<compile_context>
chip_gen: v5e
topology: v5e:2x2
jax: 0.10.0
libtpu: 0.0.40
codegen_flags: <defaults>
</compile_context>

<pallas_src>
import functools

import jax
import jax.numpy as jnp
from jax import lax
from jax.experimental import pallas as pl
from jax.experimental.pallas import tpu as pltpu


def _crnn_cell_kernel(act_ref, w_ref, b_ref, out_ref, *, ksize, H, W):
    """One grid step = one batch element.

    act_ref : (1, H+2p, W+2p, Ctot) bf16 fused activations [x | h_iter | h],
              channels-last, spatially zero-padded ("same" halo) in the wrapper.
    w_ref   : (k*k, Chid, Ctot)     bf16 per-tap fused weights (VMEM-resident).
    b_ref   : (Chid, 1)             f32 combined bias (bi + bih + bh).
    out_ref : (1, Chid, H*W)        channels-first / lane-dense output block.
    """
    hw = H * W
    ctot = act_ref.shape[-1]

    acc = None
    # k*k taps, unrolled.  Each tap is one MXU matmul with M = Chid, K = Ctot,
    # N = H*W (lane dim); partial results accumulate in f32 (in-place MRB on v7x,
    # spare-VPU adds on v5e/v6e).  No im2col slab is ever materialized.
    for kh in range(ksize):
        for kw in range(ksize):
            patch = act_ref[:, kh:kh + H, kw:kw + W, :].reshape(hw, ctot)  # (HW, Ctot)
            w_tap = w_ref[kh * ksize + kw]                                 # (Chid, Ctot)
            part = lax.dot_general(
                w_tap, patch,
                dimension_numbers=(((1,), (1,)), ((), ())),   # contract channel dims
                preferred_element_type=jnp.float32)                         # (Chid, HW)
            acc = part if acc is None else acc + part

    acc = jnp.maximum(acc + b_ref[...], 0.0)          # bias + ReLU in f32
    # Lane-dense store: last dim H*W (multiple of 128 here) -> unmasked vst; no
    # transpose of the f32 result is needed with the swapped matmul orientation.
    out_ref[0] = acc.astype(out_ref.dtype)


def _vmem_limit_bytes():
    """Generation-aware scoped-VMEM limit: 3/4 of reported per-core capacity,
    clamped so we never request more than the tightest generation's budget."""
    cap = 64 * 1024 * 1024                      # conservative fallback (v7x per-core)
    try:
        cap = int(pltpu.get_tpu_info().vmem_capacity_bytes)
    except Exception:
        pass
    return min((cap * 3) // 4, 64 * 1024 * 1024)


def crnn_cell_forward(x_nchw, hidden_iteration_nchw, hidden_nchw, params,
                      out_dtype=jnp.float32):
    """CRNNcell.forward. Inputs in PyTorch NCHW layout; output NCHW (out_dtype)."""
    wi, bi = params["i2h"]      # (Chid, Cin,  k, k), (Chid,)
    wh, bh = params["h2h"]      # (Chid, Chid, k, k), (Chid,)
    wih, bih = params["ih2ih"]  # (Chid, Chid, k, k), (Chid,)

    k = wi.shape[-1]
    assert k % 2 == 1, "CRNNcell Pallas kernel assumes odd kernel_size ('same' conv)"
    p = k // 2

    B, Cin, H, W = x_nchw.shape
    Chid = wi.shape[0]
    Ctot = Cin + 2 * Chid
    Hp, Wp = H + 2 * p, W + 2 * p
    HW = H * W

    # ---- activation prep (single fused XLA pass): concat channels [x, h_iter, h],
    #      NCHW->NHWC, spatial "same" zero-pad (halo), cast bf16.
    act = jnp.concatenate([x_nchw, hidden_iteration_nchw, hidden_nchw], axis=1)
    act = jnp.transpose(act, (0, 2, 3, 1))                        # (B, H, W, Ctot)
    act = jnp.pad(act, ((0, 0), (p, p), (p, p), (0, 0)))          # (B, Hp, Wp, Ctot)
    act = act.astype(jnp.bfloat16)

    # ---- weight prep: stack along input-channel axis in the same [x, h_iter, h]
    #      order, then arrange per-tap as (k*k, Chid, Ctot) so the kernel's per-tap
    #      dot produces (Chid, HW) directly (no transposed store).
    wcat = jnp.concatenate([wi, wih, wh], axis=1)                 # (Chid, Ctot, k, k)
    wtaps = jnp.transpose(wcat, (2, 3, 0, 1))                     # (k, k, Chid, Ctot)
    wtaps = wtaps.reshape(k * k, Chid, Ctot).astype(jnp.bfloat16)

    b_total = (bi + bih + bh).astype(jnp.float32).reshape(Chid, 1)

    kernel = functools.partial(_crnn_cell_kernel, ksize=k, H=H, W=W)

    out = pl.pallas_call(
        kernel,
        out_shape=jax.ShapeDtypeStruct((B, Chid, HW), out_dtype),
        grid=(B,),
        in_specs=[
            pl.BlockSpec((1, Hp, Wp, Ctot), lambda b: (b, 0, 0, 0)),   # fused acts
            pl.BlockSpec((k * k, Chid, Ctot), lambda b: (0, 0, 0)),    # weights (resident)
            pl.BlockSpec((Chid, 1), lambda b: (0, 0)),                 # bias (resident)
        ],
        out_specs=pl.BlockSpec((1, Chid, HW), lambda b: (b, 0, 0)),
        compiler_params=pltpu.CompilerParams(
            dimension_semantics=("parallel",),     # no cross-step scratch state -> safe
            vmem_limit_bytes=_vmem_limit_bytes(),
        ),
    )(act, wtaps, b_total)

    # (B, Chid, H*W) -> (B, Chid, H, W): minor-dim split, no transpose pass.
    return out.reshape(B, Chid, H, W)


def _reference_forward(x, hi, h, params, compute_dtype=jnp.float32):
    """Pure-JAX reference (NCHW, cross-correlation like PyTorch), f32 accumulation."""
    def conv(inp, w, b):
        pad = w.shape[-1] // 2
        out = lax.conv_general_dilated(
            inp.astype(compute_dtype), w.astype(compute_dtype),
            window_strides=(1, 1), padding=((pad, pad), (pad, pad)),
            dimension_numbers=("NCHW", "OIHW", "NCHW"),
            preferred_element_type=jnp.float32)
        return out + b.astype(jnp.float32)[None, :, None, None]

    wi, bi = params["i2h"]
    wh, bh = params["h2h"]
    wih, bih = params["ih2ih"]
    s = conv(x, wi, bi) + conv(h, wh, bh) + conv(hi, wih, bih)
    return jnp.maximum(s, 0.0)


def _init_params(key, input_size, hidden_size, kernel_size):
    ks = jax.random.split(key, 6)

    def conv_params(kw, kb, cin, cout):
        fan_in = cin * kernel_size * kernel_size
        bound = 1.0 / jnp.sqrt(fan_in)
        w = jax.random.uniform(kw, (cout, cin, kernel_size, kernel_size),
                               jnp.float32, -bound, bound)
        b = jax.random.uniform(kb, (cout,), jnp.float32, -bound, bound)
        return w, b

    return {
        "i2h": conv_params(ks[0], ks[1], input_size, hidden_size),
        "h2h": conv_params(ks[2], ks[3], hidden_size, hidden_size),
        "ih2ih": conv_params(ks[4], ks[5], hidden_size, hidden_size),
    }


if __name__ == "__main__":
    key = jax.random.PRNGKey(0)
    k_params, k_x, k_hi, k_h = jax.random.split(key, 4)

    batch, input_size, hidden_size, kernel_size = 2, 4, 32, 3
    H = W = 16

    params = _init_params(k_params, input_size, hidden_size, kernel_size)

    x = jax.random.normal(k_x, (batch, input_size, H, W), jnp.float32)
    hidden_iteration = jax.random.normal(k_hi, (batch, hidden_size, H, W), jnp.float32)
    hidden = jax.random.normal(k_h, (batch, hidden_size, H, W), jnp.float32)

    out = jax.block_until_ready(crnn_cell_forward(x, hidden_iteration, hidden, params))
    assert out.shape == (batch, hidden_size, H, W)

    # Like-for-like check (bf16-quantized inputs/weights, f32 accumulation): tight.
    ref_bf16 = jax.block_until_ready(
        _reference_forward(x, hidden_iteration, hidden, params, jnp.bfloat16))
    assert jnp.allclose(out, ref_bf16, atol=1e-3, rtol=1e-3), "mismatch vs bf16 reference"

    # Module-semantics check (full f32 reference): loose tol for the bf16 input cast.
    ref_f32 = jax.block_until_ready(
        _reference_forward(x, hidden_iteration, hidden, params, jnp.float32))
    assert jnp.allclose(out, ref_f32, atol=5e-2, rtol=5e-2), "mismatch vs f32 reference"

    print("KERNEL_OK")
</pallas_src>

<mosaic_0001>
module attributes {stable_mosaic.version = 11 : i64} {
  func.func @_crnn_cell_kernel(%arg0: i32, %arg1: memref<1x18x18x68xbf16, #tpu.memory_space<vmem>>, %arg2: memref<9x32x68xbf16, #tpu.memory_space<vmem>>, %arg3: memref<32x1xf32, #tpu.memory_space<vmem>>, %arg4: memref<1x32x256xf32, #tpu.memory_space<vmem>>) attributes {dimension_semantics = [#tpu.dimension_semantics<parallel>], iteration_bounds = array<i64: 2>, scalar_prefetch = 0 : i64, scratch_operands = 0 : i64, tpu.core_type = #tpu.core_type<tc>, window_params = [{transform_indices = @transform_0, window_bounds = array<i64: 1, 18, 18, 68>}, {pipeline_mode = #tpu.pipeline_mode<synchronous>, transform_indices = @transform_1, window_bounds = array<i64: 9, 32, 68>}, {pipeline_mode = #tpu.pipeline_mode<synchronous>, transform_indices = @transform_2, window_bounds = array<i64: 32, 1>}, {transform_indices = @transform_3, window_bounds = array<i64: 1, 32, 256>}]} {
    %c0 = arith.constant 0 : index
    %c0_0 = arith.constant 0 : index
    %c0_1 = arith.constant 0 : index
    %c0_2 = arith.constant 0 : index
    %0 = vector.load %arg1[%c0, %c0_0, %c0_1, %c0_2] : memref<1x18x18x68xbf16, #tpu.memory_space<vmem>>, vector<1x16x16x68xbf16>
    %1 = vector.shape_cast %0 : vector<1x16x16x68xbf16> to vector<256x68xbf16>
    %c0_3 = arith.constant 0 : index
    %c0_4 = arith.constant 0 : index
    %c0_5 = arith.constant 0 : index
    %2 = vector.load %arg2[%c0_3, %c0_4, %c0_5] : memref<9x32x68xbf16, #tpu.memory_space<vmem>>, vector<1x32x68xbf16>
    %3 = vector.shape_cast %2 : vector<1x32x68xbf16> to vector<32x68xbf16>
    %cst = arith.constant dense<0.000000e+00> : vector<32x256xf32>
    %4 = tpu.matmul %3, %1, %cst {dimension_numbers = #tpu.dot_dimension_numbers<[1], [1], [0], [0], [0, 0, 1, 0], [], []>} : vector<32x68xbf16>, vector<256x68xbf16>, vector<32x256xf32> -> vector<32x256xf32>
    %c0_6 = arith.constant 0 : index
    %c0_7 = arith.constant 0 : index
    %c1 = arith.constant 1 : index
    %c0_8 = arith.constant 0 : index
    %5 = vector.load %arg1[%c0_6, %c0_7, %c1, %c0_8] : memref<1x18x18x68xbf16, #tpu.memory_space<vmem>>, vector<1x16x16x68xbf16>
    %6 = vector.shape_cast %5 : vector<1x16x16x68xbf16> to vector<256x68xbf16>
    %c1_9 = arith.constant 1 : index
    %c0_10 = arith.constant 0 : index
    %c0_11 = arith.constant 0 : index
    %7 = vector.load %arg2[%c1_9, %c0_10, %c0_11] : memref<9x32x68xbf16, #tpu.memory_space<vmem>>, vector<1x32x68xbf16>
    %8 = vector.shape_cast %7 : vector<1x32x68xbf16> to vector<32x68xbf16>
    %cst_12 = arith.constant dense<0.000000e+00> : vector<32x256xf32>
    %9 = tpu.matmul %8, %6, %cst_12 {dimension_numbers = #tpu.dot_dimension_numbers<[1], [1], [0], [0], [0, 0, 1, 0], [], []>} : vector<32x68xbf16>, vector<256x68xbf16>, vector<32x256xf32> -> vector<32x256xf32>
    %10 = arith.addf %4, %9 : vector<32x256xf32>
    %c0_13 = arith.constant 0 : index
    %c0_14 = arith.constant 0 : index
    %c2 = arith.constant 2 : index
    %c0_15 = arith.constant 0 : index
    %11 = vector.load %arg1[%c0_13, %c0_14, %c2, %c0_15] : memref<1x18x18x68xbf16, #tpu.memory_space<vmem>>, vector<1x16x16x68xbf16>
    %12 = vector.shape_cast %11 : vector<1x16x16x68xbf16> to vector<256x68xbf16>
    %c2_16 = arith.constant 2 : index
    %c0_17 = arith.constant 0 : index
    %c0_18 = arith.constant 0 : index
    %13 = vector.load %arg2[%c2_16, %c0_17, %c0_18] : memref<9x32x68xbf16, #tpu.memory_space<vmem>>, vector<1x32x68xbf16>
    %14 = vector.shape_cast %13 : vector<1x32x68xbf16> to vector<32x68xbf16>
    %cst_19 = arith.constant dense<0.000000e+00> : vector<32x256xf32>
    %15 = tpu.matmul %14, %12, %cst_19 {dimension_numbers = #tpu.dot_dimension_numbers<[1], [1], [0], [0], [0, 0, 1, 0], [], []>} : vector<32x68xbf16>, vector<256x68xbf16>, vector<32x256xf32> -> vector<32x256xf32>
    %16 = arith.addf %10, %15 : vector<32x256xf32>
    %c0_20 = arith.constant 0 : index
    %c1_21 = arith.constant 1 : index
    %c0_22 = arith.constant 0 : index
    %c0_23 = arith.constant 0 : index
    %17 = vector.load %arg1[%c0_20, %c1_21, %c0_22, %c0_23] : memref<1x18x18x68xbf16, #tpu.memory_space<vmem>>, vector<1x16x16x68xbf16>
    %18 = vector.shape_cast %17 : vector<1x16x16x68xbf16> to vector<256x68xbf16>
    %c3 = arith.constant 3 : index
    %c0_24 = arith.constant 0 : index
    %c0_25 = arith.constant 0 : index
    %19 = vector.load %arg2[%c3, %c0_24, %c0_25] : memref<9x32x68xbf16, #tpu.memory_space<vmem>>, vector<1x32x68xbf16>
    %20 = vector.shape_cast %19 : vector<1x32x68xbf16> to vector<32x68xbf16>
    %cst_26 = arith.constant dense<0.000000e+00> : vector<32x256xf32>
    %21 = tpu.matmul %20, %18, %cst_26 {dimension_numbers = #tpu.dot_dimension_numbers<[1], [1], [0], [0], [0, 0, 1, 0], [], []>} : vector<32x68xbf16>, vector<256x68xbf16>, vector<32x256xf32> -> vector<32x256xf32>
    %22 = arith.addf %16, %21 : vector<32x256xf32>
    %c0_27 = arith.constant 0 : index
    %c1_28 = arith.constant 1 : index
    %c1_29 = arith.constant 1 : index
    %c0_30 = arith.constant 0 : index
    %23 = vector.load %arg1[%c0_27, %c1_28, %c1_29, %c0_30] : memref<1x18x18x68xbf16, #tpu.memory_space<vmem>>, vector<1x16x16x68xbf16>
    %24 = vector.shape_cast %23 : vector<1x16x16x68xbf16> to vector<256x68xbf16>
    %c4 = arith.constant 4 : index
    %c0_31 = arith.constant 0 : index
    %c0_32 = arith.constant 0 : index
    %25 = vector.load %arg2[%c4, %c0_31, %c0_32] : memref<9x32x68xbf16, #tpu.memory_space<vmem>>, vector<1x32x68xbf16>
    %26 = vector.shape_cast %25 : vector<1x32x68xbf16> to vector<32x68xbf16>
    %cst_33 = arith.constant dense<0.000000e+00> : vector<32x256xf32>
    %27 = tpu.matmul %26, %24, %cst_33 {dimension_numbers = #tpu.dot_dimension_numbers<[1], [1], [0], [0], [0, 0, 1, 0], [], []>} : vector<32x68xbf16>, vector<256x68xbf16>, vector<32x256xf32> -> vector<32x256xf32>
    %28 = arith.addf %22, %27 : vector<32x256xf32>
    %c0_34 = arith.constant 0 : index
    %c1_35 = arith.constant 1 : index
    %c2_36 = arith.constant 2 : index
    %c0_37 = arith.constant 0 : index
    %29 = vector.load %arg1[%c0_34, %c1_35, %c2_36, %c0_37] : memref<1x18x18x68xbf16, #tpu.memory_space<vmem>>, vector<1x16x16x68xbf16>
    %30 = vector.shape_cast %29 : vector<1x16x16x68xbf16> to vector<256x68xbf16>
    %c5 = arith.constant 5 : index
    %c0_38 = arith.constant 0 : index
    %c0_39 = arith.constant 0 : index
    %31 = vector.load %arg2[%c5, %c0_38, %c0_39] : memref<9x32x68xbf16, #tpu.memory_space<vmem>>, vector<1x32x68xbf16>
    %32 = vector.shape_cast %31 : vector<1x32x68xbf16> to vector<32x68xbf16>
    %cst_40 = arith.constant dense<0.000000e+00> : vector<32x256xf32>
    %33 = tpu.matmul %32, %30, %cst_40 {dimension_numbers = #tpu.dot_dimension_numbers<[1], [1], [0], [0], [0, 0, 1, 0], [], []>} : vector<32x68xbf16>, vector<256x68xbf16>, vector<32x256xf32> -> vector<32x256xf32>
    %34 = arith.addf %28, %33 : vector<32x256xf32>
    %c0_41 = arith.constant 0 : index
    %c2_42 = arith.constant 2 : index
    %c0_43 = arith.constant 0 : index
    %c0_44 = arith.constant 0 : index
    %35 = vector.load %arg1[%c0_41, %c2_42, %c0_43, %c0_44] : memref<1x18x18x68xbf16, #tpu.memory_space<vmem>>, vector<1x16x16x68xbf16>
    %36 = vector.shape_cast %35 : vector<1x16x16x68xbf16> to vector<256x68xbf16>
    %c6 = arith.constant 6 : index
    %c0_45 = arith.constant 0 : index
    %c0_46 = arith.constant 0 : index
    %37 = vector.load %arg2[%c6, %c0_45, %c0_46] : memref<9x32x68xbf16, #tpu.memory_space<vmem>>, vector<1x32x68xbf16>
    %38 = vector.shape_cast %37 : vector<1x32x68xbf16> to vector<32x68xbf16>
    %cst_47 = arith.constant dense<0.000000e+00> : vector<32x256xf32>
    %39 = tpu.matmul %38, %36, %cst_47 {dimension_numbers = #tpu.dot_dimension_numbers<[1], [1], [0], [0], [0, 0, 1, 0], [], []>} : vector<32x68xbf16>, vector<256x68xbf16>, vector<32x256xf32> -> vector<32x256xf32>
    %40 = arith.addf %34, %39 : vector<32x256xf32>
    %c0_48 = arith.constant 0 : index
    %c2_49 = arith.constant 2 : index
    %c1_50 = arith.constant 1 : index
    %c0_51 = arith.constant 0 : index
    %41 = vector.load %arg1[%c0_48, %c2_49, %c1_50, %c0_51] : memref<1x18x18x68xbf16, #tpu.memory_space<vmem>>, vector<1x16x16x68xbf16>
    %42 = vector.shape_cast %41 : vector<1x16x16x68xbf16> to vector<256x68xbf16>
    %c7 = arith.constant 7 : index
    %c0_52 = arith.constant 0 : index
    %c0_53 = arith.constant 0 : index
    %43 = vector.load %arg2[%c7, %c0_52, %c0_53] : memref<9x32x68xbf16, #tpu.memory_space<vmem>>, vector<1x32x68xbf16>
    %44 = vector.shape_cast %43 : vector<1x32x68xbf16> to vector<32x68xbf16>
    %cst_54 = arith.constant dense<0.000000e+00> : vector<32x256xf32>
    %45 = tpu.matmul %44, %42, %cst_54 {dimension_numbers = #tpu.dot_dimension_numbers<[1], [1], [0], [0], [0, 0, 1, 0], [], []>} : vector<32x68xbf16>, vector<256x68xbf16>, vector<32x256xf32> -> vector<32x256xf32>
    %46 = arith.addf %40, %45 : vector<32x256xf32>
    %c0_55 = arith.constant 0 : index
    %c2_56 = arith.constant 2 : index
    %c2_57 = arith.constant 2 : index
    %c0_58 = arith.constant 0 : index
    %47 = vector.load %arg1[%c0_55, %c2_56, %c2_57, %c0_58] : memref<1x18x18x68xbf16, #tpu.memory_space<vmem>>, vector<1x16x16x68xbf16>
    %48 = vector.shape_cast %47 : vector<1x16x16x68xbf16> to vector<256x68xbf16>
    %c8 = arith.constant 8 : index
    %c0_59 = arith.constant 0 : index
    %c0_60 = arith.constant 0 : index
    %49 = vector.load %arg2[%c8, %c0_59, %c0_60] : memref<9x32x68xbf16, #tpu.memory_space<vmem>>, vector<1x32x68xbf16>
    %50 = vector.shape_cast %49 : vector<1x32x68xbf16> to vector<32x68xbf16>
    %cst_61 = arith.constant dense<0.000000e+00> : vector<32x256xf32>
    %51 = tpu.matmul %50, %48, %cst_61 {dimension_numbers = #tpu.dot_dimension_numbers<[1], [1], [0], [0], [0, 0, 1, 0], [], []>} : vector<32x68xbf16>, vector<256x68xbf16>, vector<32x256xf32> -> vector<32x256xf32>
    %52 = arith.addf %46, %51 : vector<32x256xf32>
    %c0_62 = arith.constant 0 : index
    %c0_63 = arith.constant 0 : index
    %53 = vector.load %arg3[%c0_62, %c0_63] : memref<32x1xf32, #tpu.memory_space<vmem>>, vector<32x1xf32>
    %54 = vector.broadcast %53 : vector<32x1xf32> to vector<32x256xf32>
    %55 = arith.addf %52, %54 : vector<32x256xf32>
    %cst_64 = arith.constant 0.000000e+00 : f32
    %56 = vector.broadcast %cst_64 : f32 to vector<32x256xf32>
    %57 = arith.maximumf %55, %56 : vector<32x256xf32>
    %c0_65 = arith.constant 0 : index
    %c0_66 = arith.constant 0 : index
    %c0_67 = arith.constant 0 : index
    %58 = vector.load %arg4[%c0_65, %c0_66, %c0_67] : memref<1x32x256xf32, #tpu.memory_space<vmem>>, vector<1x32x256xf32>
    %59 = vector.shape_cast %58 : vector<1x32x256xf32> to vector<32x256xf32>
    %60 = vector.shape_cast %57 : vector<32x256xf32> to vector<1x32x256xf32>
    tpu.vector_store %arg4[%c0_65, %c0_66, %c0_67], %60 {strides = array<i32>} : memref<1x32x256xf32, #tpu.memory_space<vmem>>, vector<1x32x256xf32>,
    return
  }
  func.func @transform_0(%arg0: i32) -> (i32, i32, i32, i32) {
    %c0_i32 = arith.constant 0 : i32
    %c0_i32_0 = arith.constant 0 : i32
    %c0_i32_1 = arith.constant 0 : i32
    %c0_i32_2 = arith.constant 0 : i32
    return %arg0, %c0_i32, %c0_i32_0, %c0_i32_1 : i32, i32, i32, i32
  }
  func.func @transform_1(%arg0: i32) -> (i32, i32, i32) {
    %c0_i32 = arith.constant 0 : i32
    %c0_i32_0 = arith.constant 0 : i32
    %c0_i32_1 = arith.constant 0 : i32
    %c0_i32_2 = arith.constant 0 : i32
    return %c0_i32, %c0_i32_0, %c0_i32_1 : i32, i32, i32
  }
  func.func @transform_2(%arg0: i32) -> (i32, i32) {
    %c0_i32 = arith.constant 0 : i32
    %c0_i32_0 = arith.constant 0 : i32
    %c0_i32_1 = arith.constant 0 : i32
    return %c0_i32, %c0_i32_0 : i32, i32
  }
  func.func @transform_3(%arg0: i32) -> (i32, i32, i32) {
    %c0_i32 = arith.constant 0 : i32
    %c0_i32_0 = arith.constant 0 : i32
    %c0_i32_1 = arith.constant 0 : i32
    return %arg0, %c0_i32, %c0_i32_0 : i32, i32, i32
  }
}

</mosaic_0001>

<bundles_post_ra>
// kernel: tpu_custom_call.1
= control target key start
LH: loop header
LB: loop body
LE: loop exit
PB: predicated region body
PF: predicated region fallthrough
CT: control target
= control target key end

     0   :  { %8 = vsyncpa [#allocation3], 0  ;;  %s6033_s0 = inlined_call_operand.vmem [shape: bf16[2,18,18,68], index: 0, kind: input, shape index: {}]   ;;  %s6034_s1 = inlined_call_operand.vmem [shape: bf16[9,32,68], index: 1, kind: input, shape index: {}]   ;;  %s6035_s2 = inlined_call_operand.vmem [shape: f32[32,1], index: 2, kind: input, shape index: {}]   ;;  %s6036_s3 = inlined_call_operand.hbm [shape: f32[2,32,256], index: 3, kind: output, shape index: {}]  }
   0x1   :  { %10 = vsyncpa [#allocation3 + $0x1], 0  ;;  %s4524_s12 = smov 0   ;;  %s4526_s13 = smov 0  }
   0x2   :  { %s4528_s14 = smov 0   ;;  %s4530_s15 = smov 0  }
   0x3 LB: > { %s4545_s16 = sadd.s32 4294967295, %s4499_s15   ;;  %s3722_s17 = sadd.s32 4294967294, %s4499_s15   ;;  %s4499_s15 = sphi %s4530_s15, %s6052_s15   ;;  %s4495_s14 = sphi %s4528_s14, %s6051_s14   ;;  %s4491_s13 = sphi %s4526_s13, %s6050_s13   ;;  %s4487_s12 = sphi %s4524_s12, %s6049_s12  }
   0x4   : > { %s4549_s18 = sadd.s32 1, %s4499_s15   ;;  %s91_s19 = sadd.s32 1, %s4495_s14 }
   0x5   : > { %s88_s20 = ssub.s32 %s4499_s15, %s4549_s18  ;;  %p101_p0 = scmp.ne.s32.totalorder %s4495_s14, %s4491_s13 }
   0x6   : > { %p89_p1 = scmp.eq.s32.totalorder %s88_s20, 0  ;;  %p102_p2 = scmp.eq.s32.totalorder %s4545_s16, 1 }
   0x7   : > { %p107_p3 = scmp.ne.s32.totalorder %s4491_s13, %s4487_s12  ;;  %p108_p4 = scmp.eq.s32.totalorder %s3722_s17, 1 }
   0x8   : > { %s4560_s21 = scalar_select %p89_p1, %s4495_s14, %s91_s19  }
   0x9   : > { %p4562_p5 = por %p102_p2, %p101_p0  ;;  %p4566_p6 = por %p108_p4, %p107_p3 }
   0xa   : > { %p3725_p7 = scmp.ge.s32.totalorder %s4499_s15, 1  ;;  %p140_p8 = scmp.lt.s32.totalorder %s4499_s15, 3 }
   0xc   : > { %p141_p9 = pnand %p3725_p7, %p140_p8 }
   0xe   : > { %144 = sbr.rel (%p141_p9) target bundleno = 589 (0x24d), region = 32 }
  0x13   : > { %p164_p10 = scmp.lt.s32.totalorder %s4545_s16, 1  ;;  %vm671_vm0 = vcmask 556032   ;;  %vm221_vm1 = vsmask.f32 3328  ;;  %vm222_vm2 = vsmask.f32 7440 }
  0x14   : > { %vm4612_vm3 = vmor %vm221_vm1, %vm222_vm2  ;;  %vm994_vm4 = vcmask 1042432   ;;  %vm995_vm5 = vcmask 1046532   ;;  %s161_s11 = sand.u32 1, %s4491_s13   ;;  %s4371_s20 = sshll.u32 %s4545_s16, 6 }
  0x15   : > { %s165_s24 = scalar_select %p164_p10, %s4545_s16, 1  ;;  %vm4862_vm6 = vmor %vm994_vm4, %vm995_vm5 }
  0x16   : > { %s3726_s17 = sshll.u32 %s161_s11, 6  ;;  %s3656_s16 = scalar_lea.hbm %s6036_s3, %s4371_s20 }
  0x17   : > { %s4388_s25 = smul.u32 216, %s165_s24  ;;  %s5989_s19 = scalar_lea.vmem [#allocation2], %s3726_s17 }
  0x18   : > { %s3657_s26 = sshll.u32 %s5989_s19, 4  ;;  %s3659_s27 = sshll.u32 %s3656_s16, 4  ;;  %s3658_s26 = int_to_ptr.vmem [resolvable:$true] %s3657_s26  ;;  %s3660_s27 = int_to_ptr.hbm [resolvable:$true] %s3659_s27 }
  0x19   : > { %s4577_s28 = scalar_lea.vmem %s6033_s0, %s4388_s25  ;;  %s3645_s29 = scalar_lea.sflag [#allocation3], %s161_s11 }
  0x1a   : > { %v4312_v0 = vld [vmem:[%s4577_s28 + $0x54] sm:$0xff]  ;;  %v4311_v2 = vld [vmem:[%s4577_s28 + $0x48] sm:$0xff]  ;;  %v4591_v9 = vld [vmem:[%s4577_s28 + $0x5c] sm:$0x1]  ;;  %s4451_s30 = sshra.s32 %s3660_s27, 4  ;;  %s4457_s6 = scalar_lea.hbm %s6036_s3, 128  ;;  %s4452_s30 = int_to_ptr.hbm [resolvable:$true] %s4451_s30 }
  0x1b   : > { %v4320_v1 = vld [vmem:[%s4577_s28 + $0xb4] sm:$0xff]  ;;  %v4319_v3 = vld [vmem:[%s4577_s28 + $0xa8] sm:$0xff]  ;;  %v882_v6 = vsel %vm671_vm0, %v4312_v0, 0  ;;  %v879_v8 = vsel %vm671_vm0, %v4311_v2, 0  ;;  %v412_v17 = vshll.u32 %v4591_v9, 16  ;;  %v4310_v24 = vld [vmem:[%s4577_s28 + $0x3c] sm:$0xff]  ;;  %p4458_p0 = scmp.lt.s32.totalorder %s4452_s30, %s6036_s3 }
  0x1c   : > { %v183_v4 = vld [vmem:[%s4577_s28 + $0x54] sm:$0xf]  ;;  %v4585_v5 = vld [vmem:[%s4577_s28 + $0x58] sm:$0xf]  ;;  %v906_v7 = vsel %vm671_vm0, %v4320_v1, 0  ;;  %908 = vmatpush.bf16.xpose.msra.mxu2 %v882_v6  ;;  %v903_v11 = vsel %vm671_vm0, %v4319_v3, 0 }
  0x1d   : > { %v393_v10 = vshrl.u32 %v183_v4, 16  ;;  %927 = vmatpush.bf16.xpose.msra.mxu3 %v906_v7  ;;  %v396_v12 = vshll.u32 %v183_v4, 16  ;;  %v402_v13 = vshll.u32 %v4585_v5, 16  ;;  %v406_v14 = vshrl.u32 %v4585_v5, 16  ;;  %v199_v15 = vld [vmem:[%s4577_s28 + $0xb4] sm:$0xf] }
  0x1e   : > { %v4599_v18 = vld [vmem:[%s4577_s28 + $0xb8] sm:$0xf]  ;;  %v4602_v19 = vld [vmem:[%s4577_s28 + $0xbc] sm:$0x1]  ;;  %v585_v23 = vshrl.u32 %v199_v15, 16  ;;  %v414_v26 = vrot.slane %v412_v17, 5 }
  0x1f   : > { %v395_v16 = vrot.slane %v393_v10, 4  ;;  %v398_v20 = vrot.slane %v396_v12, 5  ;;  %v404_v21 = vrot.slane %v402_v13, 5  ;;  %v408_v22 = vrot.slane %v406_v14, 4  ;;  %v4318_v25 = vld [vmem:[%s4577_s28 + $0x9c] sm:$0xff] }
  0x20   : > { %v588_v27 = vshll.u32 %v199_v15, 16  ;;  %v594_v28 = vshll.u32 %v4599_v18, 16  ;;  %v598_v29 = vshrl.u32 %v4599_v18, 16  ;;  %v587_v32 = vrot.slane %v585_v23, 4  ;;  %v181_v34 = vld [vmem:[%s4577_s28 + $0x48] sm:$0xf] }
  0x21   : > { %v399_v30 = vor.u32 %v398_v20, %v395_v16  ;;  %v409_v31 = vor.u32 %v408_v22, %v404_v21  ;;  %v604_v33 = vshll.u32 %v4602_v19, 16  ;;  %v876_v39 = vsel %vm671_vm0, %v4310_v24, 0  ;;  %v4618_v40 = vld [vmem:[%s4577_s28 + $0x4c] sm:$0xf]  ;;  %v4626_v51 = vld [vmem:[%s4577_s28 + $0x50] sm:$0x1] }
  0x22   : > { %v590_v36 = vrot.slane %v588_v27, 5  ;;  %v596_v37 = vrot.slane %v594_v28, 5  ;;  %v600_v38 = vrot.slane %v598_v29, 4  ;;  %v900_v44 = vsel %vm671_vm0, %v4318_v25, 0  ;;  %v197_v62 = vld [vmem:[%s4577_s28 + $0xa8] sm:$0xf] }
  0x23   : > { %v400_v41 = vrot.slane %v399_v30, 4  ;;  %v410_v42 = vrot.slane %v409_v31, 4  ;;  %v606_v43 = vrot.slane %v604_v33, 5  ;;  %v369_v47 = vshrl.u32 %v181_v34, 16  ;;  %v4637_v3 = vld [vmem:[%s4577_s28 + $0xac] sm:$0xf] }
  0x24   : > { %v591_v45 = vor.u32 %v590_v36, %v587_v32  ;;  %v601_v46 = vor.u32 %v600_v38, %v596_v37  ;;  %v372_v48 = vshll.u32 %v181_v34, 16  ;;  %909 = vmatpush.bf16.xpose.msra.mxu2 %v879_v8  ;;  %v378_v52 = vshll.u32 %v4618_v40, 16  ;;  %v4640_v10 = vld [vmem:[%s4577_s28 + $0xb0] sm:$0x1]  ;;  %v179_v27 = vld [vmem:[%s4577_s28 + $0x3c] sm:$0xf] }
  0x25   : > { %928 = vmatpush.bf16.xpose.msra.mxu3 %v903_v11  ;;  %v405_v49 = vsel %vm4612_vm3, %v400_v41, %v404_v21  ;;  %v415_v50 = vsel %vm4612_vm3, %v410_v42, %v414_v26  ;;  %v382_v53 = vshrl.u32 %v4618_v40, 16  ;;  %v371_v58 = vrot.slane %v369_v47, 4  ;;  %v4309_v21 = vld [vmem:[%s4577_s28 + $0x30] sm:$0xff]  ;;  %v4658_v38 = vld [vmem:[%s4577_s28 + $0x44] sm:$0x1] }
  0x26   : > { %v637_v54 = vunpack.c.l.b16 %v405_v49  ;;  %v638_v55 = vunpack.c.l.b16 %v415_v50  ;;  %v592_v56 = vrot.slane %v591_v45, 4  ;;  %v602_v57 = vrot.slane %v601_v46, 4  ;;  %v4317_v22 = vld [vmem:[%s4577_s28 + $0x90] sm:$0xff]  ;;  %v4266_v35 = vld [vmem:[%s4577_s28 + $0xc0] sm:$0xe] }
  0x27   : > { %v374_v59 = vrot.slane %v372_v48, 5  ;;  %v380_v60 = vrot.slane %v378_v52, 5  ;;  %v384_v61 = vrot.slane %v382_v53, 4  ;;  %v388_v2 = vshll.u32 %v4626_v51, 16  ;;  %v195_v53 = vld [vmem:[%s4577_s28 + $0x9c] sm:$0xf] }
  0x28   : > { %v662_v63 = vpack.c.b16 %v638_v55, %v637_v54  ;;  %v597_v0 = vsel %vm4612_vm3, %v592_v56, %v596_v37  ;;  %v607_v1 = vsel %vm4612_vm3, %v602_v57, %v606_v43  ;;  %v561_v13 = vshrl.u32 %v197_v62, 16  ;;  %v4655_v37 = vld [vmem:[%s4577_s28 + $0x40] sm:$0xf] }
  0x29   : > { %v653_v4 = vunpack.c.l.b16 %v597_v0  ;;  %v654_v6 = vunpack.c.l.b16 %v607_v1  ;;  %v375_v7 = vor.u32 %v374_v59, %v371_v58  ;;  %v385_v8 = vor.u32 %v384_v61, %v380_v60  ;;  %v4670_v58 = vld [vmem:[%s4577_s28 + $0xa0] sm:$0xf] }
  0x2a   : > { %v700_v11 = vsel %vm671_vm0, %v662_v63, 0  ;;  %v390_v12 = vrot.slane %v388_v2, 5  ;;  %v564_v14 = vshll.u32 %v197_v62, 16  ;;  %v570_v20 = vshll.u32 %v4637_v3, 16  ;;  %v4673_v63 = vld [vmem:[%s4577_s28 + $0xa4] sm:$0x1] }
  0x2b   : > { %726 = vmatpush.bf16.xpose.msra.mxu0 %v700_v11  ;;  %v670_v15 = vpack.c.b16 %v654_v6, %v653_v4  ;;  %v376_v16 = vrot.slane %v375_v7, 4  ;;  %v386_v17 = vrot.slane %v385_v8, 4  ;;  %v563_v23 = vrot.slane %v561_v13, 4  ;;  %v4308_v6 = vld [vmem:[%s4577_s28 + $0x24] sm:$0xff] }
  0x2c   : > { %v566_v24 = vrot.slane %v564_v14, 5  ;;  %v574_v25 = vshrl.u32 %v4637_v3, 16  ;;  %v580_v26 = vshll.u32 %v4640_v10, 16  ;;  %910 = vmatpush.bf16.xpose.msra.mxu2 %v876_v39  ;;  %v572_v31 = vrot.slane %v570_v20, 5 }
  0x2d   : > { %v724_v28 = vsel %vm671_vm0, %v670_v15, 0  ;;  %929 = vmatpush.bf16.xpose.msra.mxu3 %v900_v44  ;;  %v381_v29 = vsel %vm4612_vm3, %v376_v16, %v380_v60  ;;  %v391_v30 = vsel %vm4612_vm3, %v386_v17, %v390_v12  ;;  %v873_v39 = vsel %vm671_vm0, %v4309_v21, 0  ;;  %v4316_v17 = vld [vmem:[%s4577_s28 + $0x84] sm:$0xff] }
  0x2e   : > { %745 = vmatpush.bf16.xpose.msra.mxu1 %v724_v28  ;;  %v635_v32 = vunpack.c.l.b16 %v381_v29  ;;  %v636_v33 = vunpack.c.l.b16 %v391_v30  ;;  %v567_v34 = vor.u32 %v566_v24, %v563_v23  ;;  %v576_v36 = vrot.slane %v574_v25, 4  ;;  %v177_v24 = vld [vmem:[%s4577_s28 + $0x30] sm:$0xf]  ;;  %v4687_v29 = vld [vmem:[%s4577_s28 + $0x34] sm:$0xf] }
  0x2f   : > { %v582_v41 = vrot.slane %v580_v26, 5  ;;  %v897_v42 = vsel %vm671_vm0, %v4317_v22, 0  ;;  %v345_v43 = vshrl.u32 %v179_v27, 16  ;;  %v348_v47 = vshll.u32 %v179_v27, 16 }
  0x30   : > { %v661_v44 = vpack.c.b16 %v636_v33, %v635_v32  ;;  %v568_v45 = vrot.slane %v567_v34, 4  ;;  %v577_v46 = vor.u32 %v576_v36, %v572_v31  ;;  %v354_v49 = vshll.u32 %v4655_v37, 16  ;;  %v4693_v34 = vld [vmem:[%s4577_s28 + $0x38] sm:$0x1] }
  0x31   : > { %v347_v48 = vrot.slane %v345_v43, 4  ;;  %v358_v50 = vshrl.u32 %v4655_v37, 16  ;;  %v364_v52 = vshll.u32 %v4658_v38, 16  ;;  %v350_v57 = vrot.slane %v348_v47, 5 }
  0x32   : > { %v697_v54 = vsel %vm671_vm0, %v661_v44, 0  ;;  %v573_v55 = vsel %vm4612_vm3, %v568_v45, %v572_v31  ;;  %v578_v56 = vrot.slane %v577_v46, 4  ;;  %v356_v60 = vrot.slane %v354_v49, 5 }
  0x33   : > { %727 = vmatpush.bf16.xpose.msra.mxu0 %v697_v54  ;;  %v651_v59 = vunpack.c.l.b16 %v573_v55  ;;  %v360_v61 = vrot.slane %v358_v50, 4  ;;  %v366_v62 = vrot.slane %v364_v52, 5  ;;  %v351_v1 = vor.u32 %v350_v57, %v347_v48  ;;  %v193_v52 = vld [vmem:[%s4577_s28 + $0x90] sm:$0xf] }
  0x34   : > { %v583_v0 = vsel %vm4612_vm3, %v578_v56, %v582_v41  ;;  %v537_v2 = vshrl.u32 %v195_v53, 16  ;;  %v540_v4 = vshll.u32 %v195_v53, 16  ;;  %911 = vmatpush.bf16.xpose.msra.mxu2 %v873_v39  ;;  %v546_v11 = vshll.u32 %v4670_v58, 16  ;;  %v4703_v53 = vld [vmem:[%s4577_s28 + $0x94] sm:$0xf] }
  0x35   : > { %v652_v7 = vunpack.c.l.b16 %v583_v0  ;;  %930 = vmatpush.bf16.xpose.msra.mxu3 %v897_v42  ;;  %v361_v8 = vor.u32 %v360_v61, %v356_v60  ;;  %v550_v12 = vshrl.u32 %v4670_v58, 16  ;;  %v352_v13 = vrot.slane %v351_v1, 4 }
  0x36   : > { %v539_v14 = vrot.slane %v537_v2, 4  ;;  %v542_v15 = vrot.slane %v540_v4, 5  ;;  %v556_v16 = vshll.u32 %v4673_v63, 16  ;;  %v548_v22 = vrot.slane %v546_v11, 5 }
  0x37   : > { %v669_v20 = vpack.c.b16 %v652_v7, %v651_v59  ;;  %v362_v21 = vrot.slane %v361_v8, 4  ;;  %v552_v23 = vrot.slane %v550_v12, 4  ;;  %v357_v25 = vsel %vm4612_vm3, %v352_v13, %v356_v60  ;;  %v4708_v59 = vld [vmem:[%s4577_s28 + $0x98] sm:$0x1] }
  0x38   : > { %v543_v26 = vor.u32 %v542_v15, %v539_v14  ;;  %v558_v27 = vrot.slane %v556_v16, 5  ;;  %v870_v28 = vsel %vm671_vm0, %v4308_v6, 0  ;;  %v633_v32 = vunpack.c.l.b16 %v357_v25  ;;  %v4307_v7 = vld [vmem:[%s4577_s28 + $0x18] sm:$0xff] }
  0x39   : > { %v721_v30 = vsel %vm671_vm0, %v669_v20, 0  ;;  %v367_v31 = vsel %vm4612_vm3, %v362_v21, %v366_v62  ;;  %v553_v33 = vor.u32 %v552_v23, %v548_v22  ;;  %v894_v39 = vsel %vm671_vm0, %v4316_v17, 0  ;;  %v4315_v8 = vld [vmem:[%s4577_s28 + $0x78] sm:$0xff]  ;;  %v175_v21 = vld [vmem:[%s4577_s28 + $0x24] sm:$0xf] }
  0x3a   : > { %746 = vmatpush.bf16.xpose.msra.mxu1 %v721_v30  ;;  %v634_v36 = vunpack.c.l.b16 %v367_v31  ;;  %v544_v41 = vrot.slane %v543_v26, 4  ;;  %v321_v42 = vshrl.u32 %v177_v24, 16  ;;  %v324_v44 = vshll.u32 %v177_v24, 16  ;;  %v4719_v26 = vld [vmem:[%s4577_s28 + $0x28] sm:$0xf] }
  0x3b   : > { %v554_v43 = vrot.slane %v553_v33, 4  ;;  %v330_v45 = vshll.u32 %v4687_v29, 16  ;;  %v334_v46 = vshrl.u32 %v4687_v29, 16  ;;  %v340_v50 = vshll.u32 %v4693_v34, 16 }
  0x3c   : > { %v660_v47 = vpack.c.b16 %v634_v36, %v633_v32  ;;  %v549_v48 = vsel %vm4612_vm3, %v544_v41, %v548_v22  ;;  %v323_v49 = vrot.slane %v321_v42, 4  ;;  %912 = vmatpush.bf16.xpose.msra.mxu2 %v870_v28  ;;  %v326_v56 = vrot.slane %v324_v44, 5  ;;  %v4726_v32 = vld [vmem:[%s4577_s28 + $0x2c] sm:$0x1] }
  0x3d   : > { %v559_v54 = vsel %vm4612_vm3, %v554_v43, %v558_v27  ;;  %v649_v55 = vunpack.c.l.b16 %v549_v48  ;;  %931 = vmatpush.bf16.xpose.msra.mxu3 %v894_v39  ;;  %v332_v57 = vrot.slane %v330_v45, 5  ;;  %v336_v62 = vrot.slane %v334_v46, 4 }
  0x3e   : > { %v694_v60 = vsel %vm671_vm0, %v660_v47, 0  ;;  %v650_v61 = vunpack.c.l.b16 %v559_v54  ;;  %v342_v0 = vrot.slane %v340_v50, 5  ;;  %v327_v1 = vor.u32 %v326_v56, %v323_v49  ;;  %v191_v50 = vld [vmem:[%s4577_s28 + $0x84] sm:$0xf] }
  0x3f   : > { %728 = vmatpush.bf16.xpose.msra.mxu0 %v694_v60  ;;  %v513_v2 = vshrl.u32 %v193_v52, 16  ;;  %v516_v4 = vshll.u32 %v193_v52, 16  ;;  %v522_v6 = vshll.u32 %v4703_v53, 16  ;;  %v337_v12 = vor.u32 %v336_v62, %v332_v57 }
  0x40   : > { %v668_v11 = vpack.c.b16 %v650_v61, %v649_v55  ;;  %v526_v13 = vshrl.u32 %v4703_v53, 16  ;;  %v532_v14 = vshll.u32 %v4708_v59, 16  ;;  %v328_v15 = vrot.slane %v327_v1, 4  ;;  %v4742_v1 = vld [vmem:[%s4577_s28 + $0x8c] sm:$0x1] }
  0x41   : > { %v515_v16 = vrot.slane %v513_v2, 4  ;;  %v518_v17 = vrot.slane %v516_v4, 5  ;;  %v524_v20 = vrot.slane %v522_v6, 5  ;;  %v338_v23 = vrot.slane %v337_v12, 4 }
  0x42   : > { %v718_v22 = vsel %vm671_vm0, %v668_v11, 0  ;;  %v528_v24 = vrot.slane %v526_v13, 4  ;;  %v534_v25 = vrot.slane %v532_v14, 5  ;;  %v333_v27 = vsel %vm4612_vm3, %v328_v15, %v332_v57  ;;  %v4737_v57 = vld [vmem:[%s4577_s28 + $0x88] sm:$0xf] }
  0x43   : > { %747 = vmatpush.bf16.xpose.msra.mxu1 %v718_v22  ;;  %v519_v28 = vor.u32 %v518_v17, %v515_v16  ;;  %v867_v30 = vsel %vm671_vm0, %v4307_v7, 0  ;;  %v891_v31 = vsel %vm671_vm0, %v4315_v8, 0  ;;  %v343_v33 = vsel %vm4612_vm3, %v338_v23, %v342_v0  ;;  %v4306_v8 = vld [vmem:[%s4577_s28 + $0xc] sm:$0xff] }
  0x44   : > { %v631_v36 = vunpack.c.l.b16 %v333_v27  ;;  %v529_v41 = vor.u32 %v528_v24, %v524_v20  ;;  %v297_v39 = vshrl.u32 %v175_v21, 16  ;;  %v632_v42 = vunpack.c.l.b16 %v343_v33  ;;  %913 = vmatpush.bf16.xpose.msra.mxu2 %v867_v30  ;;  %v173_v27 = vld [vmem:[%s4577_s28 + $0x18] sm:$0xf] }
  0x45   : > { %v520_v43 = vrot.slane %v519_v28, 4  ;;  %932 = vmatpush.bf16.xpose.msra.mxu3 %v891_v31  ;;  %v300_v44 = vshll.u32 %v175_v21, 16  ;;  %v306_v45 = vshll.u32 %v4719_v26, 16  ;;  %v310_v48 = vshrl.u32 %v4719_v26, 16  ;;  %v4314_v21 = vld [vmem:[%s4577_s28 + $0x6c] sm:$0xff] }
  0x46   : > { %v530_v46 = vrot.slane %v529_v41, 4  ;;  %v299_v47 = vrot.slane %v297_v39, 4  ;;  %v316_v49 = vshll.u32 %v4726_v32, 16  ;;  %v659_v52 = vpack.c.b16 %v632_v42, %v631_v36  ;;  %v4756_v36 = vld [vmem:[%s4577_s28 + $0x1c] sm:$0xf] }
  0x47   : > { %v525_v54 = vsel %vm4612_vm3, %v520_v43, %v524_v20  ;;  %v302_v55 = vrot.slane %v300_v44, 5  ;;  %v308_v56 = vrot.slane %v306_v45, 5  ;;  %v312_v62 = vrot.slane %v310_v48, 4  ;;  %v4761_v44 = vld [vmem:[%s4577_s28 + $0x20] sm:$0x1] }
  0x48   : > { %v535_v60 = vsel %vm4612_vm3, %v530_v46, %v534_v25  ;;  %v647_v61 = vunpack.c.l.b16 %v525_v54  ;;  %v318_v0 = vrot.slane %v316_v49, 5  ;;  %v691_v2 = vsel %vm671_vm0, %v659_v52, 0 }
  0x49   : > { %v648_v4 = vunpack.c.l.b16 %v535_v60  ;;  %v303_v6 = vor.u32 %v302_v55, %v299_v47  ;;  %v489_v7 = vshrl.u32 %v191_v50, 16  ;;  %729 = vmatpush.bf16.xpose.msra.mxu0 %v691_v2  ;;  %v313_v11 = vor.u32 %v312_v62, %v308_v56  ;;  %v189_v62 = vld [vmem:[%s4577_s28 + $0x78] sm:$0xf] }
  0x4a   : > { %v492_v12 = vshll.u32 %v191_v50, 16  ;;  %v498_v13 = vshll.u32 %v4737_v57, 16  ;;  %v502_v14 = vshrl.u32 %v4737_v57, 16  ;;  %v508_v20 = vshll.u32 %v4742_v1, 16 }
  0x4b   : > { %v667_v15 = vpack.c.b16 %v648_v4, %v647_v61  ;;  %v304_v16 = vrot.slane %v303_v6, 4  ;;  %v491_v17 = vrot.slane %v489_v7, 4  ;;  %v314_v22 = vrot.slane %v313_v11, 4  ;;  %v4773_v7 = vld [vmem:[%s4577_s28 + $0x7c] sm:$0xf] }
  0x4c   : > { %v494_v23 = vrot.slane %v492_v12, 5  ;;  %v500_v24 = vrot.slane %v498_v13, 5  ;;  %v504_v25 = vrot.slane %v502_v14, 4  ;;  %v510_v31 = vrot.slane %v508_v20, 5  ;;  %v4777_v14 = vld [vmem:[%s4577_s28 + $0x80] sm:$0x1] }
  0x4d   : > { %v715_v28 = vsel %vm671_vm0, %v667_v15, 0  ;;  %v309_v30 = vsel %vm4612_vm3, %v304_v16, %v308_v56  ;;  %v864_v33 = vsel %vm671_vm0, %v4306_v8, 0  ;;  %v319_v41 = vsel %vm4612_vm3, %v314_v22, %v318_v0 }
  0x4e   : > { %748 = vmatpush.bf16.xpose.msra.mxu1 %v715_v28  ;;  %v629_v39 = vunpack.c.l.b16 %v309_v30  ;;  %v495_v42 = vor.u32 %v494_v23, %v491_v17  ;;  %v505_v43 = vor.u32 %v504_v25, %v500_v24  ;;  %914 = vmatpush.bf16.xpose.msra.mxu2 %v864_v33  ;;  %v630_v45 = vunpack.c.l.b16 %v319_v41  ;;  %v4305_v25 = vld [vmem:[%s4577_s28] sm:$0xff] }
  0x4f   : > { %v888_v46 = vsel %vm671_vm0, %v4314_v21, 0  ;;  %v273_v47 = vshrl.u32 %v173_v27, 16  ;;  %v276_v48 = vshll.u32 %v173_v27, 16  ;;  %v282_v52 = vshll.u32 %v4756_v36, 16  ;;  %v4313_v27 = vld [vmem:[%s4577_s28 + $0x60] sm:$0xff] }
  0x50   : > { %v496_v49 = vrot.slane %v495_v42, 4  ;;  %v506_v50 = vrot.slane %v505_v43, 4  ;;  %933 = vmatpush.bf16.xpose.msra.mxu3 %v888_v46  ;;  %v286_v54 = vshrl.u32 %v4756_v36, 16  ;;  %v658_v55 = vpack.c.b16 %v630_v45, %v629_v39  ;;  %v4334_v41 = vld [vmem:[%s4577_s28 + $0x60] sm:$0xff] }
  0x51   : > { %v275_v56 = vrot.slane %v273_v47, 4  ;;  %v278_v60 = vrot.slane %v276_v48, 5  ;;  %v292_v61 = vshll.u32 %v4761_v44, 16  ;;  %v284_v4 = vrot.slane %v282_v52, 5  ;;  %v4342_v39 = vld [vmem:[%s4577_s28 + $0xc0] sm:$0xff] }
  0x52   : > { %v501_v0 = vsel %vm4612_vm3, %v496_v49, %v500_v24  ;;  %v511_v2 = vsel %vm4612_vm3, %v506_v50, %v510_v31  ;;  %v288_v6 = vrot.slane %v286_v54, 4  ;;  %v688_v8 = vsel %vm671_vm0, %v658_v55, 0  ;;  %v171_v47 = vld [vmem:[%s4577_s28 + $0xc] sm:$0xf]  ;;  %v4793_v54 = vld [vmem:[%s4577_s28 + $0x10] sm:$0xf] }
  0x53   : > { %v645_v11 = vunpack.c.l.b16 %v501_v0  ;;  %v646_v12 = vunpack.c.l.b16 %v511_v2  ;;  %v279_v13 = vor.u32 %v278_v60, %v275_v56  ;;  %730 = vmatpush.bf16.xpose.msra.mxu0 %v688_v8  ;;  %v294_v16 = vrot.slane %v292_v61, 5 }
  0x54   : > { %v289_v15 = vor.u32 %v288_v6, %v284_v4  ;;  %v465_v17 = vshrl.u32 %v189_v62, 16  ;;  %v468_v20 = vshll.u32 %v189_v62, 16  ;;  %v474_v23 = vshll.u32 %v4773_v7, 16  ;;  %v4798_v62 = vld [vmem:[%s4577_s28 + $0x14] sm:$0x1] }
  0x55   : > { %v666_v21 = vpack.c.b16 %v646_v12, %v645_v11  ;;  %v280_v22 = vrot.slane %v279_v13, 4  ;;  %v478_v24 = vshrl.u32 %v4773_v7, 16  ;;  %v484_v33 = vshll.u32 %v4777_v14, 16 }
  0x56   : > { %v290_v28 = vrot.slane %v289_v15, 4  ;;  %v467_v30 = vrot.slane %v465_v17, 4  ;;  %v470_v31 = vrot.slane %v468_v20, 5  ;;  %v476_v45 = vrot.slane %v474_v23, 5  ;;  %v187_v15 = vld [vmem:[%s4577_s28 + $0x6c] sm:$0xf] }
  0x57   : > { %v712_v42 = vsel %vm671_vm0, %v666_v21, 0  ;;  %v285_v43 = vsel %vm4612_vm3, %v280_v22, %v284_v4  ;;  %v480_v46 = vrot.slane %v478_v24, 4  ;;  %v486_v52 = vrot.slane %v484_v33, 5  ;;  %v4809_v22 = vld [vmem:[%s4577_s28 + $0x70] sm:$0xf] }
  0x58   : > { %749 = vmatpush.bf16.xpose.msra.mxu1 %v712_v42  ;;  %v295_v48 = vsel %vm4612_vm3, %v290_v28, %v294_v16  ;;  %v627_v49 = vunpack.c.l.b16 %v285_v43  ;;  %v471_v50 = vor.u32 %v470_v31, %v467_v30  ;;  %v861_v60 = vsel %vm671_vm0, %v4305_v25, 0  ;;  %v4815_v28 = vld [vmem:[%s4577_s28 + $0x74] sm:$0x1] }
  0x59   : > { %v628_v55 = vunpack.c.l.b16 %v295_v48  ;;  %v481_v56 = vor.u32 %v480_v46, %v476_v45  ;;  %v885_v61 = vsel %vm671_vm0, %v4313_v27, 0  ;;  %915 = vmatpush.bf16.xpose.msra.mxu2 %v861_v60  ;;  %v1428_v2 = vsel %vm671_vm0, %v4334_v41, 0  ;;  %v4333_v46 = vld [vmem:[%s4577_s28 + $0x54] sm:$0xff] }
  0x5a   : > { %v472_v0 = vrot.slane %v471_v50, 4  ;;  %934 = vmatpush.bf16.xpose.msra.mxu3 %v885_v61  ;;  %v1452_v4 = vsel %vm671_vm0, %v4342_v39, 0  ;;  %v249_v6 = vshrl.u32 %v171_v47, 16  ;;  %v252_v12 = vshll.u32 %v171_v47, 16  ;;  %v4341_v47 = vld [vmem:[%s4577_s28 + $0xb4] sm:$0xff] }
  0x5b   : > { %v657_v8 = vpack.c.b16 %v628_v55, %v627_v49  ;;  %v482_v11 = vrot.slane %v481_v56, 4  ;;  %v258_v13 = vshll.u32 %v4793_v54, 16  ;;  %v262_v20 = vshrl.u32 %v4793_v54, 16 }
  0x5c   : > { %v477_v16 = vsel %vm4612_vm3, %v472_v0, %v476_v45  ;;  %v251_v17 = vrot.slane %v249_v6, 4  ;;  %v268_v21 = vshll.u32 %v4798_v62, 16  ;;  %v254_v27 = vrot.slane %v252_v12, 5  ;;  %v169_v0 = vld [vmem:[%s4577_s28] sm:$0xf] }
  0x5d   : > { %v685_v23 = vsel %vm671_vm0, %v657_v8, 0  ;;  %v487_v24 = vsel %vm4612_vm3, %v482_v11, %v486_v52  ;;  %v643_v25 = vunpack.c.l.b16 %v477_v16  ;;  %v260_v31 = vrot.slane %v258_v13, 5  ;;  %v4825_v11 = vld [vmem:[%s4577_s28 + $0x4] sm:$0xf] }
  0x5e   : > { %731 = vmatpush.bf16.xpose.msra.mxu0 %v685_v23  ;;  %v644_v30 = vunpack.c.l.b16 %v487_v24  ;;  %v264_v33 = vrot.slane %v262_v20, 4  ;;  %v270_v41 = vrot.slane %v268_v21, 5  ;;  %v255_v39 = vor.u32 %v254_v27, %v251_v17  ;;  %v4832_v17 = vld [vmem:[%s4577_s28 + $0x8] sm:$0x1] }
  0x5f   : > { %v441_v42 = vshrl.u32 %v187_v15, 16  ;;  %v444_v43 = vshll.u32 %v187_v15, 16  ;;  %v450_v45 = vshll.u32 %v4809_v22, 16  ;;  %v454_v50 = vshrl.u32 %v4809_v22, 16 }
  0x60   : > { %v665_v48 = vpack.c.b16 %v644_v30, %v643_v25  ;;  %v265_v49 = vor.u32 %v264_v33, %v260_v31  ;;  %v460_v52 = vshll.u32 %v4815_v28, 16  ;;  %v256_v55 = vrot.slane %v255_v39, 4 }
  0x61   : > { %1454 = vmatpush.bf16.xpose.msrb.mxu2 %v1428_v2  ;;  %v443_v56 = vrot.slane %v441_v42, 4  ;;  %v446_v60 = vrot.slane %v444_v43, 5  ;;  %v452_v61 = vrot.slane %v450_v45, 5  ;;  %v456_v6 = vrot.slane %v454_v50, 4  ;;  %v185_v45 = vld [vmem:[%s4577_s28 + $0x60] sm:$0xf] }
  0x62   : > { %1473 = vmatpush.bf16.xpose.msrb.mxu3 %v1452_v4  ;;  %v709_v2 = vsel %vm671_vm0, %v665_v48, 0  ;;  %v266_v4 = vrot.slane %v265_v49, 4  ;;  %v462_v8 = vrot.slane %v460_v52, 5  ;;  %v261_v12 = vsel %vm4612_vm3, %v256_v55, %v260_v31  ;;  %v4843_v49 = vld [vmem:[%s4577_s28 + $0x64] sm:$0xf] }
  0x63   : > { %750 = vmatpush.bf16.xpose.msra.mxu1 %v709_v2  ;;  %v447_v13 = vor.u32 %v446_v60, %v443_v56  ;;  %v1425_v15 = vsel %vm671_vm0, %v4333_v46, 0  ;;  %v1449_v16 = vsel %vm671_vm0, %v4341_v47, 0  ;;  %v625_v21 = vunpack.c.l.b16 %v261_v12  ;;  %v4848_v60 = vld [vmem:[%s4577_s28 + $0x68] sm:$0x1] }
  0x64   : > { %v271_v20 = vsel %vm4612_vm3, %v266_v4, %v270_v41  ;;  %v457_v23 = vor.u32 %v456_v6, %v452_v61  ;;  %v225_v24 = vshrl.u32 %v169_v0, 16  ;;  %v228_v30 = vshll.u32 %v169_v0, 16 }
  0x65   : > { %v626_v25 = vunpack.c.l.b16 %v271_v20  ;;  %v448_v27 = vrot.slane %v447_v13, 4  ;;  %v234_v31 = vshll.u32 %v4825_v11, 16  ;;  %v238_v42 = vshrl.u32 %v4825_v11, 16 }
  0x66   : > { %v458_v33 = vrot.slane %v457_v23, 4  ;;  %v227_v39 = vrot.slane %v225_v24, 4  ;;  %v244_v43 = vshll.u32 %v4832_v17, 16  ;;  %v230_v47 = vrot.slane %v228_v30, 5  ;;  %v953_v30 = vld [vmem:[%s4577_s28 + $0x54] sm:$0xe] }
  0x67   : > { %v656_v41 = vpack.c.b16 %v626_v25, %v625_v21  ;;  %v453_v46 = vsel %vm4612_vm3, %v448_v27, %v452_v61  ;;  %v236_v48 = vrot.slane %v234_v31, 5  ;;  %v240_v55 = vrot.slane %v238_v42, 4  ;;  %v961_v42 = vld [vmem:[%s4577_s28 + $0xb4] sm:$0xe] }
  0x68   : > { %v463_v50 = vsel %vm4612_vm3, %v458_v33, %v462_v8  ;;  %v641_v52 = vunpack.c.l.b16 %v453_v46  ;;  %v246_v56 = vrot.slane %v244_v43, 5  ;;  %v231_v4 = vor.u32 %v230_v47, %v227_v39 }
  0x69   : > { %1455 = vmatpush.bf16.xpose.msrb.mxu2 %v1425_v15  ;;  %v682_v0 = vsel %vm671_vm0, %v656_v41, 0  ;;  %v642_v2 = vunpack.c.l.b16 %v463_v50  ;;  %v417_v6 = vshrl.u32 %v185_v45, 16  ;;  %v241_v61 = vor.u32 %v240_v55, %v236_v48 }
  0x6a   : > { %1474 = vmatpush.bf16.xpose.msrb.mxu3 %v1449_v16  ;;  %732 = vmatpush.bf16.xpose.msra.mxu0 %v682_v0  ;;  %v420_v12 = vshll.u32 %v185_v45, 16  ;;  %v426_v13 = vshll.u32 %v4843_v49, 16  ;;  %v430_v15 = vshrl.u32 %v4843_v49, 16  ;;  %v232_v16 = vrot.slane %v231_v4, 4 }
  0x6b   : > { %v664_v8 = vpack.c.b16 %v642_v2, %v641_v52  ;;  %v419_v20 = vrot.slane %v417_v6, 4  ;;  %v436_v21 = vshll.u32 %v4848_v60, 16  ;;  %v242_v23 = vrot.slane %v241_v61, 4 }
  0x6c   : > { %v422_v24 = vrot.slane %v420_v12, 5  ;;  %v428_v25 = vrot.slane %v426_v13, 5  ;;  %v432_v27 = vrot.slane %v430_v15, 4  ;;  %v237_v33 = vsel %vm4612_vm3, %v232_v16, %v236_v48 }
  0x6d   : > { %v706_v31 = vsel %vm671_vm0, %v664_v8, 0  ;;  %v438_v39 = vrot.slane %v436_v21, 5  ;;  %v247_v43 = vsel %vm4612_vm3, %v242_v23, %v246_v56  ;;  %v623_v45 = vunpack.c.l.b16 %v237_v33  ;;  %v4332_v56 = vld [vmem:[%s4577_s28 + $0x48] sm:$0xff] }
  0x6e   : > { %751 = vmatpush.bf16.xpose.msra.mxu1 %v706_v31  ;;  %v423_v41 = vor.u32 %v422_v24, %v419_v20  ;;  %v433_v46 = vor.u32 %v432_v27, %v428_v25  ;;  %v624_v47 = vunpack.c.l.b16 %v247_v43  ;;  %v3827_v50 = vrot.slane %v953_v30, 9  ;;  %v952_v20 = vld [vmem:[%s4577_s28 + $0x48] sm:$0xe] }
  0x6f   : > { %v1048_v52 = vrot.slane %v4585_v5, 5  ;;  %v1051_v2 = vrot.slane %v4591_v9, 5  ;;  %v3835_v4 = vrot.slane %v961_v42, 9  ;;  %v1104_v13 = vrot.slane %v4599_v18, 5  ;;  %v4340_v5 = vld [vmem:[%s4577_s28 + $0xa8] sm:$0xff] }
  0x70   : > { %v424_v55 = vrot.slane %v423_v41, 4  ;;  %v434_v48 = vrot.slane %v433_v46, 4  ;;  %v655_v6 = vpack.c.b16 %v624_v47, %v623_v45  ;;  %v1107_v9 = vrot.slane %v4602_v19, 5  ;;  %v960_v33 = vld [vmem:[%s4577_s28 + $0xa8] sm:$0xe]  ;;  %v4321_v19 = vld [vmem:[%s6034_s1] sm:$0xff] }
  0x71   : > { %v1049_v61 = vsel %vm4862_vm6, %v3827_v50, %v1048_v52  ;;  %v1050_v12 = vrot.slane %v1048_v52, 4  ;;  %v1106_v30 = vrot.slane %v1104_v13, 4  ;;  %v1422_v31 = vsel %vm671_vm0, %v4332_v56, 0  ;;  %v4331_v52 = vld [vmem:[%s4577_s28 + $0x3c] sm:$0xff]  ;;  %3816 = vmatmul.msk.bf16.vlgmr.msra.gmra.mxu2 %vm671_vm0, %v4321_v19  ;;  %3818 = vmatmul.msk.bf16.vlgmr.msra.gmra.mxu3 %vm671_vm0, %v4321_v19 }
  0x72   : > { %v429_v15 = vsel %vm4612_vm3, %v424_v55, %v428_v25  ;;  %v439_v8 = vsel %vm4612_vm3, %v434_v48, %v438_v39  ;;  %v1138_v16 = vunpack.c.l.b16 %v1049_v61  ;;  %v679_v21 = vsel %vm671_vm0, %v655_v6, 0  ;;  %1456 = vmatpush.bf16.xpose.msrb.mxu2 %v1422_v31  ;;  %v4339_v55 = vld [vmem:[%s4577_s28 + $0x9c] sm:$0xff] }
  0x73   : > { %v639_v23 = vunpack.c.l.b16 %v429_v15  ;;  %v640_v24 = vunpack.c.l.b16 %v439_v8  ;;  %v1052_v27 = vsel %vm4862_vm6, %v1050_v12, %v1051_v2  ;;  %733 = vmatpush.bf16.xpose.msra.mxu0 %v679_v21  ;;  %v1105_v25 = vsel %vm4862_vm6, %v3835_v4, %v1104_v13  ;;  %v951_v13 = vld [vmem:[%s4577_s28 + $0x3c] sm:$0xe] }
  0x74   : > { %v1139_v18 = vunpack.c.l.b16 %v1052_v27  ;;  %v1154_v42 = vunpack.c.l.b16 %v1105_v25  ;;  %v1446_v43 = vsel %vm671_vm0, %v4340_v5, 0  ;;  %v3826_v45 = vrot.slane %v952_v20, 9  ;;  %v4338_v27 = vld [vmem:[%s4577_s28 + $0x90] sm:$0xff] }
  0x75   : > { %v663_v39 = vpack.c.b16 %v640_v24, %v639_v23  ;;  %v1108_v46 = vsel %vm4862_vm6, %v1106_v30, %v1107_v9  ;;  %1475 = vmatpush.bf16.xpose.msrb.mxu3 %v1446_v43  ;;  %v1041_v47 = vrot.slane %v4618_v40, 5  ;;  %v1044_v50 = vrot.slane %v4626_v51, 5  ;;  %v4323_v40 = vld [vmem:[%s6034_s1 + $0x10] sm:$0xff] }
  0x76   : > { %v1163_v41 = vpack.c.b16 %v1139_v18, %v1138_v16  ;;  %v1155_v2 = vunpack.c.l.b16 %v1108_v46  ;;  %v3834_v4 = vrot.slane %v960_v33, 9  ;;  %v1097_v56 = vrot.slane %v4637_v3, 5  ;;  %v959_v16 = vld [vmem:[%s4577_s28 + $0x9c] sm:$0xe]  ;;  %v4330_v9 = vld [vmem:[%s4577_s28 + $0x30] sm:$0xff] }
  0x77   : > { %v703_v48 = vsel %vm671_vm0, %v663_v39, 0  ;;  %v1042_v6 = vsel %vm4862_vm6, %v3826_v45, %v1041_v47  ;;  %v1043_v61 = vrot.slane %v1041_v47, 4  ;;  %v1100_v12 = vrot.slane %v4640_v10, 5  ;;  %v950_v46 = vld [vmem:[%s4577_s28 + $0x30] sm:$0xe] }
  0x78   : > { %752 = vmatpush.bf16.xpose.msra.mxu1 %v703_v48  ;;  %v1200_v51 = vsel %vm671_vm0, %v1163_v41, 0  ;;  %v1171_v5 = vpack.c.b16 %v1155_v2, %v1154_v42  ;;  %v1136_v3 = vunpack.c.l.b16 %v1042_v6  ;;  %v1098_v15 = vsel %vm4862_vm6, %v3834_v4, %v1097_v56  ;;  %v4329_v2 = vld [vmem:[%s4577_s28 + $0x24] sm:$0xff] }
  0x79   : > { %v1099_v8 = vrot.slane %v1097_v56, 4  ;;  %v1045_v20 = vsel %vm4862_vm6, %v1043_v61, %v1044_v50  ;;  %v1152_v21 = vunpack.c.l.b16 %v1098_v15  ;;  %v1419_v23 = vsel %vm671_vm0, %v4331_v52, 0 }
  0x7a   : > { %v1443_v24 = vsel %vm671_vm0, %v4339_v55, 0  ;;  %v1224_v10 = vsel %vm671_vm0, %v1171_v5, 0  ;;  %v1137_v18 = vunpack.c.l.b16 %v1045_v20  ;;  %v3825_v30 = vrot.slane %v951_v13, 9  ;;  %3740 = vmatmul.msk.bf16.vlgmr.msra.gmra.mxu0 %vm671_vm0, %v4323_v40  ;;  %1457 = vmatpush.bf16.xpose.msrb.mxu2 %v1419_v23 }
  0x7b   : > { %1226 = vmatpush.bf16.xpose.msrb.mxu0 %v1200_v51  ;;  %v1101_v25 = vsel %vm4862_vm6, %v1099_v8, %v1100_v12  ;;  %v1034_v33 = vrot.slane %v4655_v37, 5  ;;  %v1037_v19 = vrot.slane %v4658_v38, 5  ;;  %v3833_v39 = vrot.slane %v959_v16, 9 }
  0x7c   : > { %v1153_v31 = vunpack.c.l.b16 %v1101_v25  ;;  %v1162_v42 = vpack.c.b16 %v1137_v18, %v1136_v3  ;;  %v1090_v43 = vrot.slane %v4670_v58, 5  ;;  %v1093_v45 = vrot.slane %v4673_v63, 5  ;;  %v958_v63 = vld [vmem:[%s4577_s28 + $0x90] sm:$0xe]  ;;  %v4337_v3 = vld [vmem:[%s4577_s28 + $0x84] sm:$0xff] }
  0x7d   : > { %v1416_v41 = vsel %vm671_vm0, %v4330_v9, 0  ;;  %1476 = vmatpush.bf16.xpose.msrb.mxu3 %v1443_v24  ;;  %v1035_v50 = vsel %vm4862_vm6, %v3825_v30, %v1034_v33  ;;  %v1036_v37 = vrot.slane %v1034_v33, 4  ;;  %v1440_v38 = vsel %vm671_vm0, %v4338_v27, 0  ;;  %v957_v18 = vld [vmem:[%s4577_s28 + $0x84] sm:$0xe] }
  0x7e   : > { %v1170_v47 = vpack.c.b16 %v1153_v31, %v1152_v21  ;;  %v1197_v52 = vsel %vm671_vm0, %v1162_v42, 0  ;;  %v1134_v55 = vunpack.c.l.b16 %v1035_v50  ;;  %v1091_v58 = vsel %vm4862_vm6, %v3833_v39, %v1090_v43 }
  0x7f   : > { %v1092_v48 = vrot.slane %v1090_v43, 4  ;;  %3742 = vmatmul.msk.bf16.vlgmr.msra.gmra.mxu1 %vm671_vm0, %v4323_v40  ;;  %v1038_v56 = vsel %vm4862_vm6, %v1036_v37, %v1037_v19  ;;  %v1150_v51 = vunpack.c.l.b16 %v1091_v58  ;;  %v3824_v6 = vrot.slane %v950_v46, 9  ;;  %v4336_v19 = vld [vmem:[%s4577_s28 + $0x78] sm:$0xff] }
  0x80   : > { %1245 = vmatpush.bf16.xpose.msrb.mxu1 %v1224_v10  ;;  %v1221_v4 = vsel %vm671_vm0, %v1170_v47, 0  ;;  %v1135_v61 = vunpack.c.l.b16 %v1038_v56  ;;  %v1027_v13 = vrot.slane %v4687_v29, 5  ;;  %v1030_v5 = vrot.slane %v4693_v34, 5  ;;  %v949_v29 = vld [vmem:[%s4577_s28 + $0x24] sm:$0xe]  ;;  %v4324_v37 = vld [vmem:[%s6034_s1 + $0x18] sm:$0xff] }
  0x81   : > { %v1094_v12 = vsel %vm4862_vm6, %v1092_v48, %v1093_v45  ;;  %v3832_v15 = vrot.slane %v958_v63, 9  ;;  %v1083_v8 = vrot.slane %v4703_v53, 5  ;;  %v1086_v16 = vrot.slane %v4708_v59, 5  ;;  %v4328_v53 = vld [vmem:[%s4577_s28 + $0x18] sm:$0xff]  ;;  %v4322_v59 = vld [vmem:[%s6034_s1 + $0x8] sm:$0xff] }
  0x82   : > { %v1151_v40 = vunpack.c.l.b16 %v1094_v12  ;;  %v1161_v9 = vpack.c.b16 %v1135_v61, %v1134_v55  ;;  %v1028_v20 = vsel %vm4862_vm6, %v3824_v6, %v1027_v13  ;;  %v1029_v21 = vrot.slane %v1027_v13, 4  ;;  %1458 = vmatpush.bf16.xpose.msrb.mxu2 %v1416_v41  ;;  %3819 = vmatmul.msk.bf16.gmra.mxu3 %vm671_vm0, %v4322_v59  ;;  %v4327_v6 = vld [vmem:[%s4577_s28 + $0xc] sm:$0xff] }
  0x83   : > { %1227 = vmatpush.bf16.xpose.msrb.mxu0 %v1197_v52  ;;  %v1413_v23 = vsel %vm671_vm0, %v4329_v2, 0  ;;  %v1132_v24 = vunpack.c.l.b16 %v1028_v20  ;;  %v1084_v27 = vsel %vm4862_vm6, %v3832_v15, %v1083_v8  ;;  %v1085_v10 = vrot.slane %v1083_v8, 4  ;;  %3817 = vmatmul.msk.bf16.gmra.mxu2 %vm671_vm0, %v4322_v59  ;;  %v5013_v59 = vld [vmem:[%s4577_s28 + $0x68] sm:$0x1] }
  0x84   : > { %v1169_v34 = vpack.c.b16 %v1151_v40, %v1150_v51  ;;  %v1194_v25 = vsel %vm671_vm0, %v1161_v9, 0  ;;  %v1031_v30 = vsel %vm4862_vm6, %v1029_v21, %v1030_v5  ;;  %v1148_v31 = vunpack.c.l.b16 %v1084_v27  ;;  %v956_v51 = vld [vmem:[%s4577_s28 + $0x78] sm:$0xe] }
  0x85   : > { %v1437_v33 = vsel %vm671_vm0, %v4337_v3, 0  ;;  %1477 = vmatpush.bf16.xpose.msrb.mxu3 %v1440_v38  ;;  %v1133_v42 = vunpack.c.l.b16 %v1031_v30  ;;  %v1087_v43 = vsel %vm4862_vm6, %v1085_v10, %v1086_v16  ;;  %v3823_v45 = vrot.slane %v949_v29, 9  ;;  %v4335_v16 = vld [vmem:[%s4577_s28 + $0x6c] sm:$0xff]  ;;  %v5008_v10 = vld [vmem:[%s4577_s28 + $0xc4] sm:$0xf] }
  0x86   : > { %v1218_v39 = vsel %vm671_vm0, %v1169_v34, 0  ;;  %v1149_v46 = vunpack.c.l.b16 %v1087_v43  ;;  %v1020_v41 = vrot.slane %v4719_v26, 5  ;;  %v1023_v47 = vrot.slane %v4726_v32, 5  ;;  %v948_v26 = vld [vmem:[%s4577_s28 + $0x18] sm:$0xe] }
  0x87   : > { %v3831_v50 = vrot.slane %v957_v18, 9  ;;  %v1160_v38 = vpack.c.b16 %v1133_v42, %v1132_v24  ;;  %v1076_v52 = vrot.slane %v4737_v57, 5  ;;  %v1079_v55 = vrot.slane %v4742_v1, 5  ;;  %v4999_v34 = vld [vmem:[%s4577_s28 + $0x64] sm:$0xf] }
  0x88   : > { %1246 = vmatpush.bf16.xpose.msrb.mxu1 %v1221_v4  ;;  %v4974_v58 = vsel %vm671_vm0, %v4328_v53, 0  ;;  %v1168_v32 = vpack.c.b16 %v1149_v46, %v1148_v31  ;;  %v1021_v48 = vsel %vm4862_vm6, %v3823_v45, %v1020_v41  ;;  %v1022_v63 = vrot.slane %v1020_v41, 4  ;;  %v947_v42 = vld [vmem:[%s4577_s28 + $0xc] sm:$0xe] }
  0x89   : > { %v4980_v2 = vsel %vm671_vm0, %v4336_v19, 0  ;;  %v1191_v4 = vsel %vm671_vm0, %v1160_v38, 0  ;;  %v1130_v56 = vunpack.c.l.b16 %v1021_v48  ;;  %v1077_v57 = vsel %vm4862_vm6, %v3831_v50, %v1076_v52 }
  0x8a   : > { %v1078_v1 = vrot.slane %v1076_v52, 4  ;;  %v1215_v61 = vsel %vm671_vm0, %v1168_v32, 0  ;;  %v1024_v12 = vsel %vm4862_vm6, %v1022_v63, %v1023_v47  ;;  %v1146_v13 = vunpack.c.l.b16 %v1077_v57  ;;  %3741 = vmatmul.msk.bf16.gmra.mxu0 %vm671_vm0, %v4324_v37  ;;  %1459 = vmatpush.bf16.xpose.msrb.mxu2 %v1413_v23  ;;  %v4035_v23 = vld [vmem:[%s4577_s28 + $0x60] sm:$0xe] }
  0x8b   : > { %1228 = vmatpush.bf16.xpose.msrb.mxu0 %v1194_v25  ;;  %v3822_v5 = vrot.slane %v948_v26, 9  ;;  %v1131_v3 = vunpack.c.l.b16 %v1024_v12  ;;  %v1013_v15 = vrot.slane %v4756_v36, 5  ;;  %v1016_v8 = vrot.slane %v4761_v44, 5  ;;  %v4043_v25 = vld [vmem:[%s4577_s28 + $0xc0] sm:$0xe] }
  0x8c   : > { %v1080_v40 = vsel %vm4862_vm6, %v1078_v1, %v1079_v55  ;;  %v3830_v20 = vrot.slane %v956_v51, 9  ;;  %v1069_v21 = vrot.slane %v4773_v7, 5  ;;  %v1072_v29 = vrot.slane %v4777_v14, 5 }
  0x8d   : > { %v1147_v9 = vunpack.c.l.b16 %v1080_v40  ;;  %1478 = vmatpush.bf16.xpose.msrb.mxu3 %v1437_v33  ;;  %v1159_v24 = vpack.c.b16 %v1131_v3, %v1130_v56  ;;  %v1014_v27 = vsel %vm4862_vm6, %v3822_v5, %v1013_v15  ;;  %v1015_v36 = vrot.slane %v1013_v15, 4  ;;  %v4034_v5 = vld [vmem:[%s4577_s28 + $0x54] sm:$0xe] }
  0x8e   : > { %v5004_v44 = vsel %vm671_vm0, %v4327_v6, 0  ;;  %v1128_v7 = vunpack.c.l.b16 %v1014_v27  ;;  %v1070_v14 = vsel %vm4862_vm6, %v3830_v20, %v1069_v21  ;;  %v1071_v53 = vrot.slane %v1069_v21, 4  ;;  %v5058_v21 = vld [vmem:[%s4577_s28 + $0x58] sm:$0xf] }
  0x8f   : > { %v1167_v18 = vpack.c.b16 %v1147_v9, %v1146_v13  ;;  %3743 = vmatmul.msk.bf16.gmra.mxu1 %vm671_vm0, %v4324_v37  ;;  %v1188_v30 = vsel %vm671_vm0, %v1159_v24, 0  ;;  %v1017_v31 = vsel %vm4862_vm6, %v1015_v36, %v1016_v8  ;;  %v1144_v33 = vunpack.c.l.b16 %v1070_v14 }
  0x90   : > { %1247 = vmatpush.bf16.xpose.msrb.mxu1 %v1218_v39  ;;  %v5021_v19 = vsel %vm671_vm0, %v4335_v16, 0  ;;  %v5024_v39 = vld [vmem:[%s4577_s28 + $0xc8] sm:$0x1]  ;;  %v1129_v45 = vunpack.c.l.b16 %v1017_v31  ;;  %v1073_v46 = vsel %vm4862_vm6, %v1071_v53, %v1072_v29  ;;  %v4051_v41 = vrot.slane %v4035_v23, 9  ;;  %v5061_v29 = vld [vmem:[%s4577_s28 + $0x5c] sm:$0x1] }
  0x91   : > { %v1212_v43 = vsel %vm671_vm0, %v1167_v18, 0  ;;  %v1145_v47 = vunpack.c.l.b16 %v1073_v46  ;;  %v2210_v50 = vrot.slane %v4999_v34, 5  ;;  %v2213_v37 = vrot.slane %v5013_v59, 5  ;;  %v4042_v23 = vld [vmem:[%s4577_s28 + $0xb4] sm:$0xe] }
  0x92   : > { %v4059_v38 = vrot.slane %v4043_v25, 9  ;;  %v1158_v52 = vpack.c.b16 %v1129_v45, %v1128_v7  ;;  %v2266_v55 = vrot.slane %v5008_v10, 5  ;;  %v2269_v26 = vrot.slane %v5024_v39, 5  ;;  %1460 = vmatpush.bf16.xpose.msrb.mxu2 %v4974_v58  ;;  %v5070_v53 = vld [vmem:[%s4577_s28 + $0xb8] sm:$0xf] }
  0x93   : > { %1229 = vmatpush.bf16.xpose.msrb.mxu0 %v1191_v4  ;;  %v3821_v32 = vrot.slane %v947_v42, 9  ;;  %v1166_v48 = vpack.c.b16 %v1145_v47, %v1144_v33  ;;  %v2211_v63 = vsel %vm4862_vm6, %v4051_v41, %v2210_v50  ;;  %v2212_v4 = vrot.slane %v2210_v50, 4  ;;  %v5073_v25 = vld [vmem:[%s4577_s28 + $0xbc] sm:$0x1] }
  0x94   : > { %v1006_v56 = vrot.slane %v4793_v54, 5  ;;  %v5039_v57 = vsel %vm671_vm0, %v1158_v52, 0  ;;  %v2300_v1 = vunpack.c.l.b16 %v2211_v63  ;;  %v2267_v51 = vsel %vm4862_vm6, %v4059_v38, %v2266_v55 }
  0x95   : > { %v2268_v6 = vrot.slane %v2266_v55, 4  ;;  %1479 = vmatpush.bf16.xpose.msrb.mxu3 %v4980_v2  ;;  %v5046_v12 = vsel %vm671_vm0, %v1166_v48, 0  ;;  %v2214_v54 = vsel %vm4862_vm6, %v2212_v4, %v2213_v37  ;;  %v2316_v58 = vunpack.c.l.b16 %v2267_v51  ;;  %v954_v48 = vld [vmem:[%s4577_s28 + $0x60] sm:$0xe] }
  0x96   : > { %v1007_v13 = vsel %vm4862_vm6, %v3821_v32, %v1006_v56  ;;  %v2301_v3 = vunpack.c.l.b16 %v2214_v54  ;;  %v1008_v15 = vrot.slane %v1006_v56, 4  ;;  %v1009_v8 = vrot.slane %v4798_v62, 5 }
  0x97   : > { %v2270_v40 = vsel %vm4862_vm6, %v2268_v6, %v2269_v26  ;;  %v1126_v16 = vunpack.c.l.b16 %v1007_v13  ;;  %v1062_v20 = vrot.slane %v4809_v22, 5  ;;  %v1065_v36 = vrot.slane %v4815_v28, 5  ;;  %v946_v28 = vld [vmem:[%s4577_s28] sm:$0xe] }
  0x98   : > { %1248 = vmatpush.bf16.xpose.msrb.mxu1 %v1215_v61  ;;  %v955_v61 = vld [vmem:[%s4577_s28 + $0x6c] sm:$0xe]  ;;  %v2317_v2 = vunpack.c.l.b16 %v2270_v40  ;;  %v2325_v24 = vpack.c.b16 %v2301_v3, %v2300_v1  ;;  %v1010_v27 = vsel %vm4862_vm6, %v1008_v15, %v1009_v8  ;;  %v4050_v62 = vrot.slane %v4034_v5, 9  ;;  %v3985_v15 = vld [vmem:[%s4577_s28 + $0x60] sm:$0xf] }
  0x99   : > { %v3829_v9 = vrot.slane %v955_v61, 9  ;;  %v1127_v7 = vunpack.c.l.b16 %v1010_v27  ;;  %v1064_v22 = vrot.slane %v1062_v20, 4  ;;  %v2203_v33 = vrot.slane %v5058_v21, 5  ;;  %v4343_v61 = vld [vmem:[%s6034_s1 + $0x30] sm:$0xff] }
  0x9a   : > { %v2333_v18 = vpack.c.b16 %v2317_v2, %v2316_v58  ;;  %v2206_v42 = vrot.slane %v5061_v29, 5  ;;  %v4058_v47 = vrot.slane %v4042_v23, 9  ;;  %1461 = vmatpush.bf16.xpose.msrb.mxu2 %v5004_v44  ;;  %v2259_v52 = vrot.slane %v5070_v53, 5 }
  0x9b   : > { %1230 = vmatpush.bf16.xpose.msrb.mxu0 %v1188_v30  ;;  %v1063_v14 = vsel %vm4862_vm6, %v3829_v9, %v1062_v20  ;;  %v2362_v30 = vsel %vm671_vm0, %v2325_v24, 0  ;;  %v1157_v46 = vpack.c.b16 %v1127_v7, %v1126_v16  ;;  %v1066_v41 = vsel %vm4862_vm6, %v1064_v22, %v1065_v36 }
  0x9c   : > { %v1142_v31 = vunpack.c.l.b16 %v1063_v14  ;;  %v2386_v45 = vsel %vm671_vm0, %v2333_v18, 0  ;;  %v1143_v50 = vunpack.c.l.b16 %v1066_v41  ;;  %v2204_v37 = vsel %vm4862_vm6, %v4050_v62, %v2203_v33  ;;  %v4009_v18 = vld [vmem:[%s4577_s28 + $0xc0] sm:$0xf]  ;;  %v5124_v41 = vld [vmem:[%s4577_s28 + $0x4c] sm:$0xf] }
  0x9d   : > { %v2205_v38 = vrot.slane %v2203_v33, 4  ;;  %1480 = vmatpush.bf16.xpose.msrb.mxu3 %v5021_v19  ;;  %v2298_v55 = vunpack.c.l.b16 %v2204_v37  ;;  %v2262_v26 = vrot.slane %v5073_v25, 5  ;;  %v3820_v32 = vrot.slane %v946_v28, 9 }
  0x9e   : > { %v1165_v63 = vpack.c.b16 %v1143_v50, %v1142_v31  ;;  %v2260_v4 = vsel %vm4862_vm6, %v4058_v47, %v2259_v52  ;;  %v2261_v56 = vrot.slane %v2259_v52, 4  ;;  %v999_v51 = vrot.slane %v4825_v11, 5 }
  0x9f   : > { %v2207_v44 = vsel %vm4862_vm6, %v2205_v38, %v2206_v42  ;;  %v2314_v19 = vunpack.c.l.b16 %v2260_v4  ;;  %v1002_v6 = vrot.slane %v4832_v17, 5  ;;  %v3828_v13 = vrot.slane %v954_v48, 9  ;;  %v4033_v38 = vld [vmem:[%s4577_s28 + $0x48] sm:$0xe] }
  0xa0   : > { %1249 = vmatpush.bf16.xpose.msrb.mxu1 %v1212_v43  ;;  %v1182_v43 = vsel %vm671_vm0, %v1157_v46, 0  ;;  %v2299_v1 = vunpack.c.l.b16 %v2207_v44  ;;  %v1206_v54 = vsel %vm671_vm0, %v1165_v63, 0  ;;  %v2263_v58 = vsel %vm4862_vm6, %v2261_v56, %v2262_v26  ;;  %v5133_v44 = vld [vmem:[%s4577_s28 + $0xac] sm:$0xf] }
  0xa1   : > { %v1055_v5 = vrot.slane %v4843_v49, 5  ;;  %v2315_v40 = vunpack.c.l.b16 %v2263_v58  ;;  %v1000_v11 = vsel %vm4862_vm6, %v3820_v32, %v999_v51  ;;  %v1001_v17 = vrot.slane %v999_v51, 4  ;;  %3960 = vmatmul.msk.bf16.vlgmr.msrb.gmra.mxu2 %vm671_vm0, %v4343_v61 }
  0xa2   : > { %2388 = vmatpush.bf16.xpose.msra.mxu2 %v2362_v30  ;;  %v2324_v3 = vpack.c.b16 %v2299_v1, %v2298_v55  ;;  %v1124_v8 = vunpack.c.l.b16 %v1000_v11  ;;  %v1058_v16 = vrot.slane %v4848_v60, 5  ;;  %v1717_v62 = vshrl.u32 %v3985_v15, 16  ;;  %v5136_v1 = vld [vmem:[%s4577_s28 + $0x50] sm:$0x1] }
  0xa3   : > { %1231 = vmatpush.bf16.xpose.msrb.mxu0 %v5039_v57  ;;  %v1056_v57 = vsel %vm4862_vm6, %v3828_v13, %v1055_v5  ;;  %v1057_v2 = vrot.slane %v1055_v5, 4  ;;  %v2332_v49 = vpack.c.b16 %v2315_v40, %v2314_v19  ;;  %v1003_v20 = vsel %vm4862_vm6, %v1001_v17, %v1002_v6 }
  0xa4   : > { %v2359_v9 = vsel %vm671_vm0, %v2324_v3, 0  ;;  %v1140_v24 = vunpack.c.l.b16 %v1056_v57  ;;  %v1125_v27 = vunpack.c.l.b16 %v1003_v20  ;;  %v1720_v23 = vshll.u32 %v3985_v15, 16  ;;  %3962 = vmatmul.msk.bf16.vlgmr.msrb.gmra.mxu3 %vm671_vm0, %v4343_v61 }
  0xa5   : > { %2407 = vmatpush.bf16.xpose.msra.mxu3 %v2386_v45  ;;  %v1059_v36 = vsel %vm4862_vm6, %v1057_v2, %v1058_v16  ;;  %v2383_v60 = vsel %vm671_vm0, %v2332_v49, 0  ;;  %v1726_v7 = vshll.u32 %v4999_v34, 16  ;;  %v1730_v14 = vshrl.u32 %v4999_v34, 16  ;;  %v3982_v49 = vld [vmem:[%s4577_s28 + $0x54] sm:$0xf] }
  0xa6   : > { %v1156_v22 = vpack.c.b16 %v1125_v27, %v1124_v8  ;;  %v1719_v30 = vrot.slane %v1717_v62, 4  ;;  %v1722_v31 = vrot.slane %v1720_v23, 5  ;;  %v1736_v33 = vshll.u32 %v5013_v59, 16 }
  0xa7   : > { %v1728_v28 = vrot.slane %v1726_v7, 5  ;;  %v1732_v45 = vrot.slane %v1730_v14, 4  ;;  %v1909_v46 = vshrl.u32 %v4009_v18, 16  ;;  %v1912_v37 = vshll.u32 %v4009_v18, 16 }
  0xa8   : > { %1250 = vmatpush.bf16.xpose.msrb.mxu1 %v5046_v12  ;;  %v1141_v12 = vunpack.c.l.b16 %v1059_v36  ;;  %v1179_v47 = vsel %vm671_vm0, %v1156_v22, 0  ;;  %v1723_v50 = vor.u32 %v1722_v31, %v1719_v30  ;;  %v1738_v34 = vrot.slane %v1736_v33, 5 }
  0xa9   : > { %v1733_v55 = vor.u32 %v1732_v45, %v1728_v28  ;;  %v1911_v26 = vrot.slane %v1909_v46, 4  ;;  %v1918_v59 = vshll.u32 %v5008_v10, 16  ;;  %v1914_v48 = vrot.slane %v1912_v37, 5  ;;  %v4006_v45 = vld [vmem:[%s4577_s28 + $0xb4] sm:$0xf] }
  0xaa   : > { %2389 = vmatpush.bf16.xpose.msra.mxu2 %v2359_v9  ;;  %v1164_v42 = vpack.c.b16 %v1141_v12, %v1140_v24  ;;  %v1724_v32 = vrot.slane %v1723_v50, 4  ;;  %v1922_v63 = vshrl.u32 %v5008_v10, 16  ;;  %v4049_v19 = vrot.slane %v4033_v38, 9  ;;  %v5142_v10 = vld [vmem:[%s4577_s28 + $0xb0] sm:$0x1] }
  0xab   : > { %1232 = vmatpush.bf16.xpose.msrb.mxu0 %v1182_v43  ;;  %v1928_v43 = vshll.u32 %v5024_v39, 16  ;;  %v1734_v4 = vrot.slane %v1733_v55, 4  ;;  %v1920_v56 = vrot.slane %v1918_v59, 5  ;;  %v2196_v51 = vrot.slane %v5124_v41, 5  ;;  %v4041_v39 = vld [vmem:[%s4577_s28 + $0xa8] sm:$0xe] }
  0xac   : > { %v1203_v52 = vsel %vm671_vm0, %v1164_v42, 0  ;;  %v1729_v6 = vsel %vm4612_vm3, %v1724_v32, %v1728_v28  ;;  %v1915_v61 = vor.u32 %v1914_v48, %v1911_v26  ;;  %v1924_v58 = vrot.slane %v1922_v63, 4  ;;  %v4325_v42 = vld [vmem:[%s6034_s1 + $0x20] sm:$0xff] }
  0xad   : > { %2408 = vmatpush.bf16.xpose.msra.mxu3 %v2383_v60  ;;  %v1930_v13 = vrot.slane %v1928_v43, 5  ;;  %v1961_v5 = vunpack.c.l.b16 %v1729_v6  ;;  %v2197_v3 = vsel %vm4862_vm6, %v4049_v19, %v2196_v51  ;;  %v2198_v40 = vrot.slane %v2196_v51, 4  ;;  %v5173_v63 = vld [vmem:[%s4577_s28 + $0x40] sm:$0xf]  ;;  %v4032_v19 = vld [vmem:[%s4577_s28 + $0x3c] sm:$0xe] }
  0xae   : > { %v1916_v17 = vrot.slane %v1915_v61, 4  ;;  %v1925_v15 = vor.u32 %v1924_v58, %v1920_v56  ;;  %v2199_v8 = vrot.slane %v5136_v1, 5  ;;  %v2296_v57 = vunpack.c.l.b16 %v2197_v3 }
  0xaf   : > { %v4057_v2 = vrot.slane %v4041_v39, 9  ;;  %v2252_v16 = vrot.slane %v5133_v44, 5  ;;  %v2255_v9 = vrot.slane %v5142_v10, 5  ;;  %v1693_v22 = vshrl.u32 %v3982_v49, 16 }
  0xb0   : > { %1251 = vmatpush.bf16.xpose.msrb.mxu1 %v1206_v54  ;;  %v1739_v54 = vsel %vm4612_vm3, %v1734_v4, %v1738_v34  ;;  %v1921_v24 = vsel %vm4612_vm3, %v1916_v17, %v1920_v56  ;;  %v1926_v27 = vrot.slane %v1925_v15, 4  ;;  %v2200_v36 = vsel %vm4862_vm6, %v2198_v40, %v2199_v8 }
  0xb1   : > { %v1962_v11 = vunpack.c.l.b16 %v1739_v54  ;;  %v1977_v62 = vunpack.c.l.b16 %v1921_v24  ;;  %v2297_v23 = vunpack.c.l.b16 %v2200_v36  ;;  %v2253_v18 = vsel %vm4862_vm6, %v4057_v2, %v2252_v16 }
  0xb2   : > { %v2254_v60 = vrot.slane %v2252_v16, 4  ;;  %v1931_v7 = vsel %vm4612_vm3, %v1926_v27, %v1930_v13  ;;  %v2312_v14 = vunpack.c.l.b16 %v2253_v18  ;;  %v1696_v28 = vshll.u32 %v3982_v49, 16  ;;  %v5193_v16 = vld [vmem:[%s4577_s28 + $0xa4] sm:$0x1] }
  0xb3   : > { %1233 = vmatpush.bf16.xpose.msrb.mxu0 %v1179_v47  ;;  %v1986_v20 = vpack.c.b16 %v1962_v11, %v1961_v5  ;;  %v1978_v30 = vunpack.c.l.b16 %v1931_v7  ;;  %v2323_v31 = vpack.c.b16 %v2297_v23, %v2296_v57  ;;  %v1695_v47 = vrot.slane %v1693_v22, 4  ;;  %v5183_v5 = vld [vmem:[%s4577_s28 + $0xa0] sm:$0xf]  ;;  %v5187_v11 = vld [vmem:[%s4577_s28 + $0x44] sm:$0x1] }
  0xb4   : > { %v2256_v33 = vsel %vm4862_vm6, %v2254_v60, %v2255_v9  ;;  %v1702_v50 = vshll.u32 %v5058_v21, 16  ;;  %v1706_v34 = vshrl.u32 %v5058_v21, 16  ;;  %v1712_v55 = vshll.u32 %v5061_v29, 16 }
  0xb5   : > { %v2023_v12 = vsel %vm671_vm0, %v1986_v20, 0  ;;  %v2313_v46 = vunpack.c.l.b16 %v2256_v33  ;;  %v1994_v37 = vpack.c.b16 %v1978_v30, %v1977_v62  ;;  %v2356_v38 = vsel %vm671_vm0, %v2323_v31, 0 }
  0xb6   : > { %2390 = vmatpush.bf16.xpose.msra.mxu2 %v2356_v38  ;;  %v1704_v59 = vrot.slane %v1702_v50, 5  ;;  %v1708_v32 = vrot.slane %v1706_v34, 4  ;;  %v1885_v48 = vshrl.u32 %v4006_v45, 16  ;;  %v1714_v4 = vrot.slane %v1712_v55, 5 }
  0xb7   : > { %v2331_v26 = vpack.c.b16 %v2313_v46, %v2312_v14  ;;  %v2047_v43 = vsel %vm671_vm0, %v1994_v37, 0  ;;  %v1888_v56 = vshll.u32 %v4006_v45, 16  ;;  %v1894_v61 = vshll.u32 %v5070_v53, 16  ;;  %v3979_v14 = vld [vmem:[%s4577_s28 + $0x48] sm:$0xf] }
  0xb8   : > { %1252 = vmatpush.bf16.xpose.msrb.mxu1 %v1203_v52  ;;  %v1698_v52 = vrot.slane %v1696_v28, 5  ;;  %v1709_v51 = vor.u32 %v1708_v32, %v1704_v59  ;;  %v1887_v6 = vrot.slane %v1885_v48, 4  ;;  %v1898_v39 = vshrl.u32 %v5070_v53, 16 }
  0xb9   : > { %v2380_v29 = vsel %vm671_vm0, %v2331_v26, 0  ;;  %v1890_v13 = vrot.slane %v1888_v56, 5  ;;  %v1904_v54 = vshll.u32 %v5073_v25, 16  ;;  %v1896_v40 = vrot.slane %v1894_v61, 5  ;;  %v4040_v25 = vld [vmem:[%s4577_s28 + $0x9c] sm:$0xe] }
  0xba   : > { %3848 = vmatmul.msk.bf16.vlgmr.msrb.gmra.mxu0 %vm671_vm0, %v4325_v42  ;;  %v1699_v21 = vor.u32 %v1698_v52, %v1695_v47  ;;  %2409 = vmatpush.bf16.xpose.msra.mxu3 %v2380_v29  ;;  %v1710_v3 = vrot.slane %v1709_v51, 4  ;;  %v4048_v17 = vrot.slane %v4032_v19, 9  ;;  %v2189_v15 = vrot.slane %v5173_v63, 5 }
  0xbb   : > { %2049 = vmatpush.bf16.xpose.msra.mxu0 %v2023_v12  ;;  %v1891_v57 = vor.u32 %v1890_v13, %v1887_v6  ;;  %v1900_v2 = vrot.slane %v1898_v39, 4  ;;  %v1906_v53 = vrot.slane %v1904_v54, 5  ;;  %v2192_v23 = vrot.slane %v5187_v11, 5  ;;  %v5221_v13 = vld [vmem:[%s4577_s28 + $0x34] sm:$0xf] }
  0xbc   : > { %v1700_v58 = vrot.slane %v1699_v21, 4  ;;  %v1715_v9 = vsel %vm4612_vm3, %v1710_v3, %v1714_v4  ;;  %v2190_v20 = vsel %vm4862_vm6, %v4048_v17, %v2189_v15  ;;  %v2191_v24 = vrot.slane %v2189_v15, 4  ;;  %v4344_v17 = vld [vmem:[%s6034_s1 + $0x38] sm:$0xff] }
  0xbd   : > { %v1960_v27 = vunpack.c.l.b16 %v1715_v9  ;;  %v1892_v36 = vrot.slane %v1891_v57, 4  ;;  %v1901_v62 = vor.u32 %v1900_v2, %v1896_v40  ;;  %v2294_v18 = vunpack.c.l.b16 %v2190_v20  ;;  %3961 = vmatmul.msk.bf16.gmra.mxu2 %vm671_vm0, %v4344_v17  ;;  %3963 = vmatmul.msk.bf16.gmra.mxu3 %vm671_vm0, %v4344_v17 }
  0xbe   : > { %v1705_v8 = vsel %vm4612_vm3, %v1700_v58, %v1704_v59  ;;  %v4056_v60 = vrot.slane %v4040_v25, 9  ;;  %v2245_v12 = vrot.slane %v5183_v5, 5  ;;  %v2248_v7 = vrot.slane %v5193_v16, 5  ;;  %v4003_v59 = vld [vmem:[%s4577_s28 + $0xa8] sm:$0xf] }
  0xbf   : > { %3850 = vmatmul.msk.bf16.vlgmr.msrb.gmra.mxu1 %vm671_vm0, %v4325_v42  ;;  %v1959_v49 = vunpack.c.l.b16 %v1705_v8  ;;  %v1897_v30 = vsel %vm4612_vm3, %v1892_v36, %v1896_v40  ;;  %v1902_v31 = vrot.slane %v1901_v62, 4  ;;  %v2193_v33 = vsel %vm4862_vm6, %v2191_v24, %v2192_v23 }
  0xc0   : > { %2068 = vmatpush.bf16.xpose.msra.mxu1 %v2047_v43  ;;  %v1975_v42 = vunpack.c.l.b16 %v1897_v30  ;;  %v2295_v28 = vunpack.c.l.b16 %v2193_v33  ;;  %v2246_v45 = vsel %vm4862_vm6, %v4056_v60, %v2245_v12  ;;  %v2247_v46 = vrot.slane %v2245_v12, 4  ;;  %v5244_v60 = vld [vmem:[%s4577_s28 + $0x98] sm:$0x1]  ;;  %v4039_v12 = vld [vmem:[%s4577_s28 + $0x90] sm:$0xe] }
  0xc1   : > { %v1985_v22 = vpack.c.b16 %v1960_v27, %v1959_v49  ;;  %v1907_v50 = vsel %vm4612_vm3, %v1902_v31, %v1906_v53  ;;  %v2310_v34 = vunpack.c.l.b16 %v2246_v45  ;;  %v1669_v37 = vshrl.u32 %v3979_v14, 16  ;;  %v5233_v49 = vld [vmem:[%s4577_s28 + $0x94] sm:$0xf]  ;;  %v5237_v27 = vld [vmem:[%s4577_s28 + $0x38] sm:$0x1] }
  0xc2   : > { %v1976_v38 = vunpack.c.l.b16 %v1907_v50  ;;  %v2322_v52 = vpack.c.b16 %v2295_v28, %v2294_v18  ;;  %v2249_v55 = vsel %vm4862_vm6, %v2247_v46, %v2248_v7  ;;  %v1672_v26 = vshll.u32 %v3979_v14, 16 }
  0xc3   : > { %v2020_v47 = vsel %vm671_vm0, %v1985_v22, 0  ;;  %v2311_v32 = vunpack.c.l.b16 %v2249_v55  ;;  %v1671_v48 = vrot.slane %v1669_v37, 4  ;;  %v1678_v43 = vshll.u32 %v5124_v41, 16 }
  0xc4   : > { %2050 = vmatpush.bf16.xpose.msra.mxu0 %v2020_v47  ;;  %v1682_v21 = vshrl.u32 %v5124_v41, 16  ;;  %v1993_v4 = vpack.c.b16 %v1976_v38, %v1975_v42  ;;  %v2353_v56 = vsel %vm671_vm0, %v2322_v52, 0  ;;  %v1674_v19 = vrot.slane %v1672_v26, 5  ;;  %v4031_v41 = vld [vmem:[%s4577_s28 + $0x30] sm:$0xe] }
  0xc5   : > { %v1688_v29 = vshll.u32 %v5136_v1, 16  ;;  %2391 = vmatpush.bf16.xpose.msra.mxu2 %v2353_v56  ;;  %v2330_v51 = vpack.c.b16 %v2311_v32, %v2310_v34  ;;  %v1680_v6 = vrot.slane %v1678_v43, 5  ;;  %v1861_v58 = vshrl.u32 %v4003_v59, 16  ;;  %v3976_v34 = vld [vmem:[%s4577_s28 + $0x3c] sm:$0xf] }
  0xc6   : > { %v1684_v61 = vrot.slane %v1682_v21, 4  ;;  %v2044_v39 = vsel %vm671_vm0, %v1993_v4, 0  ;;  %v1675_v54 = vor.u32 %v1674_v19, %v1671_v48  ;;  %v1864_v40 = vshll.u32 %v4003_v59, 16 }
  0xc7   : > { %v1690_v3 = vrot.slane %v1688_v29, 5  ;;  %v2377_v1 = vsel %vm671_vm0, %v2330_v51, 0  ;;  %v1863_v8 = vrot.slane %v1861_v58, 4  ;;  %v1870_v57 = vshll.u32 %v5133_v44, 16 }
  0xc8   : > { %2069 = vmatpush.bf16.xpose.msra.mxu1 %v2044_v39  ;;  %v1685_v15 = vor.u32 %v1684_v61, %v1680_v6  ;;  %2410 = vmatpush.bf16.xpose.msra.mxu3 %v2377_v1  ;;  %v1676_v2 = vrot.slane %v1675_v54, 4  ;;  %v1866_v53 = vrot.slane %v1864_v40, 5  ;;  %v1874_v25 = vshrl.u32 %v5133_v44, 16  ;;  %v4000_v61 = vld [vmem:[%s4577_s28 + $0x9c] sm:$0xf] }
  0xc9   : > { %v1880_v9 = vshll.u32 %v5142_v10, 16  ;;  %v1872_v24 = vrot.slane %v1870_v57, 5  ;;  %v4047_v36 = vrot.slane %v4031_v41, 9  ;;  %v2182_v62 = vrot.slane %v5221_v13, 5 }
  0xca   : > { %v1686_v20 = vrot.slane %v1685_v15, 4  ;;  %v1681_v23 = vsel %vm4612_vm3, %v1676_v2, %v1680_v6  ;;  %v1867_v18 = vor.u32 %v1866_v53, %v1863_v8  ;;  %v1876_v44 = vrot.slane %v1874_v25, 4  ;;  %v5272_v53 = vld [vmem:[%s4577_s28 + $0x28] sm:$0xf] }
  0xcb   : > { %v1882_v10 = vrot.slane %v1880_v9, 5  ;;  %v1957_v14 = vunpack.c.l.b16 %v1681_v23  ;;  %v2183_v22 = vsel %vm4862_vm6, %v4047_v36, %v2182_v62  ;;  %v2184_v30 = vrot.slane %v2182_v62, 4  ;;  %v4326_v25 = vld [vmem:[%s6034_s1 + $0x28] sm:$0xff]  ;;  %v4030_v36 = vld [vmem:[%s4577_s28 + $0x24] sm:$0xe] }
  0xcc   : > { %v1691_v7 = vsel %vm4612_vm3, %v1686_v20, %v1690_v3  ;;  %v1868_v33 = vrot.slane %v1867_v18, 4  ;;  %v1877_v42 = vor.u32 %v1876_v44, %v1872_v24  ;;  %v2185_v28 = vrot.slane %v5237_v27, 5  ;;  %3849 = vmatmul.msk.bf16.gmra.mxu0 %vm671_vm0, %v4326_v25 }
  0xcd   : > { %v1958_v31 = vunpack.c.l.b16 %v1691_v7  ;;  %v2292_v45 = vunpack.c.l.b16 %v2183_v22  ;;  %v4055_v46 = vrot.slane %v4039_v12, 9  ;;  %v2238_v47 = vrot.slane %v5233_v49, 5 }
  0xce   : > { %v2241_v50 = vrot.slane %v5244_v60, 5  ;;  %v1873_v38 = vsel %vm4612_vm3, %v1868_v33, %v1872_v24  ;;  %v1878_v52 = vrot.slane %v1877_v42, 4  ;;  %v2186_v55 = vsel %vm4862_vm6, %v2184_v30, %v2185_v28 }
  0xcf   : > { %v1984_v37 = vpack.c.b16 %v1958_v31, %v1957_v14  ;;  %v1973_v26 = vunpack.c.l.b16 %v1873_v38  ;;  %v2293_v59 = vunpack.c.l.b16 %v2186_v55  ;;  %v2239_v32 = vsel %vm4862_vm6, %v4055_v46, %v2238_v47  ;;  %v5285_v14 = vld [vmem:[%s4577_s28 + $0x88] sm:$0xf]  ;;  %3851 = vmatmul.msk.bf16.gmra.mxu1 %vm671_vm0, %v4326_v25  ;;  %v5289_v31 = vld [vmem:[%s4577_s28 + $0x2c] sm:$0x1] }
  0xd0   : > { %v2240_v48 = vrot.slane %v2238_v47, 4  ;;  %v1883_v21 = vsel %vm4612_vm3, %v1878_v52, %v1882_v10  ;;  %v2308_v4 = vunpack.c.l.b16 %v2239_v32  ;;  %v1645_v56 = vshrl.u32 %v3976_v34, 16  ;;  %v5295_v47 = vld [vmem:[%s4577_s28 + $0x8c] sm:$0x1] }
  0xd1   : > { %v2017_v43 = vsel %vm671_vm0, %v1984_v37, 0  ;;  %v1974_v19 = vunpack.c.l.b16 %v1883_v21  ;;  %v2321_v29 = vpack.c.b16 %v2293_v59, %v2292_v45  ;;  %v1648_v6 = vshll.u32 %v3976_v34, 16 }
  0xd2   : > { %2051 = vmatpush.bf16.xpose.msra.mxu0 %v2017_v43  ;;  %v2242_v51 = vsel %vm4862_vm6, %v2240_v48, %v2241_v50  ;;  %v1647_v39 = vrot.slane %v1645_v56, 4  ;;  %v1654_v54 = vshll.u32 %v5173_v63, 16  ;;  %v1658_v3 = vshrl.u32 %v5173_v63, 16 }
  0xd3   : > { %v2309_v58 = vunpack.c.l.b16 %v2242_v51  ;;  %v1992_v40 = vpack.c.b16 %v1974_v19, %v1973_v26  ;;  %v2350_v41 = vsel %vm671_vm0, %v2321_v29, 0  ;;  %v1650_v17 = vrot.slane %v1648_v6, 5 }
  0xd4   : > { %v1664_v1 = vshll.u32 %v5187_v11, 16  ;;  %2392 = vmatpush.bf16.xpose.msra.mxu2 %v2350_v41  ;;  %v1656_v8 = vrot.slane %v1654_v54, 5  ;;  %v1660_v57 = vrot.slane %v1658_v3, 4  ;;  %v1837_v2 = vshrl.u32 %v4000_v61, 16 }
  0xd5   : > { %v2329_v15 = vpack.c.b16 %v2309_v58, %v2308_v4  ;;  %v2041_v63 = vsel %vm671_vm0, %v1992_v40, 0  ;;  %v1651_v9 = vor.u32 %v1650_v17, %v1647_v39  ;;  %v1840_v24 = vshll.u32 %v4000_v61, 16  ;;  %v3973_v4 = vld [vmem:[%s4577_s28 + $0x30] sm:$0xf] }
  0xd6   : > { %v1666_v20 = vrot.slane %v1664_v1, 5  ;;  %2070 = vmatpush.bf16.xpose.msra.mxu1 %v2041_v63  ;;  %v1661_v62 = vor.u32 %v1660_v57, %v1656_v8  ;;  %v1839_v23 = vrot.slane %v1837_v2, 4  ;;  %v1846_v18 = vshll.u32 %v5183_v5, 16  ;;  %v3997_v57 = vld [vmem:[%s4577_s28 + $0x90] sm:$0xf] }
  0xd7   : > { %v2374_v11 = vsel %vm671_vm0, %v2329_v15, 0  ;;  %v1652_v44 = vrot.slane %v1651_v9, 4  ;;  %v1842_v10 = vrot.slane %v1840_v24, 5  ;;  %v1850_v12 = vshrl.u32 %v5183_v5, 16 }
  0xd8   : > { %2411 = vmatpush.bf16.xpose.msra.mxu3 %v2374_v11  ;;  %v1856_v7 = vshll.u32 %v5193_v16, 16  ;;  %v1662_v22 = vrot.slane %v1661_v62, 4  ;;  %v1848_v30 = vrot.slane %v1846_v18, 5  ;;  %v4046_v33 = vrot.slane %v4030_v36, 9  ;;  %v4038_v16 = vld [vmem:[%s4577_s28 + $0x84] sm:$0xe] }
  0xd9   : > { %v2175_v42 = vrot.slane %v5272_v53, 5  ;;  %v1657_v28 = vsel %vm4612_vm3, %v1652_v44, %v1656_v8  ;;  %v1843_v45 = vor.u32 %v1842_v10, %v1839_v23  ;;  %v1852_v46 = vrot.slane %v1850_v12, 4  ;;  %v5323_v10 = vld [vmem:[%s4577_s28 + $0x1c] sm:$0xf] }
  0xda   : > { %v1858_v5 = vrot.slane %v1856_v7, 5  ;;  %v1667_v50 = vsel %vm4612_vm3, %v1662_v22, %v1666_v20  ;;  %v1955_v34 = vunpack.c.l.b16 %v1657_v28  ;;  %v2178_v59 = vrot.slane %v5289_v31, 5 }
  0xdb   : > { %v2176_v37 = vsel %vm4862_vm6, %v4046_v33, %v2175_v42  ;;  %v2177_v38 = vrot.slane %v2175_v42, 4  ;;  %v1956_v52 = vunpack.c.l.b16 %v1667_v50  ;;  %v1844_v55 = vrot.slane %v1843_v45, 4  ;;  %v5332_v50 = vld [vmem:[%s4577_s28 + $0x7c] sm:$0xf] }
  0xdc   : > { %v1853_v26 = vor.u32 %v1852_v46, %v1848_v30  ;;  %v2290_v32 = vunpack.c.l.b16 %v2176_v37  ;;  %v4054_v48 = vrot.slane %v4038_v16, 9  ;;  %v2231_v43 = vrot.slane %v5285_v14, 5 }
  0xdd   : > { %v2234_v21 = vrot.slane %v5295_v47, 5  ;;  %v1983_v56 = vpack.c.b16 %v1956_v52, %v1955_v34  ;;  %v1849_v19 = vsel %vm4612_vm3, %v1844_v55, %v1848_v30  ;;  %v2179_v51 = vsel %vm4862_vm6, %v2177_v38, %v2178_v59  ;;  %v4029_v30 = vld [vmem:[%s4577_s28 + $0x18] sm:$0xe]  ;;  %v5335_v38 = vld [vmem:[%s4577_s28 + $0x20] sm:$0x1] }
  0xde   : > { %v1854_v29 = vrot.slane %v1853_v26, 4  ;;  %v1971_v6 = vunpack.c.l.b16 %v1849_v19  ;;  %v2291_v61 = vunpack.c.l.b16 %v2179_v51  ;;  %v2232_v58 = vsel %vm4862_vm6, %v4054_v48, %v2231_v43 }
  0xdf   : > { %v2233_v39 = vrot.slane %v2231_v43, 4  ;;  %v2014_v54 = vsel %vm671_vm0, %v1983_v56, 0  ;;  %v2306_v40 = vunpack.c.l.b16 %v2232_v58  ;;  %v1621_v41 = vshrl.u32 %v3973_v4, 16  ;;  %v5341_v43 = vld [vmem:[%s4577_s28 + $0x80] sm:$0x1] }
  0xe0   : > { %v1859_v3 = vsel %vm4612_vm3, %v1854_v29, %v1858_v5  ;;  %2052 = vmatpush.bf16.xpose.msra.mxu0 %v2014_v54  ;;  %v2320_v1 = vpack.c.b16 %v2291_v61, %v2290_v32  ;;  %v1624_v8 = vshll.u32 %v3973_v4, 16  ;;  %v1630_v63 = vshll.u32 %v5221_v13, 16 }
  0xe1   : > { %v1972_v17 = vunpack.c.l.b16 %v1859_v3  ;;  %v2235_v15 = vsel %vm4862_vm6, %v2233_v39, %v2234_v21  ;;  %v1623_v25 = vrot.slane %v1621_v41, 4  ;;  %v1634_v9 = vshrl.u32 %v5221_v13, 16  ;;  %v3970_v3 = vld [vmem:[%s4577_s28 + $0x24] sm:$0xf] }
  0xe2   : > { %v2307_v2 = vunpack.c.l.b16 %v2235_v15  ;;  %v2347_v24 = vsel %vm671_vm0, %v2320_v1, 0  ;;  %v1626_v36 = vrot.slane %v1624_v8, 5  ;;  %v1640_v11 = vshll.u32 %v5237_v27, 16 }
  0xe3   : > { %v1991_v20 = vpack.c.b16 %v1972_v17, %v1971_v6  ;;  %2393 = vmatpush.bf16.xpose.msra.mxu2 %v2347_v24  ;;  %v1632_v23 = vrot.slane %v1630_v63, 5  ;;  %v1636_v18 = vrot.slane %v1634_v9, 4  ;;  %v1813_v44 = vshrl.u32 %v3997_v57, 16 }
  0xe4   : > { %v2328_v62 = vpack.c.b16 %v2307_v2, %v2306_v40  ;;  %v1627_v7 = vor.u32 %v1626_v36, %v1623_v25  ;;  %v1642_v22 = vrot.slane %v1640_v11, 5  ;;  %v1816_v13 = vshll.u32 %v3997_v57, 16 }
  0xe5   : > { %v2038_v12 = vsel %vm671_vm0, %v1991_v20, 0  ;;  %v1637_v42 = vor.u32 %v1636_v18, %v1632_v23  ;;  %v1815_v27 = vrot.slane %v1813_v44, 4  ;;  %v1822_v28 = vshll.u32 %v5233_v49, 16 }
  0xe6   : > { %2071 = vmatpush.bf16.xpose.msra.mxu1 %v2038_v12  ;;  %v2371_v33 = vsel %vm671_vm0, %v2328_v62, 0  ;;  %v1628_v45 = vrot.slane %v1627_v7, 4  ;;  %v1818_v46 = vrot.slane %v1816_v13, 5  ;;  %v1826_v5 = vshrl.u32 %v5233_v49, 16  ;;  %v4037_v49 = vld [vmem:[%s4577_s28 + $0x78] sm:$0xe] }
  0xe7   : > { %2412 = vmatpush.bf16.xpose.msra.mxu3 %v2371_v33  ;;  %v1832_v16 = vshll.u32 %v5244_v60, 16  ;;  %v1638_v34 = vrot.slane %v1637_v42, 4  ;;  %v1824_v37 = vrot.slane %v1822_v28, 5  ;;  %v4045_v52 = vrot.slane %v4029_v30, 9 }
  0xe8   : > { %v2168_v55 = vrot.slane %v5323_v10, 5  ;;  %v1633_v26 = vsel %vm4612_vm3, %v1628_v45, %v1632_v23  ;;  %v1819_v59 = vor.u32 %v1818_v46, %v1815_v27  ;;  %v1828_v32 = vrot.slane %v1826_v5, 4  ;;  %v3994_v23 = vld [vmem:[%s4577_s28 + $0x84] sm:$0xf]  ;;  %v5369_v46 = vld [vmem:[%s4577_s28 + $0x10] sm:$0xf] }
  0xe9   : > { %v1834_v48 = vrot.slane %v1832_v16, 5  ;;  %v1643_v60 = vsel %vm4612_vm3, %v1638_v34, %v1642_v22  ;;  %v1953_v21 = vunpack.c.l.b16 %v1633_v26  ;;  %v2171_v6 = vrot.slane %v5335_v38, 5 }
  0xea   : > { %v2169_v4 = vsel %vm4862_vm6, %v4045_v52, %v2168_v55  ;;  %v2170_v56 = vrot.slane %v2168_v55, 4  ;;  %v1954_v19 = vunpack.c.l.b16 %v1643_v60  ;;  %v1820_v29 = vrot.slane %v1819_v59, 4  ;;  %v5378_v60 = vld [vmem:[%s4577_s28 + $0x70] sm:$0xf] }
  0xeb   : > { %v1829_v51 = vor.u32 %v1828_v32, %v1824_v37  ;;  %v2288_v61 = vunpack.c.l.b16 %v2169_v4  ;;  %v4053_v58 = vrot.slane %v4037_v49, 9  ;;  %v2224_v39 = vrot.slane %v5332_v50, 5 }
  0xec   : > { %v2227_v54 = vrot.slane %v5341_v43, 5  ;;  %v1982_v40 = vpack.c.b16 %v1954_v19, %v1953_v21  ;;  %v1825_v41 = vsel %vm4612_vm3, %v1820_v29, %v1824_v37  ;;  %v2172_v1 = vsel %vm4862_vm6, %v2170_v56, %v2171_v6  ;;  %v4028_v37 = vld [vmem:[%s4577_s28 + $0xc] sm:$0xe]  ;;  %v5381_v56 = vld [vmem:[%s4577_s28 + $0x14] sm:$0x1] }
  0xed   : > { %v1830_v17 = vrot.slane %v1829_v51, 4  ;;  %v1969_v15 = vunpack.c.l.b16 %v1825_v41  ;;  %v2289_v8 = vunpack.c.l.b16 %v2172_v1  ;;  %v2225_v57 = vsel %vm4862_vm6, %v4053_v58, %v2224_v39 }
  0xee   : > { %v2226_v2 = vrot.slane %v2224_v39, 4  ;;  %v2011_v25 = vsel %vm671_vm0, %v1982_v40, 0  ;;  %v2304_v9 = vunpack.c.l.b16 %v2225_v57  ;;  %v1597_v20 = vshrl.u32 %v3970_v3, 16  ;;  %v5387_v39 = vld [vmem:[%s4577_s28 + $0x74] sm:$0x1] }
  0xef   : > { %v1835_v63 = vsel %vm4612_vm3, %v1830_v17, %v1834_v48  ;;  %2053 = vmatpush.bf16.xpose.msra.mxu0 %v2011_v25  ;;  %v2319_v36 = vpack.c.b16 %v2289_v8, %v2288_v61  ;;  %v1600_v62 = vshll.u32 %v3970_v3, 16  ;;  %v1606_v12 = vshll.u32 %v5272_v53, 16 }
  0xf0   : > { %v1970_v24 = vunpack.c.l.b16 %v1835_v63  ;;  %v2228_v11 = vsel %vm4862_vm6, %v2226_v2, %v2227_v54  ;;  %v1599_v44 = vrot.slane %v1597_v20, 4  ;;  %v1610_v7 = vshrl.u32 %v5272_v53, 16  ;;  %v4209_v63 = vld [vmem:[%s4577_s28 + $0x6c] sm:$0xf] }
  0xf1   : > { %v2305_v18 = vunpack.c.l.b16 %v2228_v11  ;;  %v2344_v13 = vsel %vm671_vm0, %v2319_v36, 0  ;;  %v1602_v30 = vrot.slane %v1600_v62, 5  ;;  %v1616_v33 = vshll.u32 %v5289_v31, 16 }
  0xf2   : > { %v1990_v22 = vpack.c.b16 %v1970_v24, %v1969_v15  ;;  %2394 = vmatpush.bf16.xpose.msra.mxu2 %v2344_v13  ;;  %v1608_v27 = vrot.slane %v1606_v12, 5  ;;  %v1612_v28 = vrot.slane %v1610_v7, 4  ;;  %v1789_v45 = vshrl.u32 %v3994_v23, 16  ;;  %v4211_v13 = vld [vmem:[%s4577_s28 + $0x74] sm:$0x1] }
  0xf3   : > { %v2327_v42 = vpack.c.b16 %v2305_v18, %v2304_v9  ;;  %v1603_v16 = vor.u32 %v1602_v30, %v1599_v44  ;;  %v1618_v34 = vrot.slane %v1616_v33, 5  ;;  %v1792_v53 = vshll.u32 %v3994_v23, 16  ;;  %v4210_v44 = vld [vmem:[%s4577_s28 + $0x70] sm:$0xf] }
  0xf4   : > { %v2035_v5 = vsel %vm671_vm0, %v1990_v22, 0  ;;  %v1613_v55 = vor.u32 %v1612_v28, %v1608_v27  ;;  %v1791_v31 = vrot.slane %v1789_v45, 4  ;;  %v1798_v26 = vshll.u32 %v5285_v14, 16  ;;  %v4233_v45 = vld [vmem:[%s4577_s28 + $0xcc] sm:$0xf] }
  0xf5   : > { %2072 = vmatpush.bf16.xpose.msra.mxu1 %v2035_v5  ;;  %v2368_v52 = vsel %vm671_vm0, %v2327_v42, 0  ;;  %v1604_v59 = vrot.slane %v1603_v16, 4  ;;  %v1794_v32 = vrot.slane %v1792_v53, 5  ;;  %v1802_v48 = vshrl.u32 %v5285_v14, 16  ;;  %v4036_v14 = vld [vmem:[%s4577_s28 + $0x6c] sm:$0xe] }
  0xf6   : > { %2413 = vmatpush.bf16.xpose.msra.mxu3 %v2368_v52  ;;  %v1808_v49 = vshll.u32 %v5295_v47, 16  ;;  %v1614_v21 = vrot.slane %v1613_v55, 4  ;;  %v1800_v4 = vrot.slane %v1798_v26, 5  ;;  %v4044_v19 = vrot.slane %v4028_v37, 9  ;;  %v4234_v26 = vld [vmem:[%s4577_s28 + $0xd0] sm:$0xf] }
  0xf7   : > { %v2161_v29 = vrot.slane %v5369_v46, 5  ;;  %v1609_v51 = vsel %vm4612_vm3, %v1604_v59, %v1608_v27  ;;  %v1795_v6 = vor.u32 %v1794_v32, %v1791_v31  ;;  %v1804_v61 = vrot.slane %v1802_v48, 4 }
  0xf8   : > { %v1810_v58 = vrot.slane %v1808_v49, 5  ;;  %v1619_v47 = vsel %vm4612_vm3, %v1614_v21, %v1618_v34  ;;  %v1951_v54 = vunpack.c.l.b16 %v1609_v51  ;;  %v2164_v15 = vrot.slane %v5381_v56, 5  ;;  %v4235_v49 = vld [vmem:[%s4577_s28 + $0xd4] sm:$0x1] }
  0xf9   : > { %v2162_v3 = vsel %vm4862_vm6, %v4044_v19, %v2161_v29  ;;  %v2163_v40 = vrot.slane %v2161_v29, 4  ;;  %v1952_v41 = vunpack.c.l.b16 %v1619_v47  ;;  %v1796_v17 = vrot.slane %v1795_v6, 4  ;;  %v3967_v6 = vld [vmem:[%s4577_s28 + $0x18] sm:$0xf] }
  0xfa   : > { %v1805_v1 = vor.u32 %v1804_v61, %v1800_v4  ;;  %v2286_v8 = vunpack.c.l.b16 %v2162_v3  ;;  %v4052_v57 = vrot.slane %v4036_v14, 9  ;;  %v2217_v2 = vrot.slane %v5378_v60, 5 }
  0xfb   : > { %v2220_v25 = vrot.slane %v5387_v39, 5  ;;  %v1981_v9 = vpack.c.b16 %v1952_v41, %v1951_v54  ;;  %v1801_v20 = vsel %vm4612_vm3, %v1796_v17, %v1800_v4  ;;  %v2165_v36 = vsel %vm4862_vm6, %v2163_v40, %v2164_v15 }
  0xfc   : > { %v1806_v24 = vrot.slane %v1805_v1, 4  ;;  %v1967_v11 = vunpack.c.l.b16 %v1801_v20  ;;  %v2287_v62 = vunpack.c.l.b16 %v2165_v36  ;;  %v2218_v23 = vsel %vm4862_vm6, %v4052_v57, %v2217_v2 }
  0xfd   : > { %v2219_v18 = vrot.slane %v2217_v2, 4  ;;  %v2008_v12 = vsel %vm671_vm0, %v1981_v9, 0  ;;  %v2302_v22 = vunpack.c.l.b16 %v2218_v23  ;;  %v2879_v30 = vshrl.u32 %v4209_v63, 16  ;;  %v3991_v9 = vld [vmem:[%s4577_s28 + $0x78] sm:$0xf] }
  0xfe   : > { %v1811_v7 = vsel %vm4612_vm3, %v1806_v24, %v1810_v58  ;;  %2054 = vmatpush.bf16.xpose.msra.mxu0 %v2008_v12  ;;  %v2318_v42 = vpack.c.b16 %v2287_v62, %v2286_v8  ;;  %v2882_v28 = vshll.u32 %v4209_v63, 16  ;;  %v2888_v34 = vshll.u32 %v4210_v44, 16 }
  0xff   : > { %v1968_v33 = vunpack.c.l.b16 %v1811_v7  ;;  %v2221_v27 = vsel %vm4862_vm6, %v2219_v18, %v2220_v25  ;;  %v2881_v16 = vrot.slane %v2879_v30, 4  ;;  %v2892_v53 = vshrl.u32 %v4210_v44, 16 }
 0x100   : > { %v2303_v5 = vunpack.c.l.b16 %v2221_v27  ;;  %v2341_v52 = vsel %vm671_vm0, %v2318_v42, 0  ;;  %v2884_v55 = vrot.slane %v2882_v28, 5  ;;  %v2898_v31 = vshll.u32 %v4211_v13, 16 }
 0x101   : > { %v1989_v37 = vpack.c.b16 %v1968_v33, %v1967_v11  ;;  %2395 = vmatpush.bf16.xpose.msra.mxu2 %v2341_v52  ;;  %v2890_v32 = vrot.slane %v2888_v34, 5  ;;  %v2894_v48 = vrot.slane %v2892_v53, 4  ;;  %v3071_v21 = vshrl.u32 %v4233_v45, 16 }
 0x102   : > { %v2326_v59 = vpack.c.b16 %v2303_v5, %v2302_v22  ;;  %v2885_v19 = vor.u32 %v2884_v55, %v2881_v16  ;;  %v2900_v29 = vrot.slane %v2898_v31, 5  ;;  %v3074_v51 = vshll.u32 %v4233_v45, 16 }
 0x103   : > { %v2032_v4 = vsel %vm671_vm0, %v1989_v37, 0  ;;  %v2895_v58 = vor.u32 %v2894_v48, %v2890_v32  ;;  %v3073_v14 = vrot.slane %v3071_v21, 4  ;;  %v3080_v47 = vshll.u32 %v4234_v26, 16  ;;  %v5438_v21 = vld [vmem:[%s4577_s28 + $0x64] sm:$0xf] }
 0x104   : > { %2073 = vmatpush.bf16.xpose.msra.mxu1 %v2032_v4  ;;  %v2365_v61 = vsel %vm671_vm0, %v2326_v59, 0  ;;  %v2886_v54 = vrot.slane %v2885_v19, 4  ;;  %v3076_v3 = vrot.slane %v3074_v51, 5  ;;  %v3084_v40 = vshrl.u32 %v4234_v26, 16 }
 0x105   : > { %2414 = vmatpush.bf16.xpose.msra.mxu3 %v2365_v61  ;;  %v3090_v41 = vshll.u32 %v4235_v49, 16  ;;  %v2896_v17 = vrot.slane %v2895_v58, 4  ;;  %v3082_v1 = vrot.slane %v3080_v47, 5  ;;  %v1573_v15 = vshrl.u32 %v3967_v6, 16  ;;  %v5442_v47 = vld [vmem:[%s4577_s28 + $0x68] sm:$0x1] }
 0x106   : > { %v1576_v8 = vshll.u32 %v3967_v6, 16  ;;  %v2891_v57 = vsel %vm4612_vm3, %v2886_v54, %v2890_v32  ;;  %v3077_v2 = vor.u32 %v3076_v3, %v3073_v14  ;;  %v3086_v25 = vrot.slane %v3084_v40, 4  ;;  %v4230_v6 = vld [vmem:[%s4577_s28 + $0xc0] sm:$0xf]  ;;  %v4347_v3 = vld [vmem:[%s6034_s1 + $0x50] sm:$0xff] }
 0x107   : > { %v3092_v63 = vrot.slane %v3090_v41, 5  ;;  %v2901_v20 = vsel %vm4612_vm3, %v2896_v17, %v2900_v29  ;;  %v3123_v24 = vunpack.c.l.b16 %v2891_v57  ;;  %v1575_v36 = vrot.slane %v1573_v15, 4 }
 0x108   : > { %v1578_v11 = vrot.slane %v1576_v8, 5  ;;  %v3124_v62 = vunpack.c.l.b16 %v2901_v20  ;;  %v3078_v23 = vrot.slane %v3077_v2, 4  ;;  %v3087_v18 = vor.u32 %v3086_v25, %v3082_v1  ;;  %4072 = vmatmul.msk.bf16.vlgmr.msra.gmra.mxu2 %vm671_vm0, %v4347_v3 }
 0x109   : > { %v1582_v44 = vshll.u32 %v5323_v10, 16  ;;  %v1586_v7 = vshrl.u32 %v5323_v10, 16  ;;  %v1592_v22 = vshll.u32 %v5335_v38, 16  ;;  %v1765_v13 = vshrl.u32 %v3991_v9, 16  ;;  %v4206_v38 = vld [vmem:[%s4577_s28 + $0x60] sm:$0xf] }
 0x10a   : > { %v1579_v12 = vor.u32 %v1578_v11, %v1575_v36  ;;  %v3148_v30 = vpack.c.b16 %v3124_v62, %v3123_v24  ;;  %v3083_v33 = vsel %vm4612_vm3, %v3078_v23, %v3082_v1  ;;  %v3088_v42 = vrot.slane %v3087_v18, 4  ;;  %v5458_v11 = vld [vmem:[%s4577_s28 + $0xc4] sm:$0xf]  ;;  %v5461_v62 = vld [vmem:[%s4577_s28 + $0xc8] sm:$0x1] }
 0x10b   : > { %v1584_v27 = vrot.slane %v1582_v44, 5  ;;  %v3139_v28 = vunpack.c.l.b16 %v3083_v33  ;;  %v1588_v5 = vrot.slane %v1586_v7, 4  ;;  %v1594_v16 = vrot.slane %v1592_v22, 5  ;;  %v3964_v7 = vld [vmem:[%s4577_s28 + $0xc] sm:$0xf] }
 0x10c   : > { %v1580_v45 = vrot.slane %v1579_v12, 4  ;;  %v3185_v34 = vsel %vm671_vm0, %v3148_v30, 0  ;;  %v3093_v53 = vsel %vm4612_vm3, %v3088_v42, %v3092_v63  ;;  %v1767_v10 = vrot.slane %v1765_v13, 4  ;;  %4074 = vmatmul.msk.bf16.vlgmr.msra.gmra.mxu3 %vm671_vm0, %v4347_v3 }
 0x10d   : > { %v1768_v37 = vshll.u32 %v3991_v9, 16  ;;  %3211 = vmatpush.bf16.xpose.msrb.mxu2 %v3185_v34  ;;  %v3140_v52 = vunpack.c.l.b16 %v3093_v53  ;;  %v1589_v31 = vor.u32 %v1588_v5, %v1584_v27  ;;  %v1774_v26 = vshll.u32 %v5332_v50, 16 }
 0x10e   : > { %v1585_v55 = vsel %vm4612_vm3, %v1580_v45, %v1584_v27  ;;  %v1778_v48 = vshrl.u32 %v5332_v50, 16  ;;  %v1784_v49 = vshll.u32 %v5341_v43, 16  ;;  %v2855_v51 = vshrl.u32 %v4206_v38, 16 }
 0x10f   : > { %v1949_v59 = vunpack.c.l.b16 %v1585_v55  ;;  %v1770_v32 = vrot.slane %v1768_v37, 5  ;;  %v3156_v4 = vpack.c.b16 %v3140_v52, %v3139_v28  ;;  %v1590_v19 = vrot.slane %v1589_v31, 4 }
 0x110   : > { %v1776_v29 = vrot.slane %v1774_v26, 5  ;;  %v1780_v58 = vrot.slane %v1778_v48, 4  ;;  %v1786_v14 = vrot.slane %v1784_v49, 5  ;;  %v2858_v54 = vshll.u32 %v4206_v38, 16 }
 0x111   : > { %v1771_v61 = vor.u32 %v1770_v32, %v1767_v10  ;;  %v3209_v50 = vsel %vm671_vm0, %v3156_v4, 0  ;;  %v1595_v43 = vsel %vm4612_vm3, %v1590_v19, %v1594_v16  ;;  %v2857_v40 = vrot.slane %v2855_v51, 4  ;;  %v3988_v32 = vld [vmem:[%s4577_s28 + $0x6c] sm:$0xf] }
 0x112   : > { %v2864_v41 = vshll.u32 %v5438_v21, 16  ;;  %3230 = vmatpush.bf16.xpose.msrb.mxu3 %v3209_v50  ;;  %v1950_v17 = vunpack.c.l.b16 %v1595_v43  ;;  %v1781_v15 = vor.u32 %v1780_v58, %v1776_v29  ;;  %v2860_v8 = vrot.slane %v2858_v54, 5 }
 0x113   : > { %v1772_v1 = vrot.slane %v1771_v61, 4  ;;  %v2868_v2 = vshrl.u32 %v5438_v21, 16  ;;  %v2874_v25 = vshll.u32 %v5442_v47, 16  ;;  %v3047_v63 = vshrl.u32 %v4230_v6, 16 }
 0x114   : > { %v2866_v57 = vrot.slane %v2864_v41, 5  ;;  %v1980_v9 = vpack.c.b16 %v1950_v17, %v1949_v59  ;;  %v1782_v24 = vrot.slane %v1781_v15, 4  ;;  %v2861_v36 = vor.u32 %v2860_v8, %v2857_v40  ;;  %v4356_v17 = vld [vmem:[%s4577_s28 + $0x6c] sm:$0xff] }
 0x115   : > { %v1777_v20 = vsel %vm4612_vm3, %v1772_v1, %v1776_v29  ;;  %v2870_v18 = vrot.slane %v2868_v2, 4  ;;  %v2876_v44 = vrot.slane %v2874_v25, 5  ;;  %v3049_v12 = vrot.slane %v3047_v63, 4 }
 0x116   : > { %v1965_v23 = vunpack.c.l.b16 %v1777_v20  ;;  %v2005_v22 = vsel %vm671_vm0, %v1980_v9, 0  ;;  %v1787_v13 = vsel %vm4612_vm3, %v1782_v24, %v1786_v14  ;;  %v2862_v30 = vrot.slane %v2861_v36, 4  ;;  %v4364_v36 = vld [vmem:[%s4577_s28 + $0xcc] sm:$0xff] }
 0x117   : > { %v3050_v33 = vshll.u32 %v4230_v6, 16  ;;  %2055 = vmatpush.bf16.xpose.msra.mxu0 %v2005_v22  ;;  %v1966_v42 = vunpack.c.l.b16 %v1787_v13  ;;  %v2871_v27 = vor.u32 %v2870_v18, %v2866_v57  ;;  %v3056_v28 = vshll.u32 %v5458_v11, 16 }
 0x118   : > { %v3060_v45 = vshrl.u32 %v5458_v11, 16  ;;  %v2867_v5 = vsel %vm4612_vm3, %v2862_v30, %v2866_v57  ;;  %v3066_v34 = vshll.u32 %v5461_v62, 16  ;;  %v1549_v53 = vshrl.u32 %v3964_v7, 16 }
 0x119   : > { %v3052_v16 = vrot.slane %v3050_v33, 5  ;;  %v1988_v10 = vpack.c.b16 %v1966_v42, %v1965_v23  ;;  %v2872_v37 = vrot.slane %v2871_v27, 4  ;;  %v3121_v38 = vunpack.c.l.b16 %v2867_v5  ;;  %v4203_v33 = vld [vmem:[%s4577_s28 + $0x54] sm:$0xf]  ;;  %v5494_v42 = vld [vmem:[%s4577_s28 + $0x58] sm:$0xf] }
 0x11a   : > { %v3058_v52 = vrot.slane %v3056_v28, 5  ;;  %v3062_v31 = vrot.slane %v3060_v45, 4  ;;  %v3068_v26 = vrot.slane %v3066_v34, 5  ;;  %v1551_v59 = vrot.slane %v1549_v53, 4  ;;  %v5499_v5 = vld [vmem:[%s4577_s28 + $0x5c] sm:$0x1] }
 0x11b   : > { %v3053_v55 = vor.u32 %v3052_v16, %v3049_v12  ;;  %v2029_v48 = vsel %vm671_vm0, %v1988_v10, 0  ;;  %v2877_v49 = vsel %vm4612_vm3, %v2872_v37, %v2876_v44  ;;  %v1552_v4 = vshll.u32 %v3964_v7, 16 }
 0x11c   : > { %v1558_v19 = vshll.u32 %v5369_v46, 16  ;;  %2074 = vmatpush.bf16.xpose.msra.mxu1 %v2029_v48  ;;  %v3122_v29 = vunpack.c.l.b16 %v2877_v49  ;;  %v3063_v6 = vor.u32 %v3062_v31, %v3058_v52  ;;  %v1562_v61 = vshrl.u32 %v5369_v46, 16  ;;  %v4227_v48 = vld [vmem:[%s4577_s28 + $0xb4] sm:$0xf] }
 0x11d   : > { %v3054_v51 = vrot.slane %v3053_v55, 4  ;;  %v1554_v58 = vrot.slane %v1552_v4, 5  ;;  %v1568_v54 = vshll.u32 %v5381_v56, 16  ;;  %v1741_v3 = vshrl.u32 %v3988_v32, 16 }
 0x11e   : > { %v1560_v14 = vrot.slane %v1558_v19, 5  ;;  %v3147_v50 = vpack.c.b16 %v3122_v29, %v3121_v38  ;;  %v3064_v40 = vrot.slane %v3063_v6, 4  ;;  %v1564_v41 = vrot.slane %v1562_v61, 4 }
 0x11f   : > { %v3059_v43 = vsel %vm4612_vm3, %v3054_v51, %v3058_v52  ;;  %v1555_v15 = vor.u32 %v1554_v58, %v1551_v59  ;;  %v1570_v8 = vrot.slane %v1568_v54, 5  ;;  %v1743_v57 = vrot.slane %v1741_v3, 4  ;;  %v5515_v51 = vld [vmem:[%s4577_s28 + $0xb8] sm:$0xf]  ;;  %v5521_v54 = vld [vmem:[%s4577_s28 + $0xbc] sm:$0x1] }
 0x120   : > { %v3137_v1 = vunpack.c.l.b16 %v3059_v43  ;;  %v3182_v2 = vsel %vm671_vm0, %v3147_v50, 0  ;;  %v3069_v46 = vsel %vm4612_vm3, %v3064_v40, %v3068_v26  ;;  %v1565_v25 = vor.u32 %v1564_v41, %v1560_v14  ;;  %v4355_v41 = vld [vmem:[%s4577_s28 + $0x60] sm:$0xff] }
 0x121   : > { %v1744_v56 = vshll.u32 %v3988_v32, 16  ;;  %3212 = vmatpush.bf16.xpose.msrb.mxu2 %v3182_v2  ;;  %v3138_v63 = vunpack.c.l.b16 %v3069_v46  ;;  %v1556_v9 = vrot.slane %v1555_v15, 4  ;;  %v1750_v20 = vshll.u32 %v5378_v60, 16 }
 0x122   : > { %v1754_v24 = vshrl.u32 %v5378_v60, 16  ;;  %v1566_v23 = vrot.slane %v1565_v25, 4  ;;  %v1760_v44 = vshll.u32 %v5387_v39, 16  ;;  %v2590_v12 = vsel %vm671_vm0, %v4356_v17, 0  ;;  %v4348_v39 = vld [vmem:[%s6034_s1 + $0x58] sm:$0xff] }
 0x123   : > { %v1746_v18 = vrot.slane %v1744_v56, 5  ;;  %v3155_v7 = vpack.c.b16 %v3138_v63, %v3137_v1  ;;  %v1561_v22 = vsel %vm4612_vm3, %v1556_v9, %v1560_v14  ;;  %v1752_v13 = vrot.slane %v1750_v20, 5  ;;  %4073 = vmatmul.msk.bf16.gmra.mxu2 %vm671_vm0, %v4348_v39  ;;  %4075 = vmatmul.msk.bf16.gmra.mxu3 %vm671_vm0, %v4348_v39  ;;  %v4363_v56 = vld [vmem:[%s4577_s28 + $0xc0] sm:$0xff]  ;;  %v4200_v63 = vld [vmem:[%s4577_s28 + $0x48] sm:$0xf] }
 0x124   : > { %v1756_v30 = vrot.slane %v1754_v24, 4  ;;  %v1571_v60 = vsel %vm4612_vm3, %v1566_v23, %v1570_v8  ;;  %v1947_v27 = vunpack.c.l.b16 %v1561_v22  ;;  %v1762_v45 = vrot.slane %v1760_v44, 5  ;;  %v4345_v23 = vld [vmem:[%s6034_s1 + $0x40] sm:$0xff]  ;;  %v5537_v22 = vld [vmem:[%s4577_s28 + $0x4c] sm:$0xf] }
 0x125   : > { %v1747_v28 = vor.u32 %v1746_v18, %v1743_v57  ;;  %v3206_v16 = vsel %vm671_vm0, %v3155_v7, 0  ;;  %v1948_v34 = vunpack.c.l.b16 %v1571_v60  ;;  %v2614_v10 = vsel %vm671_vm0, %v4364_v36, 0 }
 0x126   : > { %v1757_v53 = vor.u32 %v1756_v30, %v1752_v13  ;;  %3231 = vmatpush.bf16.xpose.msrb.mxu3 %v3206_v16  ;;  %v2831_v38 = vshrl.u32 %v4203_v33, 16  ;;  %v2834_v52 = vshll.u32 %v4203_v33, 16  ;;  %v2840_v55 = vshll.u32 %v5494_v42, 16 }
 0x127   : > { %v1748_v37 = vrot.slane %v1747_v28, 4  ;;  %v1979_v31 = vpack.c.b16 %v1948_v34, %v1947_v27  ;;  %v2844_v59 = vshrl.u32 %v5494_v42, 16  ;;  %v2850_v32 = vshll.u32 %v5499_v5, 16  ;;  %v5542_v27 = vld [vmem:[%s4577_s28 + $0x50] sm:$0x1] }
 0x128   : > { %v1758_v26 = vrot.slane %v1757_v53, 4  ;;  %v2833_v4 = vrot.slane %v2831_v38, 4  ;;  %v2836_v19 = vrot.slane %v2834_v52, 5  ;;  %v2842_v29 = vrot.slane %v2840_v55, 5 }
 0x129   : > { %v1753_v49 = vsel %vm4612_vm3, %v1748_v37, %v1752_v13  ;;  %v2002_v6 = vsel %vm671_vm0, %v1979_v31, 0  ;;  %v2846_v14 = vrot.slane %v2844_v59, 4  ;;  %v2852_v43 = vrot.slane %v2850_v32, 5 }
 0x12a   : > { %v1763_v61 = vsel %vm4612_vm3, %v1758_v26, %v1762_v45  ;;  %v1963_v58 = vunpack.c.l.b16 %v1753_v49  ;;  %2056 = vmatpush.bf16.xpose.msra.mxu0 %v2002_v6  ;;  %v2837_v50 = vor.u32 %v2836_v19, %v2833_v4  ;;  %v3023_v40 = vshrl.u32 %v4227_v48, 16  ;;  %v4224_v26 = vld [vmem:[%s4577_s28 + $0xa8] sm:$0xf]  ;;  %v5555_v4 = vld [vmem:[%s4577_s28 + $0xac] sm:$0xf] }
 0x12b   : > { %v1964_v3 = vunpack.c.l.b16 %v1763_v61  ;;  %v2847_v17 = vor.u32 %v2846_v14, %v2842_v29  ;;  %v3026_v1 = vshll.u32 %v4227_v48, 16  ;;  %v3032_v15 = vshll.u32 %v5515_v51, 16 }
 0x12c   : > { %v3036_v8 = vshrl.u32 %v5515_v51, 16  ;;  %v2838_v2 = vrot.slane %v2837_v50, 4  ;;  %v3025_v46 = vrot.slane %v3023_v40, 4  ;;  %v3042_v25 = vshll.u32 %v5521_v54, 16 }
 0x12d   : > { %v1987_v57 = vpack.c.b16 %v1964_v3, %v1963_v58  ;;  %v2848_v9 = vrot.slane %v2847_v17, 4  ;;  %v3028_v20 = vrot.slane %v3026_v1, 5  ;;  %v3034_v24 = vrot.slane %v3032_v15, 5  ;;  %v5559_v58 = vld [vmem:[%s4577_s28 + $0xb0] sm:$0x1]  ;;  %v4354_v15 = vld [vmem:[%s4577_s28 + $0x54] sm:$0xff] }
 0x12e   : > { %v3038_v36 = vrot.slane %v3036_v8, 4  ;;  %v2843_v44 = vsel %vm4612_vm3, %v2838_v2, %v2842_v29  ;;  %v2587_v7 = vsel %vm671_vm0, %v4355_v41, 0  ;;  %v2611_v45 = vsel %vm671_vm0, %v4363_v56, 0  ;;  %v4362_v8 = vld [vmem:[%s4577_s28 + $0xb4] sm:$0xff]  ;;  %v4197_v56 = vld [vmem:[%s4577_s28 + $0x3c] sm:$0xf] }
 0x12f   : > { %v2026_v18 = vsel %vm671_vm0, %v1987_v57, 0  ;;  %v2853_v13 = vsel %vm4612_vm3, %v2848_v9, %v2852_v43  ;;  %v3119_v30 = vunpack.c.l.b16 %v2843_v44  ;;  %v3029_v33 = vor.u32 %v3028_v20, %v3025_v46 }
 0x130   : > { %2075 = vmatpush.bf16.xpose.msra.mxu1 %v2026_v18  ;;  %v3039_v60 = vor.u32 %v3038_v36, %v3034_v24  ;;  %v3120_v28 = vunpack.c.l.b16 %v2853_v13  ;;  %v2807_v39 = vshrl.u32 %v4200_v63, 16  ;;  %v2810_v16 = vshll.u32 %v4200_v63, 16  ;;  %v5572_v36 = vld [vmem:[%s4577_s28 + $0x40] sm:$0xf] }
 0x131   : > { %v3030_v34 = vrot.slane %v3029_v33, 4  ;;  %4024 = vmatmul.msk.bf16.vlgmr.msra.gmra.mxu0 %vm671_vm0, %v4345_v23  ;;  %v2816_v37 = vshll.u32 %v5537_v22, 16  ;;  %v2820_v38 = vshrl.u32 %v5537_v22, 16  ;;  %v2999_v50 = vshrl.u32 %v4224_v26, 16 }
 0x132   : > { %2616 = vmatpush.bf16.xpose.msrb.mxu0 %v2590_v12  ;;  %v3044_v12 = vrot.slane %v3042_v25, 5  ;;  %v3040_v53 = vrot.slane %v3039_v60, 4  ;;  %v3146_v52 = vpack.c.b16 %v3120_v28, %v3119_v30  ;;  %v2809_v55 = vrot.slane %v2807_v39, 4 }
 0x133   : > { %v2812_v31 = vrot.slane %v2810_v16, 5  ;;  %v3035_v59 = vsel %vm4612_vm3, %v3030_v34, %v3034_v24  ;;  %v2818_v48 = vrot.slane %v2816_v37, 5  ;;  %v2822_v49 = vrot.slane %v2820_v38, 4 }
 0x134   : > { %v3045_v32 = vsel %vm4612_vm3, %v3040_v53, %v3044_v12  ;;  %v3179_v19 = vsel %vm671_vm0, %v3146_v52, 0  ;;  %v3135_v29 = vunpack.c.l.b16 %v3035_v59  ;;  %v3002_v43 = vshll.u32 %v4224_v26, 16  ;;  %v4221_v52 = vld [vmem:[%s4577_s28 + $0x9c] sm:$0xf]  ;;  %v5588_v59 = vld [vmem:[%s4577_s28 + $0xa0] sm:$0xf] }
 0x135   : > { %v3136_v6 = vunpack.c.l.b16 %v3045_v32  ;;  %v2813_v61 = vor.u32 %v2812_v31, %v2809_v55  ;;  %3213 = vmatpush.bf16.xpose.msrb.mxu2 %v3179_v19  ;;  %v2823_v14 = vor.u32 %v2822_v49, %v2818_v48  ;;  %v3008_v17 = vshll.u32 %v5555_v4, 16  ;;  %v4346_v32 = vld [vmem:[%s6034_s1 + $0x48] sm:$0xff] }
 0x136   : > { %v3012_v1 = vshrl.u32 %v5555_v4, 16  ;;  %v3001_v2 = vrot.slane %v2999_v50, 4  ;;  %v3004_v46 = vrot.slane %v3002_v43, 5  ;;  %v3018_v25 = vshll.u32 %v5559_v58, 16  ;;  %v4353_v43 = vld [vmem:[%s4577_s28 + $0x48] sm:$0xff] }
 0x137   : > { %v3154_v40 = vpack.c.b16 %v3136_v6, %v3135_v29  ;;  %4026 = vmatmul.msk.bf16.vlgmr.msra.gmra.mxu1 %vm671_vm0, %v4345_v23  ;;  %v2814_v41 = vrot.slane %v2813_v61, 4  ;;  %v2824_v57 = vrot.slane %v2823_v14, 4  ;;  %v3010_v20 = vrot.slane %v3008_v17, 5  ;;  %v5597_v6 = vld [vmem:[%s4577_s28 + $0xa4] sm:$0x1] }
 0x138   : > { %2635 = vmatpush.bf16.xpose.msrb.mxu1 %v2614_v10  ;;  %v2826_v10 = vshll.u32 %v5542_v27, 16  ;;  %v3014_v24 = vrot.slane %v3012_v1, 4  ;;  %v3005_v44 = vor.u32 %v3004_v46, %v3001_v2  ;;  %v3020_v12 = vrot.slane %v3018_v25, 5  ;;  %v4361_v46 = vld [vmem:[%s4577_s28 + $0xa8] sm:$0xff] }
 0x139   : > { %v3203_v63 = vsel %vm671_vm0, %v3154_v40, 0  ;;  %v2819_v9 = vsel %vm4612_vm3, %v2814_v41, %v2818_v48  ;;  %v2584_v33 = vsel %vm671_vm0, %v4354_v15, 0  ;;  %v2608_v60 = vsel %vm671_vm0, %v4362_v8, 0 }
 0x13a   : > { %2617 = vmatpush.bf16.xpose.msrb.mxu0 %v2587_v7  ;;  %v2828_v3 = vrot.slane %v2826_v10, 5  ;;  %3232 = vmatpush.bf16.xpose.msrb.mxu3 %v3203_v63  ;;  %v3117_v18 = vunpack.c.l.b16 %v2819_v9  ;;  %v5577_v7 = vld [vmem:[%s4577_s28 + $0x44] sm:$0x1]  ;;  %v3015_v30 = vor.u32 %v3014_v24, %v3010_v20  ;;  %v3006_v28 = vrot.slane %v3005_v44, 4 }
 0x13b   : > { %v2786_v39 = vshll.u32 %v4197_v56, 16  ;;  %v2792_v16 = vshll.u32 %v5572_v36, 16  ;;  %v2796_v37 = vshrl.u32 %v5572_v36, 16  ;;  %v2802_v38 = vshll.u32 %v5577_v7, 16 }
 0x13c   : > { %v2829_v23 = vsel %vm4612_vm3, %v2824_v57, %v2828_v3  ;;  %v3016_v53 = vrot.slane %v3015_v30, 4  ;;  %v3011_v55 = vsel %vm4612_vm3, %v3006_v28, %v3010_v20  ;;  %v2975_v50 = vshrl.u32 %v4221_v52, 16  ;;  %v4194_v20 = vld [vmem:[%s4577_s28 + $0x30] sm:$0xf]  ;;  %v5616_v28 = vld [vmem:[%s4577_s28 + $0x38] sm:$0x1] }
 0x13d   : > { %v3118_v13 = vunpack.c.l.b16 %v2829_v23  ;;  %v2788_v10 = vrot.slane %v2786_v39, 5  ;;  %v2794_v26 = vrot.slane %v2792_v16, 5  ;;  %v3133_v19 = vunpack.c.l.b16 %v3011_v55 }
 0x13e   : > { %v3021_v49 = vsel %vm4612_vm3, %v3016_v53, %v3020_v12  ;;  %v2798_v29 = vrot.slane %v2796_v37, 4  ;;  %v2804_v3 = vrot.slane %v2802_v38, 5  ;;  %v2978_v41 = vshll.u32 %v4221_v52, 16  ;;  %v5611_v12 = vld [vmem:[%s4577_s28 + $0x34] sm:$0xf] }
 0x13f   : > { %v3145_v34 = vpack.c.b16 %v3118_v13, %v3117_v18  ;;  %v3134_v61 = vunpack.c.l.b16 %v3021_v49  ;;  %v2984_v17 = vshll.u32 %v5588_v59, 16  ;;  %v2988_v1 = vshrl.u32 %v5588_v59, 16 }
 0x140   : > { %2636 = vmatpush.bf16.xpose.msrb.mxu1 %v2611_v45  ;;  %v2783_v45 = vshrl.u32 %v4197_v56, 16  ;;  %v2799_v40 = vor.u32 %v2798_v29, %v2794_v26  ;;  %v2977_v57 = vrot.slane %v2975_v50, 4  ;;  %v2994_v2 = vshll.u32 %v5597_v6, 16 }
 0x141   : > { %v3176_v48 = vsel %vm671_vm0, %v3145_v34, 0  ;;  %v3153_v15 = vpack.c.b16 %v3134_v61, %v3133_v19  ;;  %4025 = vmatmul.msk.bf16.gmra.mxu0 %vm671_vm0, %v4346_v32  ;;  %v2980_v56 = vrot.slane %v2978_v41, 5  ;;  %v2986_v63 = vrot.slane %v2984_v17, 5  ;;  %v5629_v61 = vld [vmem:[%s4577_s28 + $0x94] sm:$0xf] }
 0x142   : > { %2618 = vmatpush.bf16.xpose.msrb.mxu0 %v2584_v33  ;;  %v2785_v31 = vrot.slane %v2783_v45, 4  ;;  %3214 = vmatpush.bf16.xpose.msrb.mxu2 %v3176_v48  ;;  %v2800_v25 = vrot.slane %v2799_v40, 4  ;;  %v2990_v9 = vrot.slane %v2988_v1, 4  ;;  %v2996_v18 = vrot.slane %v2994_v2, 5  ;;  %v4218_v48 = vld [vmem:[%s4577_s28 + $0x90] sm:$0xf] }
 0x143   : > { %v3200_v24 = vsel %vm671_vm0, %v3153_v15, 0  ;;  %v2581_v44 = vsel %vm671_vm0, %v4353_v43, 0  ;;  %v2981_v33 = vor.u32 %v2980_v56, %v2977_v57  ;;  %v2605_v39 = vsel %vm671_vm0, %v4361_v46, 0  ;;  %v5633_v40 = vld [vmem:[%s4577_s28 + $0x98] sm:$0x1]  ;;  %v4360_v56 = vld [vmem:[%s4577_s28 + $0x9c] sm:$0xff] }
 0x144   : > { %v2789_v14 = vor.u32 %v2788_v10, %v2785_v31  ;;  %3233 = vmatpush.bf16.xpose.msrb.mxu3 %v3200_v24  ;;  %v2805_v13 = vsel %vm4612_vm3, %v2800_v25, %v2804_v3  ;;  %v2759_v16 = vshrl.u32 %v4194_v20, 16  ;;  %v2762_v34 = vshll.u32 %v4194_v20, 16  ;;  %v4352_v25 = vld [vmem:[%s4577_s28 + $0x3c] sm:$0xff] }
 0x145   : > { %v3116_v45 = vunpack.c.l.b16 %v2805_v13  ;;  %v2982_v53 = vrot.slane %v2981_v33, 4  ;;  %v2768_v38 = vshll.u32 %v5611_v12, 16  ;;  %v2772_v52 = vshrl.u32 %v5611_v12, 16 }
 0x146   : > { %v2790_v8 = vrot.slane %v2789_v14, 4  ;;  %v2761_v31 = vrot.slane %v2759_v16, 4  ;;  %v2764_v10 = vrot.slane %v2762_v34, 5  ;;  %v2951_v1 = vshrl.u32 %v4218_v48, 16 }
 0x147   : > { %4027 = vmatmul.msk.bf16.gmra.mxu1 %vm671_vm0, %v4346_v32  ;;  %v2987_v49 = vsel %vm4612_vm3, %v2982_v53, %v2986_v63  ;;  %v2770_v29 = vrot.slane %v2768_v38, 5  ;;  %v2774_v32 = vrot.slane %v2772_v52, 4  ;;  %v2954_v15 = vshll.u32 %v4218_v48, 16  ;;  %v5656_v38 = vpop.f32.mrf.mxu2  ;;  %v5658_v52 = vpop.f32.mrf.mxu3 }
 0x148   : > { %2637 = vmatpush.bf16.xpose.msrb.mxu1 %v2608_v60  ;;  %v2795_v23 = vsel %vm4612_vm3, %v2790_v8, %v2794_v26  ;;  %v2991_v60 = vor.u32 %v2990_v9, %v2986_v63  ;;  %v2778_v26 = vshll.u32 %v5616_v28, 16  ;;  %v3131_v3 = vunpack.c.l.b16 %v2987_v49 }
 0x149   : > { %v3115_v30 = vunpack.c.l.b16 %v2795_v23  ;;  %v2765_v43 = vor.u32 %v2764_v10, %v2761_v31  ;;  %v2775_v41 = vor.u32 %v2774_v32, %v2770_v29  ;;  %v2960_v2 = vshll.u32 %v5629_v61, 16  ;;  %v4191_v23 = vld [vmem:[%s4577_s28 + $0x24] sm:$0xf] }
 0x14a   : > { %2619 = vmatpush.bf16.xpose.msrb.mxu0 %v2581_v44  ;;  %v2992_v37 = vrot.slane %v2991_v60, 4  ;;  %v2780_v17 = vrot.slane %v2778_v26, 5  ;;  %v2964_v46 = vshrl.u32 %v5629_v61, 16  ;;  %v2953_v9 = vrot.slane %v2951_v1, 4  ;;  %v5643_v44 = vpop.f32.mrf.mxu1 }
 0x14b   : > { %v3144_v55 = vpack.c.b16 %v3116_v45, %v3115_v30  ;;  %v2766_v57 = vrot.slane %v2765_v43, 4  ;;  %v2776_v63 = vrot.slane %v2775_v41, 4  ;;  %v2956_v20 = vrot.slane %v2954_v15, 5  ;;  %v5649_v45 = vld [vmem:[%s4577_s28 + $0x28] sm:$0xf] }
 0x14c   : > { %v2997_v19 = vsel %vm4612_vm3, %v2992_v37, %v2996_v18  ;;  %v2970_v24 = vshll.u32 %v5633_v40, 16  ;;  %v5641_v18 = vpop.f32.mrf.mxu0  ;;  %v2962_v33 = vrot.slane %v2960_v2, 5  ;;  %v2966_v60 = vrot.slane %v2964_v46, 4  ;;  %v5654_v37 = vld [vmem:[%s4577_s28 + $0x2c] sm:$0x1] }
 0x14d   : > { %v3173_v14 = vsel %vm671_vm0, %v3144_v55, 0  ;;  %v3132_v50 = vunpack.c.l.b16 %v2997_v19  ;;  %v2771_v30 = vsel %vm4612_vm3, %v2766_v57, %v2770_v29  ;;  %v2957_v34 = vor.u32 %v2956_v20, %v2953_v9  ;;  %v4215_v43 = vld [vmem:[%s4577_s28 + $0x84] sm:$0xf] }
 0x14e   : > { %3215 = vmatpush.bf16.xpose.msrb.mxu2 %v3173_v14  ;;  %v3113_v16 = vunpack.c.l.b16 %v2771_v30  ;;  %v2972_v53 = vrot.slane %v2970_v24, 5  ;;  %v2967_v31 = vor.u32 %v2966_v60, %v2962_v33  ;;  %v2578_v10 = vsel %vm671_vm0, %v4352_v25, 0 }
 0x14f   : > { %v3152_v8 = vpack.c.b16 %v3132_v50, %v3131_v3  ;;  %v2602_v26 = vsel %vm671_vm0, %v4360_v56, 0  ;;  %v2958_v48 = vrot.slane %v2957_v34, 4  ;;  %v2735_v49 = vshrl.u32 %v4191_v23, 16  ;;  %v5675_v56 = vld [vmem:[%s4577_s28 + $0x8c] sm:$0x1] }
 0x150   : > { %2638 = vmatpush.bf16.xpose.msrb.mxu1 %v2605_v39  ;;  %v2781_v39 = vsel %vm4612_vm3, %v2776_v63, %v2780_v17  ;;  %v2738_v19 = vshll.u32 %v4191_v23, 16  ;;  %v2744_v29 = vshll.u32 %v5649_v45, 16  ;;  %v2968_v14 = vrot.slane %v2967_v31, 4  ;;  %v4351_v23 = vld [vmem:[%s4577_s28 + $0x30] sm:$0xff] }
 0x151   : > { %v3197_v13 = vsel %vm671_vm0, %v3152_v8, 0  ;;  %v3114_v55 = vunpack.c.l.b16 %v2781_v39  ;;  %v2748_v3 = vshrl.u32 %v5649_v45, 16  ;;  %v2754_v50 = vshll.u32 %v5654_v37, 16  ;;  %v5669_v8 = vld [vmem:[%s4577_s28 + $0x88] sm:$0xf] }
 0x152   : > { %3234 = vmatpush.bf16.xpose.msrb.mxu3 %v3197_v13  ;;  %2620 = vmatpush.bf16.xpose.msrb.mxu0 %v2578_v10  ;;  %v2963_v41 = vsel %vm4612_vm3, %v2958_v48, %v2962_v33  ;;  %v2737_v17 = vrot.slane %v2735_v49, 4  ;;  %v2740_v1 = vrot.slane %v2738_v19, 5  ;;  %v2746_v15 = vrot.slane %v2744_v29, 5  ;;  %v5684_v10 = vpop.f32.mrf.mxu1 }
 0x153   : > { %v3143_v32 = vpack.c.b16 %v3114_v55, %v3113_v16  ;;  %v2973_v2 = vsel %vm4612_vm3, %v2968_v14, %v2972_v53  ;;  %v3129_v46 = vunpack.c.l.b16 %v2963_v41  ;;  %v2750_v25 = vrot.slane %v2748_v3, 4  ;;  %v4359_v55 = vld [vmem:[%s4577_s28 + $0x90] sm:$0xff]  ;;  %v5693_v41 = vpop.f32.mrf.mxu3 }
 0x154   : > { %v3130_v63 = vunpack.c.l.b16 %v2973_v2  ;;  %v2741_v9 = vor.u32 %v2740_v1, %v2737_v17  ;;  %v2756_v20 = vrot.slane %v2754_v50, 5  ;;  %v2927_v24 = vshrl.u32 %v4215_v43, 16  ;;  %v5682_v31 = vpop.f32.mrf.mxu0  ;;  %v4188_v50 = vld [vmem:[%s4577_s28 + $0x18] sm:$0xf] }
 0x155   : > { %v3170_v57 = vsel %vm671_vm0, %v3143_v32, 0  ;;  %v2751_v13 = vor.u32 %v2750_v25, %v2746_v15  ;;  %v2930_v30 = vshll.u32 %v4215_v43, 16  ;;  %v2936_v33 = vshll.u32 %v5669_v8, 16  ;;  %v5691_v43 = vpop.f32.mrf.mxu2 }
 0x156   : > { %3216 = vmatpush.bf16.xpose.msrb.mxu2 %v3170_v57  ;;  %v2940_v60 = vshrl.u32 %v5669_v8, 16  ;;  %v3151_v39 = vpack.c.b16 %v3130_v63, %v3129_v46  ;;  %v2742_v16 = vrot.slane %v2741_v9, 4  ;;  %v2929_v34 = vrot.slane %v2927_v24, 4  ;;  %v5698_v46 = vld [vmem:[%s4577_s28 + $0x1c] sm:$0xf] }
 0x157   : > { %v2946_v53 = vshll.u32 %v5675_v56, 16  ;;  %v2932_v48 = vrot.slane %v2930_v30, 5  ;;  %v2938_v49 = vrot.slane %v2936_v33, 5  ;;  %v2575_v3 = vsel %vm671_vm0, %v4351_v23, 0 }
 0x158   : > { %2639 = vmatpush.bf16.xpose.msrb.mxu1 %v2602_v26  ;;  %v2752_v26 = vrot.slane %v2751_v13, 4  ;;  %v2942_v19 = vrot.slane %v2940_v60, 4  ;;  %v3194_v29 = vsel %vm671_vm0, %v3151_v39, 0  ;;  %v2747_v32 = vsel %vm4612_vm3, %v2742_v16, %v2746_v15  ;;  %v5701_v15 = vld [vmem:[%s4577_s28 + $0x20] sm:$0x1] }
 0x159   : > { %v2948_v14 = vrot.slane %v2946_v53, 5  ;;  %v3111_v1 = vunpack.c.l.b16 %v2747_v32  ;;  %v2933_v57 = vor.u32 %v2932_v48, %v2929_v34  ;;  %6045 = vst [vmem:[#allocation5_spill] sm:$0xff] %v5701_v15  ;;  %v2599_v63 = vsel %vm671_vm0, %v4359_v55, 0  ;;  %v5721_v53 = vld [vmem:[%s4577_s28 + $0x7c] sm:$0xf] }
 0x15a   : > { %3235 = vmatpush.bf16.xpose.msrb.mxu3 %v3194_v29  ;;  %v2757_v17 = vsel %vm4612_vm3, %v2752_v26, %v2756_v20  ;;  %v2943_v2 = vor.u32 %v2942_v19, %v2938_v49  ;;  %2621 = vmatpush.bf16.xpose.msrb.mxu0 %v2575_v3  ;;  %v5706_v9 = vadd.f32 %v5656_v38, %v5641_v18  ;;  %v2711_v13 = vshrl.u32 %v4188_v50, 16  ;;  %v4212_v18 = vld [vmem:[%s4577_s28 + $0x78] sm:$0xf]  ;;  %v5725_v29 = vld [vmem:[%s4577_s28 + $0x80] sm:$0x1] }
 0x15b   : > { %v3112_v25 = vunpack.c.l.b16 %v2757_v17  ;;  %v5710_v20 = vadd.f32 %v5658_v52, %v5643_v44  ;;  %v2934_v24 = vrot.slane %v2933_v57, 4  ;;  %v2714_v30 = vshll.u32 %v4188_v50, 16  ;;  %6046 = vst [vmem:[#allocation6_spill] sm:$0xff] %v5725_v29 }
 0x15c   : > { %v2944_v23 = vrot.slane %v2943_v2, 4  ;;  %v2720_v60 = vshll.u32 %v5698_v46, 16  ;;  %v2724_v39 = vshrl.u32 %v5698_v46, 16  ;;  %v2730_v16 = vshll.u32 %v5701_v15, 16  ;;  %v4259_v2 = vld [vmem:[%s4577_s28 + $0x6c] sm:$0xe] }
 0x15d   : > { %v3142_v33 = vpack.c.b16 %v3112_v25, %v3111_v1  ;;  %v2939_v38 = vsel %vm4612_vm3, %v2934_v24, %v2938_v49  ;;  %v2713_v52 = vrot.slane %v2711_v13, 4  ;;  %v2716_v34 = vrot.slane %v2714_v30, 5  ;;  %v5730_v25 = vpop.f32.mrf.mxu0 }
 0x15e   : > { %v2949_v44 = vsel %vm4612_vm3, %v2944_v23, %v2948_v14  ;;  %v3127_v26 = vunpack.c.l.b16 %v2939_v38  ;;  %v2722_v19 = vrot.slane %v2720_v60, 5  ;;  %v2726_v3 = vrot.slane %v2724_v39, 4  ;;  %v5737_v38 = vpop.f32.mrf.mxu2 }
 0x15f   : > { %v3167_v55 = vsel %vm671_vm0, %v3142_v33, 0  ;;  %v3128_v48 = vunpack.c.l.b16 %v2949_v44  ;;  %v2717_v32 = vor.u32 %v2716_v34, %v2713_v52  ;;  %v2732_v50 = vrot.slane %v2730_v16, 5  ;;  %v5739_v44 = vpop.f32.mrf.mxu3 }
 0x160   : > { %2640 = vmatpush.bf16.xpose.msrb.mxu1 %v2599_v63  ;;  %3217 = vmatpush.bf16.xpose.msrb.mxu2 %v3167_v55  ;;  %v2903_v49 = vshrl.u32 %v4212_v18, 16  ;;  %v2906_v14 = vshll.u32 %v4212_v18, 16  ;;  %v2912_v1 = vshll.u32 %v5721_v53, 16  ;;  %v2916_v57 = vshrl.u32 %v5721_v53, 16  ;;  %v5732_v63 = vpop.f32.mrf.mxu1  ;;  %v4267_v18 = vld [vmem:[%s4577_s28 + $0xcc] sm:$0xe] }
 0x161   : > { %v3150_v17 = vpack.c.b16 %v3128_v48, %v3127_v26  ;;  %v2718_v24 = vrot.slane %v2717_v32, 4  ;;  %v2727_v23 = vor.u32 %v2726_v3, %v2722_v19  ;;  %v2922_v30 = vshll.u32 %v5725_v29, 16 }
 0x162   : > { %v2905_v13 = vrot.slane %v2903_v49, 4  ;;  %v2908_v60 = vrot.slane %v2906_v14, 5  ;;  %v2914_v39 = vrot.slane %v2912_v1, 5  ;;  %v2918_v16 = vrot.slane %v2916_v57, 4  ;;  %v4433_v49 = vld [vmem:[%s4577_s28 + $0x70] sm:$0xf] }
 0x163   : > { %v3191_v33 = vsel %vm671_vm0, %v3150_v17, 0  ;;  %v2723_v52 = vsel %vm4612_vm3, %v2718_v24, %v2722_v19  ;;  %v2728_v34 = vrot.slane %v2727_v23, 4  ;;  %v2924_v55 = vrot.slane %v2922_v30, 5  ;;  %v4434_v1 = vld [vmem:[%s4577_s28 + $0x74] sm:$0x1] }
 0x164   : > { %3236 = vmatpush.bf16.xpose.msrb.mxu3 %v3191_v33  ;;  %v4275_v26 = vrot.slane %v4259_v2, 9  ;;  %v3109_v48 = vunpack.c.l.b16 %v2723_v52  ;;  %v2909_v32 = vor.u32 %v2908_v60, %v2905_v13  ;;  %v2919_v3 = vor.u32 %v2918_v16, %v2914_v39  ;;  %v4435_v33 = vld [vmem:[%s4577_s28 + $0xd0] sm:$0xf]  ;;  %v4350_v13 = vld [vmem:[%s4577_s28 + $0x24] sm:$0xff] }
 0x165   : > { %v3372_v17 = vrot.slane %v4433_v49, 5  ;;  %v2733_v14 = vsel %vm4612_vm3, %v2728_v34, %v2732_v50  ;;  %v3375_v57 = vrot.slane %v4434_v1, 5  ;;  %v4283_v29 = vrot.slane %v4267_v18, 9  ;;  %v4358_v52 = vld [vmem:[%s4577_s28 + $0x84] sm:$0xff] }
 0x166   : > { %v3428_v15 = vrot.slane %v4435_v33, 5  ;;  %v3110_v19 = vunpack.c.l.b16 %v2733_v14  ;;  %v2910_v24 = vrot.slane %v2909_v32, 4  ;;  %v2920_v23 = vrot.slane %v2919_v3, 4  ;;  %v4436_v3 = vld [vmem:[%s4577_s28 + $0xd4] sm:$0x1] }
 0x167   : > { %v3373_v2 = vsel %vm4862_vm6, %v4275_v26, %v3372_v17  ;;  %v3374_v30 = vrot.slane %v3372_v17, 4  ;;  %v3431_v49 = vrot.slane %v4436_v3, 5  ;;  %v943_v3 = vpop.f32.mrf.mxu3 }
 0x168   : > { %v3462_v60 = vunpack.c.l.b16 %v3373_v2  ;;  %v3429_v16 = vsel %vm4862_vm6, %v4283_v29, %v3428_v15  ;;  %v3430_v50 = vrot.slane %v3428_v15, 4  ;;  %v3141_v18 = vpack.c.b16 %v3110_v19, %v3109_v48  ;;  %v4258_v29 = vld [vmem:[%s4577_s28 + $0x60] sm:$0xe]  ;;  %v5767_v19 = vpop.f32.mrf.mxu1 }
 0x169   : > { %v2915_v34 = vsel %vm4612_vm3, %v2910_v24, %v2914_v39  ;;  %v2925_v32 = vsel %vm4612_vm3, %v2920_v23, %v2924_v55  ;;  %v3376_v17 = vsel %vm4862_vm6, %v3374_v30, %v3375_v57  ;;  %v3478_v1 = vunpack.c.l.b16 %v3429_v16  ;;  %v742_v55 = vpop.f32.mrf.mxu0  ;;  %v4349_v30 = vld [vmem:[%s4577_s28 + $0x18] sm:$0xff] }
 0x16a   : > { %v3125_v26 = vunpack.c.l.b16 %v2915_v34  ;;  %v3126_v14 = vunpack.c.l.b16 %v2925_v32  ;;  %v3164_v15 = vsel %vm671_vm0, %v3141_v18, 0  ;;  %v3463_v33 = vunpack.c.l.b16 %v3376_v17  ;;  %v4357_v34 = vld [vmem:[%s4577_s28 + $0x78] sm:$0xff]  ;;  %v924_v32 = vpop.f32.mrf.mxu2 }
 0x16b   : > { %v3432_v48 = vsel %vm4862_vm6, %v3430_v50, %v3431_v49  ;;  %v2572_v39 = vsel %vm671_vm0, %v4350_v13, 0  ;;  %3218 = vmatpush.bf16.xpose.msrb.mxu2 %v3164_v15  ;;  %v2596_v57 = vsel %vm671_vm0, %v4358_v52, 0  ;;  %v5772_v2 = vadd.f32 %v5691_v43, %v5682_v31 }
 0x16c   : > { %v3149_v24 = vpack.c.b16 %v3126_v14, %v3125_v26  ;;  %v3479_v23 = vunpack.c.l.b16 %v3432_v48  ;;  %2622 = vmatpush.bf16.xpose.msrb.mxu0 %v2572_v39  ;;  %v3487_v16 = vpack.c.b16 %v3463_v33, %v3462_v60  ;;  %2641 = vmatpush.bf16.xpose.msrb.mxu1 %v2596_v57  ;;  %v5777_v13 = vadd.f32 %v5693_v41, %v5684_v10  ;;  %v4367_v26 = vld [vmem:[%s6034_s1 + $0x70] sm:$0xff] }
 0x16d   : > { %v4274_v50 = vrot.slane %v4258_v29, 9  ;;  %v3365_v18 = vrot.slane %v5438_v21, 5  ;;  %v3368_v31 = vrot.slane %v5442_v47, 5  ;;  %v4282_v43 = vrot.slane %v4266_v35, 9  ;;  %v4257_v29 = vld [vmem:[%s4577_s28 + $0x54] sm:$0xe] }
 0x16e   : > { %v3188_v52 = vsel %vm671_vm0, %v3149_v24, 0  ;;  %v3495_v49 = vpack.c.b16 %v3479_v23, %v3478_v1  ;;  %v3524_v60 = vsel %vm671_vm0, %v3487_v16, 0  ;;  %v3421_v21 = vrot.slane %v5458_v11, 5  ;;  %v4265_v39 = vld [vmem:[%s4577_s28 + $0xb4] sm:$0xe] }
 0x16f   : > { %3237 = vmatpush.bf16.xpose.msrb.mxu3 %v3188_v52  ;;  %v3366_v10 = vsel %vm4862_vm6, %v4274_v50, %v3365_v18  ;;  %v3367_v41 = vrot.slane %v3365_v18, 4  ;;  %v3424_v47 = vrot.slane %v5461_v62, 5  ;;  %v2569_v1 = vsel %vm671_vm0, %v4349_v30, 0 }
 0x170   : > { %v3548_v14 = vsel %vm671_vm0, %v3495_v49, 0  ;;  %v3460_v17 = vunpack.c.l.b16 %v3366_v10  ;;  %v3422_v11 = vsel %vm4862_vm6, %v4282_v43, %v3421_v21  ;;  %v3423_v33 = vrot.slane %v3421_v21, 4 }
 0x171   : > { %v3369_v15 = vsel %vm4862_vm6, %v3367_v41, %v3368_v31  ;;  %v2593_v48 = vsel %vm671_vm0, %v4357_v34, 0  ;;  %v3476_v24 = vunpack.c.l.b16 %v3422_v11  ;;  %v5802_v23 = vadd.f32 %v5737_v38, %v5730_v25  ;;  %v1235_v31 = vpop.f32.mrf.mxu0  ;;  %v4264_v41 = vld [vmem:[%s4577_s28 + $0xa8] sm:$0xe] }
 0x172   : > { %v3461_v35 = vunpack.c.l.b16 %v3369_v15  ;;  %v5806_v62 = vadd.f32 %v5739_v44, %v5732_v63  ;;  %v3425_v57 = vsel %vm4862_vm6, %v3423_v33, %v3424_v47  ;;  %4248 = vmatmul.msk.bf16.vlgmr.msrb.gmra.mxu2 %vm671_vm0, %v4367_v26  ;;  %v4273_v30 = vrot.slane %v4257_v29, 9  ;;  %v1482_v47 = vpop.f32.mrf.mxu3 }
 0x173   : > { %4372 = vmatpush.bf16.xpose.msra.mxu2 %v3524_v60  ;;  %v3358_v16 = vrot.slane %v5494_v42, 5  ;;  %v3361_v50 = vrot.slane %v5499_v5, 5  ;;  %v3477_v34 = vunpack.c.l.b16 %v3425_v57  ;;  %v4281_v25 = vrot.slane %v4265_v39, 9  ;;  %v4256_v42 = vld [vmem:[%s4577_s28 + $0x48] sm:$0xe]  ;;  %v1254_v5 = vpop.f32.mrf.mxu1 }
 0x174   : > { %v3486_v18 = vpack.c.b16 %v3461_v35, %v3460_v17  ;;  %2623 = vmatpush.bf16.xpose.msrb.mxu0 %v2569_v1  ;;  %v3414_v38 = vrot.slane %v5515_v51, 5  ;;  %2642 = vmatpush.bf16.xpose.msrb.mxu1 %v2593_v48  ;;  %v3417_v52 = vrot.slane %v5521_v54, 5  ;;  %v5817_v49 = vadd.f32 %v924_v32, %v742_v55  ;;  %v4365_v32 = vld [vmem:[%s6034_s1 + $0x60] sm:$0xff] }
 0x175   : > { %v3359_v63 = vsel %vm4862_vm6, %v4273_v30, %v3358_v16  ;;  %v3360_v44 = vrot.slane %v3358_v16, 4  ;;  %v3494_v10 = vpack.c.b16 %v3477_v34, %v3476_v24  ;;  %v5831_v17 = vadd.f32 %v943_v3, %v5767_v19 }
 0x176   : > { %v3521_v43 = vsel %vm671_vm0, %v3486_v18, 0  ;;  %4250 = vmatmul.msk.bf16.vlgmr.msrb.gmra.mxu3 %vm671_vm0, %v4367_v26  ;;  %v3458_v51 = vunpack.c.l.b16 %v3359_v63  ;;  %v3416_v54 = vrot.slane %v3414_v38, 4  ;;  %v4272_v29 = vrot.slane %v4256_v42, 9 }
 0x177   : > { %4380 = vmatpush.bf16.xpose.msra.mxu3 %v3548_v14  ;;  %v3362_v21 = vsel %vm4862_vm6, %v3360_v44, %v3361_v50  ;;  %v3545_v26 = vsel %vm671_vm0, %v3494_v10, 0  ;;  %v3351_v15 = vrot.slane %v5537_v22, 5  ;;  %v3354_v33 = vrot.slane %v5542_v27, 5  ;;  %v4255_v27 = vld [vmem:[%s4577_s28 + $0x3c] sm:$0xe] }
 0x178   : > { %v3459_v1 = vunpack.c.l.b16 %v3362_v21  ;;  %v3418_v11 = vsel %vm4862_vm6, %v3416_v54, %v3417_v52  ;;  %v4280_v48 = vrot.slane %v4264_v41, 9  ;;  %v3407_v19 = vrot.slane %v5555_v4, 5 }
 0x179   : > { %v3475_v39 = vunpack.c.l.b16 %v3418_v11  ;;  %v3352_v35 = vsel %vm4862_vm6, %v4272_v29, %v3351_v15  ;;  %v3353_v24 = vrot.slane %v3351_v15, 4  ;;  %v3410_v16 = vrot.slane %v5559_v58, 5  ;;  %v4263_v58 = vld [vmem:[%s4577_s28 + $0x9c] sm:$0xe] }
 0x17a   : > { %v3485_v3 = vpack.c.b16 %v3459_v1, %v3458_v51  ;;  %v3456_v57 = vunpack.c.l.b16 %v3352_v35  ;;  %v3408_v22 = vsel %vm4862_vm6, %v4280_v48, %v3407_v19  ;;  %v3409_v30 = vrot.slane %v3407_v19, 4  ;;  %v1484_v1 = vpop.f32.mrf.mxu3  ;;  %v4262_v48 = vld [vmem:[%s4577_s28 + $0x90] sm:$0xe] }
 0x17b   : > { %4373 = vmatpush.bf16.xpose.msra.mxu2 %v3521_v43  ;;  %4184 = vmatmul.msk.bf16.vlgmr.msrb.gmra.mxu0 %vm671_vm0, %v4365_v32  ;;  %v3355_v18 = vsel %vm4862_vm6, %v3353_v24, %v3354_v33  ;;  %v3472_v34 = vunpack.c.l.b16 %v3408_v22  ;;  %v1264_v63 = vadd.f32 %v1235_v31, %v5706_v9  ;;  %v1265_v44 = vadd.f32 %v1254_v5, %v5710_v20  ;;  %v1237_v20 = vpop.f32.mrf.mxu0  ;;  %v1256_v31 = vpop.f32.mrf.mxu1  ;;  %v4253_v22 = vld [vmem:[%s4577_s28 + $0x24] sm:$0xe] }
 0x17c   : > { %3550 = vmatpush.bf16.xpose.msra.mxu0 %v3524_v60  ;;  %3569 = vmatpush.bf16.xpose.msra.mxu1 %v3548_v14  ;;  %v3415_v60 = vsel %vm4862_vm6, %v4281_v25, %v3414_v38  ;;  %v1463_v14 = vpop.f32.mrf.mxu2  ;;  %v3518_v50 = vsel %vm671_vm0, %v3485_v3, 0  ;;  %v3457_v25 = vunpack.c.l.b16 %v3355_v18  ;;  %v3411_v38 = vsel %vm4862_vm6, %v3409_v30, %v3410_v16 }
 0x17d   : > { %v3474_v55 = vunpack.c.l.b16 %v3415_v60  ;;  %4186 = vmatmul.msk.bf16.vlgmr.msrb.gmra.mxu1 %vm671_vm0, %v4365_v32  ;;  %v3473_v42 = vunpack.c.l.b16 %v3411_v38  ;;  %v4271_v10 = vrot.slane %v4255_v27, 9  ;;  %v3344_v51 = vrot.slane %v5572_v36, 5 }
 0x17e   : > { %v3484_v60 = vpack.c.b16 %v3457_v25, %v3456_v57  ;;  %v5860_v41 = vadd.f32 %v1463_v14, %v1264_v63  ;;  %v5862_v21 = vadd.f32 %v1482_v47, %v1265_v44  ;;  %v3347_v9 = vrot.slane %v5577_v7, 5 }
 0x17f   : > { %4381 = vmatpush.bf16.xpose.msra.mxu3 %v3545_v26  ;;  %v3493_v4 = vpack.c.b16 %v3475_v39, %v3474_v55  ;;  %v3345_v5 = vsel %vm4862_vm6, %v4271_v10, %v3344_v51  ;;  %v3346_v54 = vrot.slane %v3344_v51, 4  ;;  %v4279_v36 = vrot.slane %v4263_v58, 9  ;;  %v4254_v55 = vld [vmem:[%s4577_s28 + $0x30] sm:$0xe] }
 0x180   : > { %v5869_v32 = vsel %vm671_vm0, %v3484_v60, 0  ;;  %v3492_v14 = vpack.c.b16 %v3473_v42, %v3472_v34  ;;  %v3400_v47 = vrot.slane %v5588_v59, 5  ;;  %v3454_v15 = vunpack.c.l.b16 %v3345_v5  ;;  %v4261_v60 = vld [vmem:[%s4577_s28 + $0x84] sm:$0xe] }
 0x181   : > { %v3542_v52 = vsel %vm671_vm0, %v3493_v4, 0  ;;  %v3348_v29 = vsel %vm4862_vm6, %v3346_v54, %v3347_v9  ;;  %v1266_v11 = vadd.f32 %v1237_v20, %v5772_v2  ;;  %v1267_v33 = vadd.f32 %v1256_v31, %v5777_v13 }
 0x182   : > { %v3455_v19 = vunpack.c.l.b16 %v3348_v29  ;;  %v3401_v59 = vsel %vm4862_vm6, %v4279_v36, %v3400_v47  ;;  %v3402_v3 = vrot.slane %v3400_v47, 4  ;;  %v3337_v57 = vrot.slane %v5611_v12, 5  ;;  %v1487_v5 = vpop.f32.mrf.mxu3 }
 0x183   : > { %4374 = vmatpush.bf16.xpose.msra.mxu2 %v3518_v50  ;;  %v3470_v39 = vunpack.c.l.b16 %v3401_v59  ;;  %v5883_v24 = vadd.f32 %v1484_v1, %v1267_v33  ;;  %v3539_v2 = vsel %vm671_vm0, %v3492_v14, 0  ;;  %v3340_v30 = vrot.slane %v5616_v28, 5 }
 0x184   : > { %3551 = vmatpush.bf16.xpose.msra.mxu0 %v3521_v43  ;;  %3570 = vmatpush.bf16.xpose.msra.mxu1 %v3545_v26  ;;  %v4368_v43 = vld [vmem:[%s6034_s1 + $0x78] sm:$0xff]  ;;  %v3403_v26 = vrot.slane %v5597_v6, 5  ;;  %v1465_v7 = vpop.f32.mrf.mxu2  ;;  %v4270_v6 = vrot.slane %v4254_v55, 9  ;;  %v4278_v16 = vrot.slane %v4262_v48, 9  ;;  %v3339_v18 = vrot.slane %v3337_v57, 4 }
 0x185   : > { %4249 = vmatmul.msk.bf16.gmra.mxu2 %vm671_vm0, %v4368_v43  ;;  %v5881_v35 = vadd.f32 %v1465_v7, %v1266_v11  ;;  %v3393_v12 = vrot.slane %v5629_v61, 5  ;;  %v3483_v34 = vpack.c.b16 %v3455_v19, %v3454_v15  ;;  %v3396_v28 = vrot.slane %v5633_v40, 5  ;;  %v1240_v40 = vpop.f32.mrf.mxu0  ;;  %v4252_v48 = vld [vmem:[%s4577_s28 + $0x18] sm:$0xe] }
 0x186   : > { %v3404_v13 = vsel %vm4862_vm6, %v3402_v3, %v3403_v26  ;;  %4251 = vmatmul.msk.bf16.gmra.mxu3 %vm671_vm0, %v4368_v43  ;;  %v3338_v4 = vsel %vm4862_vm6, %v4270_v6, %v3337_v57  ;;  %v4269_v38 = vrot.slane %v4253_v22, 9  ;;  %v3341_v44 = vsel %vm4862_vm6, %v3339_v18, %v3340_v30  ;;  %v1259_v43 = vpop.f32.mrf.mxu1 }
 0x187   : > { %4382 = vmatpush.bf16.xpose.msra.mxu3 %v3542_v52  ;;  %v3471_v27 = vunpack.c.l.b16 %v3404_v13  ;;  %v3452_v25 = vunpack.c.l.b16 %v3338_v4  ;;  %v3394_v58 = vsel %vm4862_vm6, %v4278_v16, %v3393_v12  ;;  %v3395_v61 = vrot.slane %v3393_v12, 4  ;;  %v4260_v16 = vld [vmem:[%s4577_s28 + $0x78] sm:$0xe]  ;;  %s4453_s28 = scalar_lea.hbm %s4452_s30, 64 }
 0x188   : > { %v3468_v42 = vunpack.c.l.b16 %v3394_v58  ;;  %v3330_v10 = vrot.slane %v5649_v45, 5  ;;  %v3333_v51 = vrot.slane %v5654_v37, 5  ;;  %v3386_v20 = vrot.slane %v5669_v8, 5  ;;  %p4454_p11 = scmp.ne.s32.totalorder %s4452_s30, %s4453_s28  ;;  %p4459_p1 = scmp.lt.s32.totalorder %s4457_s6, %s4453_s28 }
 0x189   : > { %v3491_v63 = vpack.c.b16 %v3471_v27, %v3470_v39  ;;  %v3397_v9 = vsel %vm4862_vm6, %v3395_v61, %v3396_v28  ;;  %v4277_v14 = vrot.slane %v4261_v60, 9  ;;  %v3512_v47 = vsel %vm671_vm0, %v3483_v34, 0  ;;  %v3599_v60 = vld [vmem:[%s6035_s2 + $0x18] sm:$0xff] }
 0x18a   : > { %v3469_v36 = vunpack.c.l.b16 %v3397_v9  ;;  %v3331_v55 = vsel %vm4862_vm6, %v4269_v38, %v3330_v10  ;;  %v3332_v45 = vrot.slane %v3330_v10, 4  ;;  %v3388_v29 = vrot.slane %v3386_v20, 4  ;;  %v1489_v13 = vpop.f32.mrf.mxu3  ;;  %p4455_p12 = pnand %p4454_p11, %p4562_p5  ;;  %p4460_p2 = por %p4459_p1, %p4458_p0 }
 0x18b   : > { %4375 = vmatpush.bf16.xpose.msra.mxu2 %v5869_v32  ;;  %v3450_v37 = vunpack.c.l.b16 %v3331_v55  ;;  %v3536_v7 = vsel %vm671_vm0, %v3491_v63, 0  ;;  %v3389_v15 = vrot.slane %v5675_v56, 5  ;;  %v3387_v33 = vsel %vm4862_vm6, %v4277_v14, %v3386_v20  ;;  %v3597_v20 = vld [vmem:[%s6035_s2 + $0x8] sm:$0xff]  ;;  %v4369_v14 = vld [vmem:[%s6034_s1 + $0x80] sm:$0xff] }
 0x18c   : > { %3552 = vmatpush.bf16.xpose.msra.mxu0 %v3518_v50  ;;  %3571 = vmatpush.bf16.xpose.msra.mxu1 %v3542_v52  ;;  %v4366_v50 = vld [vmem:[%s6034_s1 + $0x68] sm:$0xff]  ;;  %v3453_v52 = vunpack.c.l.b16 %v3341_v44  ;;  %v1468_v31 = vpop.f32.mrf.mxu2  ;;  %v3490_v8 = vpack.c.b16 %v3469_v36, %v3468_v42  ;;  %v3334_v26 = vsel %vm4862_vm6, %v3332_v45, %v3333_v51  ;;  %v3323_v6 = vrot.slane %v5698_v46, 5  ;;  %p4456_p13 = pneg %p4455_p12 }
 0x18d   : > { %4185 = vmatmul.msk.bf16.gmra.mxu0 %vm671_vm0, %v4366_v50  ;;  %4187 = vmatmul.msk.bf16.gmra.mxu1 %vm671_vm0, %v4366_v50  ;;  %v3451_v1 = vunpack.c.l.b16 %v3334_v26  ;;  %v1242_v19 = vpop.f32.mrf.mxu0  ;;  %v3390_v3 = vsel %vm4862_vm6, %v3388_v29, %v3389_v15  ;;  %v3466_v56 = vunpack.c.l.b16 %v3387_v33  ;;  %v3379_v57 = vrot.slane %v5721_v53, 5  ;;  %v3598_v53 = vld [vmem:[%s6035_s2 + $0x10] sm:$0xff]  ;;  %v6047_v50 = vld [vmem:[#allocation5_spill] sm:$0xff]  ;;  %v6048_v44 = vld [vmem:[#allocation6_spill] sm:$0xff] }
 0x18e   : > { %v3482_v54 = vpack.c.b16 %v3453_v52, %v3452_v25  ;;  %v1261_v59 = vpop.f32.mrf.mxu1  ;;  %v1269_v22 = vadd.f32 %v1259_v43, %v5806_v62  ;;  %v4268_v30 = vrot.slane %v4252_v48, 9  ;;  %v3533_v18 = vsel %vm671_vm0, %v3490_v8, 0  ;;  %v3596_v62 = vld [vmem:[%s6035_s2] sm:$0xff]  ;;  %p4461_p3 = pnand %p4460_p2, %p4456_p13 }
 0x18f   : > { %4383 = vmatpush.bf16.xpose.msra.mxu3 %v3539_v2  ;;  %v3481_v11 = vpack.c.b16 %v3451_v1, %v3450_v37  ;;  %v1271_v4 = vadd.f32 %v1261_v59, %v5831_v17  ;;  %v3467_v46 = vunpack.c.l.b16 %v3390_v3  ;;  %v3325_v34 = vrot.slane %v3323_v6, 4  ;;  %v4370_v37 = vld [vmem:[%s6034_s1 + $0x88] sm:$0xff] }
 0x190   : > { %v3509_v39 = vsel %vm671_vm0, %v3482_v54, 0  ;;  %v5936_v12 = vadd.f32 %v1487_v5, %v1269_v22  ;;  %v4501_v28 = vmov 0   ;;  %v4276_v38 = vrot.slane %v4260_v16, 9 }
 0x191   : > { %v5947_v17 = vadd.f32 %v1489_v13, %v1271_v4  ;;  %4432 = vset.pattern.permute.xlu1 %v4501_v28  ;;  %v3381_v63 = vrot.slane %v3379_v57, 4  ;;  %v3382_v58 = vrot.slane %v6048_v44, 5  ;;  %4431 = vset.pattern.permute.xlu0 %v4501_v28  ;;  %v3489_v61 = vpack.c.b16 %v3467_v46, %v3466_v56 }
 0x192   : > { %3612 = vperm.xlu1 %4432, %v3598_v53   ;;  %3602 = vperm.xlu0 %4431, %v3596_v62   ;;  %v3324_v52 = vsel %vm4862_vm6, %v4268_v30, %v3323_v6  ;;  %v3380_v10 = vsel %vm4862_vm6, %v4276_v38, %v3379_v57 }
 0x193   : > { %4376 = vmatpush.bf16.xpose.msra.mxu2 %v3512_v47  ;;  %v3383_v51 = vsel %vm4862_vm6, %v3381_v63, %v3382_v58  ;;  %v3448_v43 = vunpack.c.l.b16 %v3324_v52  ;;  %v3464_v5 = vunpack.c.l.b16 %v3380_v10 }
 0x194   : > { %3553 = vmatpush.bf16.xpose.msra.mxu0 %v5869_v32  ;;  %3572 = vmatpush.bf16.xpose.msra.mxu1 %v3539_v2  ;;  %v1268_v32 = vadd.f32 %v1240_v40, %v5802_v23  ;;  %v1470_v2 = vpop.f32.mrf.mxu2  ;;  %v1270_v23 = vadd.f32 %v1242_v19, %v5817_v49  ;;  %v3326_v49 = vrot.slane %v6047_v50, 5  ;;  %v3506_v40 = vsel %vm671_vm0, %v3481_v11, 0 }
 0x195   : > { %v3465_v54 = vunpack.c.l.b16 %v3383_v51 }
 0x196   : > { %v5931_v27 = vadd.f32 %v1468_v31, %v1268_v32  ;;  %v5945_v25 = vadd.f32 %v1470_v2, %v1270_v23  ;;  %v3327_v42 = vsel %vm4862_vm6, %v3325_v34, %v3326_v49  ;;  %v3530_v31 = vsel %vm671_vm0, %v3489_v61, 0 }
 0x197   : > { %4384 = vmatpush.bf16.xpose.msra.mxu3 %v3536_v7  ;;  %v3449_v9 = vunpack.c.l.b16 %v3327_v42  ;;  %v3488_v36 = vpack.c.b16 %v3465_v54, %v3464_v5 }
 0x199   : > { %v3480_v0 = vpack.c.b16 %v3449_v9, %v3448_v43  ;;  %v3527_v45 = vsel %vm671_vm0, %v3488_v36, 0 }
 0x19a   : > { %3617 = vperm.xlu1 %4432, %v3599_v60   ;;  %3607 = vperm.xlu0 %4431, %v3597_v20  }
 0x19b   : > { %4377 = vmatpush.bf16.xpose.msra.mxu2 %v3509_v39  ;;  %v3503_v55 = vsel %vm671_vm0, %v3480_v0, 0 }
 0x19c   : > { %3554 = vmatpush.bf16.xpose.msra.mxu0 %v3512_v47  ;;  %3573 = vmatpush.bf16.xpose.msra.mxu1 %v3536_v7  ;;  %v2397_v26 = vpop.f32.mrf.mxu2  ;;  %v2416_v7 = vpop.f32.mrf.mxu3 }
 0x19f   : > { %4385 = vmatpush.bf16.xpose.msra.mxu3 %v3533_v18 }
 0x1a3   : > { %4378 = vmatpush.bf16.xpose.msra.mxu2 %v3506_v40 }
 0x1a4   : > { %3555 = vmatpush.bf16.xpose.msra.mxu0 %v3509_v39  ;;  %3574 = vmatpush.bf16.xpose.msra.mxu1 %v3533_v18  ;;  %v2399_v15 = vpop.f32.mrf.mxu2  ;;  %v2418_v11 = vpop.f32.mrf.mxu3 }
 0x1a7   : > { %4386 = vmatpush.bf16.xpose.msra.mxu3 %v3530_v31 }
 0x1ab   : > { %4379 = vmatpush.bf16.xpose.msra.mxu2 %v3503_v55 }
 0x1ac   : > { %3556 = vmatpush.bf16.xpose.msra.mxu0 %v3506_v40  ;;  %3575 = vmatpush.bf16.xpose.msra.mxu1 %v3530_v31  ;;  %v2402_v32 = vpop.f32.mrf.mxu2  ;;  %v2421_v19 = vpop.f32.mrf.mxu3 }
 0x1ae   : > { %v2058_v47 = vpop.f32.mrf.mxu0 }
 0x1af   : > { %4387 = vmatpush.bf16.xpose.msra.mxu3 %v3527_v45  ;;  %v2087_v62 = vadd.f32 %v2058_v47, %v5860_v41 }
 0x1b1   : > { %v2426_v38 = vadd.f32 %v2397_v26, %v2087_v62 }
 0x1b2   : > { %4297 = vmatmul.msk.bf16.vlgmr.msra.gmra.mxu2 %vm671_vm0, %v4370_v37 }
 0x1b4   : > { %3557 = vmatpush.bf16.xpose.msra.mxu0 %v3503_v55  ;;  %3576 = vmatpush.bf16.xpose.msra.mxu1 %v3527_v45  ;;  %v2077_v8 = vpop.f32.mrf.mxu1  ;;  %v2404_v6 = vpop.f32.mrf.mxu2 }
 0x1b5   : > { %v2423_v39 = vpop.f32.mrf.mxu3  ;;  %v2088_v34 = vadd.f32 %v2077_v8, %v5862_v21 }
 0x1b6   : > { %4299 = vmatmul.msk.bf16.vlgmr.msra.gmra.mxu3 %vm671_vm0, %v4370_v37  ;;  %v2060_v1 = vpop.f32.mrf.mxu0 }
 0x1b7   : > { %v2427_v58 = vadd.f32 %v2416_v7, %v2088_v34  ;;  %v2089_v41 = vadd.f32 %v2060_v1, %v5881_v35 }
 0x1b9   : > { %v2428_v0 = vadd.f32 %v2399_v15, %v2089_v41 }
 0x1bb   : > { %4296 = vmatmul.msk.bf16.vlgmr.msra.gmra.mxu0 %vm671_vm0, %v4369_v14  ;;  %4298 = vmatmul.msk.bf16.vlgmr.msra.gmra.mxu1 %vm671_vm0, %v4369_v14 }
 0x1bc   : > { %v2079_v29 = vpop.f32.mrf.mxu1 }
 0x1bd   : > { %v2090_v21 = vadd.f32 %v2079_v29, %v5883_v24 }
 0x1be   : > { %v2063_v33 = vpop.f32.mrf.mxu0 }
 0x1bf   : > { %v2091_v50 = vadd.f32 %v2063_v33, %v5931_v27  ;;  %v2429_v37 = vadd.f32 %v2418_v11, %v2090_v21 }
 0x1c1   : > { %v2430_v61 = vadd.f32 %v2402_v32, %v2091_v50 }
 0x1c4   : > { %v2082_v48 = vpop.f32.mrf.mxu1 }
 0x1c5   : > { %v2092_v49 = vadd.f32 %v2082_v48, %v5936_v12 }
 0x1c6   : > { %v2065_v59 = vpop.f32.mrf.mxu0 }
 0x1c7   : > { %v2431_v42 = vadd.f32 %v2421_v19, %v2092_v49  ;;  %v2093_v27 = vadd.f32 %v2065_v59, %v5945_v25 }
 0x1c9   : > { %v2432_v14 = vadd.f32 %v2404_v6, %v2093_v27 }
 0x1cc   : > { %v2084_v3 = vpop.f32.mrf.mxu1 }
 0x1cd   : > { %v2094_v12 = vadd.f32 %v2084_v3, %v5947_v17 }
 0x1cf   : > { %v2433_v17 = vadd.f32 %v2423_v39, %v2094_v12 }
 0x1f5   : > { %v3220_v22 = vpop.f32.mrf.mxu2 }
 0x1f8   : > { %v2625_v56 = vpop.f32.mrf.mxu0 }
 0x1f9   : > { %v3239_v2 = vpop.f32.mrf.mxu3  ;;  %v2654_v10 = vadd.f32 %v2625_v56, %v2426_v38 }
 0x1fa   : > { %v2644_v57 = vpop.f32.mrf.mxu1 }
 0x1fb   : > { %v2655_v51 = vadd.f32 %v2644_v57, %v2427_v58  ;;  %v3249_v43 = vadd.f32 %v3220_v22, %v2654_v10 }
 0x1fd   : > { %v3222_v16 = vpop.f32.mrf.mxu2  ;;  %v3250_v20 = vadd.f32 %v3239_v2, %v2655_v51 }
 0x200   : > { %v2627_v13 = vpop.f32.mrf.mxu0 }
 0x201   : > { %v3241_v23 = vpop.f32.mrf.mxu3  ;;  %v2656_v8 = vadd.f32 %v2627_v13, %v2428_v0 }
 0x202   : > { %v2646_v30 = vpop.f32.mrf.mxu1 }
 0x203   : > { %v2657_v1 = vadd.f32 %v2646_v30, %v2429_v37  ;;  %v3251_v3 = vadd.f32 %v3222_v16, %v2656_v8 }
 0x204   : > { %v3613_v9 = vpop.permute.xlu1 %3612  ;;  %v3603_v5 = vpop.permute.xlu0 %3602 }
 0x205   : > { %v3252_v39 = vadd.f32 %v3241_v23, %v2657_v1 }
 0x208   : > { %v3225_v46 = vpop.f32.mrf.mxu2 }
 0x209   : > { %v3244_v53 = vpop.f32.mrf.mxu3 }
 0x20a   : > { %v2630_v4 = vpop.f32.mrf.mxu0  ;;  %v2649_v18 = vpop.f32.mrf.mxu1 }
 0x20b   : > { %v2658_v60 = vadd.f32 %v2630_v4, %v2430_v61  ;;  %v2659_v40 = vadd.f32 %v2649_v18, %v2431_v42 }
 0x20c   : > { %v3608_v16 = vpop.permute.xlu0 %3607  ;;  %v3618_v23 = vpop.permute.xlu1 %3617 }
 0x20d   : > { %v3253_v31 = vadd.f32 %v3225_v46, %v2658_v60  ;;  %v3254_v36 = vadd.f32 %v3244_v53, %v2659_v40 }
 0x210   : > { %v3227_v44 = vpop.f32.mrf.mxu2 }
 0x211   : > { %v3246_v52 = vpop.f32.mrf.mxu3 }
 0x212   : > { %v2632_v28 = vpop.f32.mrf.mxu0  ;;  %v2651_v63 = vpop.f32.mrf.mxu1 }
 0x213   : > { %v2660_v29 = vadd.f32 %v2632_v28, %v2432_v14  ;;  %v2661_v48 = vadd.f32 %v2651_v63, %v2433_v17 }
 0x215   : > { %v3255_v56 = vadd.f32 %v3227_v44, %v2660_v29  ;;  %v3256_v22 = vadd.f32 %v3246_v52, %v2661_v48 }
 0x235   : > { %v3564_v55 = vpop.f32.mrf.mxu2 }
 0x236   : > { %v3592_v24 = vadd.f32 %v3564_v55, %v3253_v31 }
 0x238   : > { %v3559_v54 = vpop.f32.mrf.mxu0  ;;  %v3578_v35 = vpop.f32.mrf.mxu1  ;;  %v3624_v33 = vadd.f32 %v3613_v9, %v3592_v24 }
 0x239   : > { %v3588_v45 = vadd.f32 %v3559_v54, %v3249_v43  ;;  %v3583_v25 = vpop.f32.mrf.mxu3  ;;  %v3589_v47 = vadd.f32 %v3578_v35, %v3250_v20 }
 0x23a   : > { %v3593_v26 = vadd.f32 %v3583_v25, %v3254_v36  ;;  %v3632_v59 = vmax.f32 %v3624_v33, 0.0 }
 0x23b   : > { %v3620_v7 = vadd.f32 %v3603_v5, %v3588_v45  ;;  %v3621_v15 = vadd.f32 %v3603_v5, %v3589_v47 }
 0x23c   : > { %v3625_v32 = vadd.f32 %v3613_v9, %v3593_v26  ;;  %3640 = vst [vmem:[%s5989_s19 + $0x20] sm:$0xff] %v3632_v59 }
 0x23d   : > { %v3628_v19 = vmax.f32 %v3620_v7, 0.0  ;;  %v3629_v11 = vmax.f32 %v3621_v15, 0.0  ;;  %v3566_v2 = vpop.f32.mrf.mxu2 }
 0x23e   : > { %v3633_v6 = vmax.f32 %v3625_v32, 0.0  ;;  %v3594_v4 = vadd.f32 %v3566_v2, %v3255_v56 }
 0x23f   : > { %3636 = vst [vmem:[%s5989_s19] sm:$0xff] %v3628_v19 }
 0x240   : > { %v3561_v57 = vpop.f32.mrf.mxu0  ;;  %3641 = vst [vmem:[%s5989_s19 + $0x28] sm:$0xff] %v3633_v6  ;;  %v3580_v30 = vpop.f32.mrf.mxu1  ;;  %v3626_v34 = vadd.f32 %v3618_v23, %v3594_v4 }
 0x241   : > { %v3590_v13 = vadd.f32 %v3561_v57, %v3251_v3  ;;  %3637 = vst [vmem:[%s5989_s19 + $0x8] sm:$0xff] %v3629_v11  ;;  %v3585_v18 = vpop.f32.mrf.mxu3  ;;  %v3591_v46 = vadd.f32 %v3580_v30, %v3252_v39 }
 0x242   : > { %v3595_v53 = vadd.f32 %v3585_v18, %v3256_v22  ;;  %v3634_v38 = vmax.f32 %v3626_v34, 0.0 }
 0x243   : > { %v3622_v62 = vadd.f32 %v3608_v16, %v3590_v13  ;;  %v3623_v50 = vadd.f32 %v3608_v16, %v3591_v46 }
 0x244   : > { %v3627_v49 = vadd.f32 %v3618_v23, %v3595_v53  ;;  %3642 = vst [vmem:[%s5989_s19 + $0x30] sm:$0xff] %v3634_v38 }
 0x245   : > { %v3630_v28 = vmax.f32 %v3622_v62, 0.0  ;;  %v3631_v63 = vmax.f32 %v3623_v50, 0.0 }
 0x246   : > { %v3635_v44 = vmax.f32 %v3627_v49, 0.0 }
 0x247   : > { %3638 = vst [vmem:[%s5989_s19 + $0x10] sm:$0xff] %v3630_v28 }
 0x248   : > { %3643 = vst [vmem:[%s5989_s19 + $0x38] sm:$0xff] %v3635_v44 }
 0x249   : > { %3639 = vst [vmem:[%s5989_s19 + $0x18] sm:$0xff] %v3631_v63 }
 0x24a   : > { %4464 = shalt.err (!%p4461_p3)
}
 0x24b   : > { %s4502_s9 = smov 256   ;;  %s4503_s10 = smov 16  }
 0x24c   : > { %4389 = dma.vmem_to_hbm [thread:$0]  (%p4562_p5), %s3658_s26, 1024, %s3660_s27, %s3645_s29, %s4502_s9, %s4502_s9, %s4503_s10  }
 0x24d PF: > { %p4395_p4 = scmp.ge.s32.totalorder %s4499_s15, 2  ;;  %s3674_s11 = sand.u32 1, %s4487_s12  }
 0x24e   : > { %s3675_s17 = scalar_lea.sflag [#allocation3], %s3674_s11 }
 0x24f   : > { %p4392_p7 = pnand %p4395_p4, %p4566_p6 }
 0x251   : > { %p4393_p8 = pneg %p4392_p7 }
 0x253   : > { %4482 = dma.done.wait (%p4393_p8), %s3675_s17, 1024  }
 0x254   : > { %4484 = vsyncadd (%p4393_p8), %s3675_s17, 4294966272  ;;  %p13_p9 = scmp.ge.s32.totalorder %s4549_s18, 4   ;;  %s6049_s12 = smov %s4491_s13 }
 0x255   : > { %s6050_s13 = smov %s4495_s14  ;;  %s6051_s14 = smov %s4560_s21 }
 0x256   : > { %s6052_s15 = smov %s4549_s18  ;;  %15 = sbr.rel (!%p13_p9) target bundleno = 3 (0x3), region = 77 }
 0x25b   :  { %3681 = vsyncpa [#allocation3], 1 }
 0x25c   :  { %3683 = vsyncpa [#allocation3 + $0x1], 1 }

</bundles_post_ra>
